<compile_context>
chip_gen: v7x
topology: tpu7x:2x2x1
jax: 0.10.0
libtpu: 0.0.40
codegen_flags: <defaults>
</compile_context>

<pallas_src>
import functools

import jax
import jax.numpy as jnp
from jax import lax
from jax.experimental import pallas as pl
from jax.experimental.pallas import tpu as pltpu

LN_EPS = 1e-5  # PyTorch nn.LayerNorm default


# ----------------------------- in-kernel helpers -----------------------------

def _layer_norm(y, gamma, beta):
    # One-pass statistics: var = E[y^2] - mean^2 (single lane-reduction pass each).
    mean = jnp.mean(y, axis=-1, keepdims=True)
    msq = jnp.mean(y * y, axis=-1, keepdims=True)
    var = msq - mean * mean
    return (y - mean) * lax.rsqrt(var + LN_EPS) * gamma + beta


def _mlp_tail(h0, w1, b1, w2, b2, gamma, beta):
    """ReLU -> Linear -> ReLU -> Linear -> LayerNorm, given pre-activation h0."""
    h = jnp.maximum(h0, 0.0)
    h = jnp.maximum(jnp.dot(h, w1, preferred_element_type=jnp.float32) + b1, 0.0)
    y = jnp.dot(h, w2, preferred_element_type=jnp.float32) + b2
    return _layer_norm(y, gamma, beta)


# --------------------------------- kernel ------------------------------------

def _gnb_kernel(
    # inputs
    send_ref, recv_ref,                       # [TILE_E, 1] int32 index columns
    node_ref, edge_ref,                       # [N, D] resident, [TILE_E, D] tile
    ew0s_ref, ew0r_ref, ew0e_ref, eb0_ref,    # edge MLP layer 0 (split)
    ew1_ref, eb1_ref, ew2_ref, eb2_ref, eg_ref, ebt_ref,
    nw0n_ref, nw0seg_ref, nb0_ref,            # node MLP layer 0 (split)
    nw1_ref, nb1_ref, nw2_ref, nb2_ref, ng_ref, nbt_ref,
    # outputs
    edge_out_ref, node_out_ref,
    # scratch
    seg_ref,                                  # [N, D] resident segment-sum slab
):
    t = pl.program_id(0)
    tile_e, d = edge_ref.shape
    n_nodes = node_ref.shape[0]

    # ---- first tile: zero the resident segment-sum accumulator ---------------
    @pl.when(t == 0)
    def _init():
        seg_ref[...] = jnp.zeros_like(seg_ref)

    node = node_ref[...]
    edge = edge_ref[...]

    # ---- vectorized one-hot gather (MXU) --------------------------------------
    # Padded edges carry index == n_nodes -> all-zero one-hot row -> zero
    # gathered row and zero contribution to the segment sum.
    iota_n = lax.broadcasted_iota(jnp.int32, (tile_e, n_nodes), 1)
    oh_s = (send_ref[...] == iota_n).astype(jnp.float32)   # [TILE_E, N]
    oh_r = (recv_ref[...] == iota_n).astype(jnp.float32)   # [TILE_E, N]

    sender = jnp.dot(oh_s, node, preferred_element_type=jnp.float32)  # [TILE_E, D]
    recver = jnp.dot(oh_r, node, preferred_element_type=jnp.float32)  # [TILE_E, D]

    # ---- edge MLP: layer 0 on the *virtual* concat [sender || recv || edge] ---
    h0 = (jnp.dot(sender, ew0s_ref[...], preferred_element_type=jnp.float32)
          + jnp.dot(recver, ew0r_ref[...], preferred_element_type=jnp.float32)
          + jnp.dot(edge, ew0e_ref[...], preferred_element_type=jnp.float32)
          + eb0_ref[...])
    y = _mlp_tail(h0, ew1_ref[...], eb1_ref[...], ew2_ref[...], eb2_ref[...],
                  eg_ref[...], ebt_ref[...])                         # [TILE_E, D]

    edge_out_ref[...] = y + edge                 # edge residual connection

    # ---- MXU segment sum: seg[n, :] += sum_e oh_r[e, n] * y[e, :] --------------
    seg_ref[...] = seg_ref[...] + lax.dot_general(
        oh_r, y, dimension_numbers=(((0,), (0,)), ((), ())),
        preferred_element_type=jnp.float32)

    # ---- last tile: node MLP on virtual concat [node || seg_sum] + residual ---
    @pl.when(t == pl.num_programs(0) - 1)
    def _finalize():
        hn0 = (jnp.dot(node, nw0n_ref[...], preferred_element_type=jnp.float32)
               + jnp.dot(seg_ref[...], nw0seg_ref[...],
                         preferred_element_type=jnp.float32)
               + nb0_ref[...])
        yn = _mlp_tail(hn0, nw1_ref[...], nb1_ref[...], nw2_ref[...],
                       nb2_ref[...], ng_ref[...], nbt_ref[...])
        node_out_ref[...] = yn + node            # node residual connection


# --------------------------------- wrapper -----------------------------------

def _full_spec(shape):
    """Resident (untiled) operand: full-shape block, constant index map."""
    nd = len(shape)
    return pl.BlockSpec(shape, lambda t, *_: (0,) * nd)


def graph_net_block(node_features, edge_features, senders, receivers, params,
                    *, tile_e=256):
    """One GraphNetBlock forward pass -> (new_node_features, new_edge_features)."""
    n, d = node_features.shape
    e, d2 = edge_features.shape
    assert d2 == d
    pe, pn = params["edge"], params["node"]
    latent = pe["w1"].shape[0]

    # Pad the edge set to a multiple of the tile size.  Padded index rows get the
    # out-of-range value `n` (all-zero one-hot -> inert); padded edge-output rows
    # are sliced off below.
    e_pad = max(tile_e, ((e + tile_e - 1) // tile_e) * tile_e)
    pad = e_pad - e
    edge_p = jnp.pad(edge_features, ((0, pad), (0, 0)))
    send_p = jnp.pad(senders.astype(jnp.int32), (0, pad),
                     constant_values=n).reshape(e_pad, 1)
    recv_p = jnp.pad(receivers.astype(jnp.int32), (0, pad),
                     constant_values=n).reshape(e_pad, 1)
    num_tiles = e_pad // tile_e

    # Split layer-0 weights so the concats never materialize.
    ew0_s, ew0_r, ew0_e = pe["w0"][:d], pe["w0"][d:2 * d], pe["w0"][2 * d:]
    nw0_n, nw0_seg = pn["w0"][:d], pn["w0"][d:]

    idx_spec = pl.BlockSpec((tile_e, 1), lambda t, *_: (t, 0))
    edge_spec = pl.BlockSpec((tile_e, d), lambda t, *_: (t, 0))

    in_specs = [
        idx_spec, idx_spec,                                   # senders, receivers
        _full_spec((n, d)),                                   # node table (resident)
        edge_spec,                                            # edge feature tile
        # edge MLP (resident weights)
        _full_spec((d, latent)), _full_spec((d, latent)), _full_spec((d, latent)),
        _full_spec((1, latent)),
        _full_spec((latent, latent)), _full_spec((1, latent)),
        _full_spec((latent, d)), _full_spec((1, d)),
        _full_spec((1, d)), _full_spec((1, d)),
        # node MLP (resident weights)
        _full_spec((d, latent)), _full_spec((d, latent)), _full_spec((1, latent)),
        _full_spec((latent, latent)), _full_spec((1, latent)),
        _full_spec((latent, d)), _full_spec((1, d)),
        _full_spec((1, d)), _full_spec((1, d)),
    ]
    out_specs = [
        edge_spec,                                            # new edge features
        _full_spec((n, d)),                                   # new node features
    ]

    grid_spec = pltpu.PrefetchScalarGridSpec(
        num_scalar_prefetch=0,
        grid=(num_tiles,),
        in_specs=in_specs,
        out_specs=out_specs,
        scratch_shapes=[
            pltpu.VMEM((n, d), jnp.float32),    # resident segment-sum slab
        ],
    )

    edge_out, node_out = pl.pallas_call(
        _gnb_kernel,
        grid_spec=grid_spec,
        out_shape=(jax.ShapeDtypeStruct((e_pad, d), jnp.float32),
                   jax.ShapeDtypeStruct((n, d), jnp.float32)),
        compiler_params=pltpu.CompilerParams(
            # The edge-tile axis carries the segment-sum accumulation.
            dimension_semantics=("arbitrary",),
        ),
    )(send_p, recv_p,
      node_features, edge_p,
      ew0_s, ew0_r, ew0_e, pe["b0"], pe["w1"], pe["b1"], pe["w2"], pe["b2"],
      pe["ln_g"], pe["ln_b"],
      nw0_n, nw0_seg, pn["b0"], pn["w1"], pn["b1"], pn["w2"], pn["b2"],
      pn["ln_g"], pn["ln_b"])

    return node_out, edge_out[:e]


# ------------------------- parameter construction ---------------------------

def _linear(key, fan_in, fan_out):
    kw, kb = jax.random.split(key)
    bound = 1.0 / jnp.sqrt(fan_in)
    w = jax.random.uniform(kw, (fan_in, fan_out), jnp.float32, -bound, bound)
    b = jax.random.uniform(kb, (1, fan_out), jnp.float32, -bound, bound)
    return w, b


def make_params(key, d, latent):
    ks = jax.random.split(key, 6)
    ew0, eb0 = _linear(ks[0], 3 * d, latent)   # edge MLP in = sender||recv||edge
    ew1, eb1 = _linear(ks[1], latent, latent)
    ew2, eb2 = _linear(ks[2], latent, d)
    nw0, nb0 = _linear(ks[3], 2 * d, latent)   # node MLP in = node||seg_sum
    nw1, nb1 = _linear(ks[4], latent, latent)
    nw2, nb2 = _linear(ks[5], latent, d)
    ones = jnp.ones((1, d), jnp.float32)
    zeros = jnp.zeros((1, d), jnp.float32)
    return {
        "edge": dict(w0=ew0, b0=eb0, w1=ew1, b1=eb1, w2=ew2, b2=eb2,
                     ln_g=ones, ln_b=zeros),
        "node": dict(w0=nw0, b0=nb0, w1=nw1, b1=nb1, w2=nw2, b2=nb2,
                     ln_g=ones, ln_b=zeros),
    }


# ----------------------------- pure-JAX reference ---------------------------

def _mlp_ref(x, w0, b0, w1, b1, w2, b2, g, beta):
    hp = jax.lax.Precision.HIGHEST
    h = jnp.maximum(jnp.dot(x, w0, precision=hp) + b0, 0.0)
    h = jnp.maximum(jnp.dot(h, w1, precision=hp) + b1, 0.0)
    y = jnp.dot(h, w2, precision=hp) + b2
    m = y.mean(-1, keepdims=True)
    v = ((y - m) ** 2).mean(-1, keepdims=True)
    return (y - m) / jnp.sqrt(v + LN_EPS) * g + beta


def graph_net_block_ref(node, edge, senders, receivers, params):
    pe, pn = params["edge"], params["node"]
    x = jnp.concatenate([node[senders], node[receivers], edge], axis=-1)
    eupd = _mlp_ref(x, pe["w0"], pe["b0"], pe["w1"], pe["b1"], pe["w2"], pe["b2"],
                    pe["ln_g"], pe["ln_b"])
    seg = jnp.zeros_like(node).at[receivers].add(eupd)
    xn = jnp.concatenate([node, seg], axis=-1)
    nupd = _mlp_ref(xn, pn["w0"], pn["b0"], pn["w1"], pn["b1"], pn["w2"], pn["b2"],
                    pn["ln_g"], pn["ln_b"])
    return nupd + node, eupd + edge


# ---------------------------------- main -------------------------------------

if __name__ == "__main__":
    # nodes, edges, feature dim (=output_size, lane-dense 128), latent size
    N, E, D, L = 64, 300, 128, 128
    TILE_E = 256   # -> E padded to 512, 2 pipelined edge tiles

    key = jax.random.PRNGKey(0)
    k_node, k_edge, k_s, k_r, k_p = jax.random.split(key, 5)
    node_features = jax.random.normal(k_node, (N, D), jnp.float32)
    edge_features = jax.random.normal(k_edge, (E, D), jnp.float32)
    senders = jax.random.randint(k_s, (E,), 0, N, jnp.int32)
    receivers = jax.random.randint(k_r, (E,), 0, N, jnp.int32)
    params = make_params(k_p, D, L)

    fn = jax.jit(functools.partial(graph_net_block, tile_e=TILE_E))
    new_nodes, new_edges = fn(node_features, edge_features, senders, receivers,
                              params)
    jax.block_until_ready((new_nodes, new_edges))

    ref_nodes, ref_edges = graph_net_block_ref(
        node_features, edge_features, senders, receivers, params)

    assert new_nodes.shape == ref_nodes.shape
    assert new_edges.shape == ref_edges.shape
    node_err = float(jnp.max(jnp.abs(new_nodes - ref_nodes)))
    edge_err = float(jnp.max(jnp.abs(new_edges - ref_edges)))
    assert jnp.allclose(new_nodes, ref_nodes, rtol=1e-4, atol=1e-4), node_err
    assert jnp.allclose(new_edges, ref_edges, rtol=1e-4, atol=1e-4), edge_err

    print("KERNEL_OK")
</pallas_src>

<mosaic_0001>
module attributes {stable_mosaic.version = 11 : i64} {
  func.func @_gnb_kernel(%arg0: i32, %arg1: memref<256x1xi32, #tpu.memory_space<vmem>>, %arg2: memref<256x1xi32, #tpu.memory_space<vmem>>, %arg3: memref<64x128xf32, #tpu.memory_space<vmem>>, %arg4: memref<256x128xf32, #tpu.memory_space<vmem>>, %arg5: memref<128x128xf32, #tpu.memory_space<vmem>>, %arg6: memref<128x128xf32, #tpu.memory_space<vmem>>, %arg7: memref<128x128xf32, #tpu.memory_space<vmem>>, %arg8: memref<1x128xf32, #tpu.memory_space<vmem>>, %arg9: memref<128x128xf32, #tpu.memory_space<vmem>>, %arg10: memref<1x128xf32, #tpu.memory_space<vmem>>, %arg11: memref<128x128xf32, #tpu.memory_space<vmem>>, %arg12: memref<1x128xf32, #tpu.memory_space<vmem>>, %arg13: memref<1x128xf32, #tpu.memory_space<vmem>>, %arg14: memref<1x128xf32, #tpu.memory_space<vmem>>, %arg15: memref<128x128xf32, #tpu.memory_space<vmem>>, %arg16: memref<128x128xf32, #tpu.memory_space<vmem>>, %arg17: memref<1x128xf32, #tpu.memory_space<vmem>>, %arg18: memref<128x128xf32, #tpu.memory_space<vmem>>, %arg19: memref<1x128xf32, #tpu.memory_space<vmem>>, %arg20: memref<128x128xf32, #tpu.memory_space<vmem>>, %arg21: memref<1x128xf32, #tpu.memory_space<vmem>>, %arg22: memref<1x128xf32, #tpu.memory_space<vmem>>, %arg23: memref<1x128xf32, #tpu.memory_space<vmem>>, %arg24: memref<256x128xf32, #tpu.memory_space<vmem>>, %arg25: memref<64x128xf32, #tpu.memory_space<vmem>>, %arg26: memref<64x128xf32, #tpu.memory_space<vmem>>) attributes {dimension_semantics = [#tpu.dimension_semantics<arbitrary>], iteration_bounds = array<i64: 2>, scalar_prefetch = 0 : i64, scratch_operands = 1 : i64, tpu.core_type = #tpu.core_type<tc>, window_params = [{transform_indices = @transform_0, window_bounds = array<i64: 256, 1>}, {transform_indices = @transform_1, window_bounds = array<i64: 256, 1>}, {pipeline_mode = #tpu.pipeline_mode<synchronous>, transform_indices = @transform_2, window_bounds = array<i64: 64, 128>}, {transform_indices = @transform_3, window_bounds = array<i64: 256, 128>}, {pipeline_mode = #tpu.pipeline_mode<synchronous>, transform_indices = @transform_4, window_bounds = array<i64: 128, 128>}, {pipeline_mode = #tpu.pipeline_mode<synchronous>, transform_indices = @transform_5, window_bounds = array<i64: 128, 128>}, {pipeline_mode = #tpu.pipeline_mode<synchronous>, transform_indices = @transform_6, window_bounds = array<i64: 128, 128>}, {pipeline_mode = #tpu.pipeline_mode<synchronous>, transform_indices = @transform_7, window_bounds = array<i64: 1, 128>}, {pipeline_mode = #tpu.pipeline_mode<synchronous>, transform_indices = @transform_8, window_bounds = array<i64: 128, 128>}, {pipeline_mode = #tpu.pipeline_mode<synchronous>, transform_indices = @transform_9, window_bounds = array<i64: 1, 128>}, {pipeline_mode = #tpu.pipeline_mode<synchronous>, transform_indices = @transform_10, window_bounds = array<i64: 128, 128>}, {pipeline_mode = #tpu.pipeline_mode<synchronous>, transform_indices = @transform_11, window_bounds = array<i64: 1, 128>}, {pipeline_mode = #tpu.pipeline_mode<synchronous>, transform_indices = @transform_12, window_bounds = array<i64: 1, 128>}, {pipeline_mode = #tpu.pipeline_mode<synchronous>, transform_indices = @transform_13, window_bounds = array<i64: 1, 128>}, {pipeline_mode = #tpu.pipeline_mode<synchronous>, transform_indices = @transform_14, window_bounds = array<i64: 128, 128>}, {pipeline_mode = #tpu.pipeline_mode<synchronous>, transform_indices = @transform_15, window_bounds = array<i64: 128, 128>}, {pipeline_mode = #tpu.pipeline_mode<synchronous>, transform_indices = @transform_16, window_bounds = array<i64: 1, 128>}, {pipeline_mode = #tpu.pipeline_mode<synchronous>, transform_indices = @transform_17, window_bounds = array<i64: 128, 128>}, {pipeline_mode = #tpu.pipeline_mode<synchronous>, transform_indices = @transform_18, window_bounds = array<i64: 1, 128>}, {pipeline_mode = #tpu.pipeline_mode<synchronous>, transform_indices = @transform_19, window_bounds = array<i64: 128, 128>}, {pipeline_mode = #tpu.pipeline_mode<synchronous>, transform_indices = @transform_20, window_bounds = array<i64: 1, 128>}, {pipeline_mode = #tpu.pipeline_mode<synchronous>, transform_indices = @transform_21, window_bounds = array<i64: 1, 128>}, {pipeline_mode = #tpu.pipeline_mode<synchronous>, transform_indices = @transform_22, window_bounds = array<i64: 1, 128>}, {transform_indices = @transform_23, window_bounds = array<i64: 256, 128>}, {pipeline_mode = #tpu.pipeline_mode<synchronous>, transform_indices = @transform_24, window_bounds = array<i64: 64, 128>}]} {
    %c0_i32 = arith.constant 0 : i32
    %0 = arith.cmpi eq, %arg0, %c0_i32 : i32
    %1 = arith.extui %0 : i1 to i32
    %c0_i32_0 = arith.constant 0 : i32
    %2 = arith.cmpi ne, %1, %c0_i32_0 : i32
    scf.if %2 {
      %cst_49 = arith.constant 0.000000e+00 : f32
      %76 = vector.broadcast %cst_49 : f32 to vector<64x128xf32>
      %c0_50 = arith.constant 0 : index
      %c0_51 = arith.constant 0 : index
      %77 = vector.load %arg26[%c0_50, %c0_51] : memref<64x128xf32, #tpu.memory_space<vmem>>, vector<64x128xf32>
      tpu.vector_store %arg26[%c0_50, %c0_51], %76 {strides = array<i32>} : memref<64x128xf32, #tpu.memory_space<vmem>>, vector<64x128xf32>,
    } else {
    }
    %c0 = arith.constant 0 : index
    %c0_1 = arith.constant 0 : index
    %3 = vector.load %arg3[%c0, %c0_1] : memref<64x128xf32, #tpu.memory_space<vmem>>, vector<64x128xf32>
    %c0_2 = arith.constant 0 : index
    %c0_3 = arith.constant 0 : index
    %4 = vector.load %arg4[%c0_2, %c0_3] : memref<256x128xf32, #tpu.memory_space<vmem>>, vector<256x128xf32>
    %5 = tpu.iota {dimensions = array<i32: 1>} : vector<256x64xi32>
    %c0_4 = arith.constant 0 : index
    %c0_5 = arith.constant 0 : index
    %6 = vector.load %arg1[%c0_4, %c0_5] : memref<256x1xi32, #tpu.memory_space<vmem>>, vector<256x1xi32>
    %7 = vector.broadcast %6 : vector<256x1xi32> to vector<256x64xi32>
    %8 = arith.cmpi eq, %7, %5 : vector<256x64xi32>
    %9 = arith.extui %8 : vector<256x64xi1> to vector<256x64xi32>
    %10 = arith.sitofp %9 : vector<256x64xi32> to vector<256x64xf32>
    %c0_6 = arith.constant 0 : index
    %c0_7 = arith.constant 0 : index
    %11 = vector.load %arg2[%c0_6, %c0_7] : memref<256x1xi32, #tpu.memory_space<vmem>>, vector<256x1xi32>
    %12 = vector.broadcast %11 : vector<256x1xi32> to vector<256x64xi32>
    %13 = arith.cmpi eq, %12, %5 : vector<256x64xi32>
    %14 = arith.extui %13 : vector<256x64xi1> to vector<256x64xi32>
    %15 = arith.sitofp %14 : vector<256x64xi32> to vector<256x64xf32>
    %cst = arith.constant dense<0.000000e+00> : vector<256x128xf32>
    %16 = tpu.matmul %10, %3, %cst {dimension_numbers = #tpu.dot_dimension_numbers<[1], [0], [0], [1], [0, 0, 1, 1], [], []>} : vector<256x64xf32>, vector<64x128xf32>, vector<256x128xf32> -> vector<256x128xf32>
    %cst_8 = arith.constant dense<0.000000e+00> : vector<256x128xf32>
    %17 = tpu.matmul %15, %3, %cst_8 {dimension_numbers = #tpu.dot_dimension_numbers<[1], [0], [0], [1], [0, 0, 1, 1], [], []>} : vector<256x64xf32>, vector<64x128xf32>, vector<256x128xf32> -> vector<256x128xf32>
    %c0_9 = arith.constant 0 : index
    %c0_10 = arith.constant 0 : index
    %18 = vector.load %arg5[%c0_9, %c0_10] : memref<128x128xf32, #tpu.memory_space<vmem>>, vector<128x128xf32>
    %cst_11 = arith.constant dense<0.000000e+00> : vector<256x128xf32>
    %19 = tpu.matmul %16, %18, %cst_11 {dimension_numbers = #tpu.dot_dimension_numbers<[1], [0], [0], [1], [0, 0, 1, 1], [], []>} : vector<256x128xf32>, vector<128x128xf32>, vector<256x128xf32> -> vector<256x128xf32>
    %c0_12 = arith.constant 0 : index
    %c0_13 = arith.constant 0 : index
    %20 = vector.load %arg6[%c0_12, %c0_13] : memref<128x128xf32, #tpu.memory_space<vmem>>, vector<128x128xf32>
    %cst_14 = arith.constant dense<0.000000e+00> : vector<256x128xf32>
    %21 = tpu.matmul %17, %20, %cst_14 {dimension_numbers = #tpu.dot_dimension_numbers<[1], [0], [0], [1], [0, 0, 1, 1], [], []>} : vector<256x128xf32>, vector<128x128xf32>, vector<256x128xf32> -> vector<256x128xf32>
    %22 = arith.addf %19, %21 : vector<256x128xf32>
    %c0_15 = arith.constant 0 : index
    %c0_16 = arith.constant 0 : index
    %23 = vector.load %arg7[%c0_15, %c0_16] : memref<128x128xf32, #tpu.memory_space<vmem>>, vector<128x128xf32>
    %cst_17 = arith.constant dense<0.000000e+00> : vector<256x128xf32>
    %24 = tpu.matmul %4, %23, %cst_17 {dimension_numbers = #tpu.dot_dimension_numbers<[1], [0], [0], [1], [0, 0, 1, 1], [], []>} : vector<256x128xf32>, vector<128x128xf32>, vector<256x128xf32> -> vector<256x128xf32>
    %25 = arith.addf %22, %24 : vector<256x128xf32>
    %c0_18 = arith.constant 0 : index
    %c0_19 = arith.constant 0 : index
    %26 = vector.load %arg8[%c0_18, %c0_19] : memref<1x128xf32, #tpu.memory_space<vmem>>, vector<1x128xf32>
    %27 = vector.broadcast %26 : vector<1x128xf32> to vector<256x128xf32>
    %28 = arith.addf %25, %27 : vector<256x128xf32>
    %c0_20 = arith.constant 0 : index
    %c0_21 = arith.constant 0 : index
    %29 = vector.load %arg9[%c0_20, %c0_21] : memref<128x128xf32, #tpu.memory_space<vmem>>, vector<128x128xf32>
    %c0_22 = arith.constant 0 : index
    %c0_23 = arith.constant 0 : index
    %30 = vector.load %arg10[%c0_22, %c0_23] : memref<1x128xf32, #tpu.memory_space<vmem>>, vector<1x128xf32>
    %c0_24 = arith.constant 0 : index
    %c0_25 = arith.constant 0 : index
    %31 = vector.load %arg11[%c0_24, %c0_25] : memref<128x128xf32, #tpu.memory_space<vmem>>, vector<128x128xf32>
    %c0_26 = arith.constant 0 : index
    %c0_27 = arith.constant 0 : index
    %32 = vector.load %arg12[%c0_26, %c0_27] : memref<1x128xf32, #tpu.memory_space<vmem>>, vector<1x128xf32>
    %c0_28 = arith.constant 0 : index
    %c0_29 = arith.constant 0 : index
    %33 = vector.load %arg13[%c0_28, %c0_29] : memref<1x128xf32, #tpu.memory_space<vmem>>, vector<1x128xf32>
    %c0_30 = arith.constant 0 : index
    %c0_31 = arith.constant 0 : index
    %34 = vector.load %arg14[%c0_30, %c0_31] : memref<1x128xf32, #tpu.memory_space<vmem>>, vector<1x128xf32>
    %cst_32 = arith.constant 0.000000e+00 : f32
    %35 = vector.broadcast %cst_32 : f32 to vector<256x128xf32>
    %36 = arith.maximumf %28, %35 : vector<256x128xf32>
    %cst_33 = arith.constant dense<0.000000e+00> : vector<256x128xf32>
    %37 = tpu.matmul %36, %29, %cst_33 {dimension_numbers = #tpu.dot_dimension_numbers<[1], [0], [0], [1], [0, 0, 1, 1], [], []>} : vector<256x128xf32>, vector<128x128xf32>, vector<256x128xf32> -> vector<256x128xf32>
    %38 = vector.broadcast %30 : vector<1x128xf32> to vector<256x128xf32>
    %39 = arith.addf %37, %38 : vector<256x128xf32>
    %cst_34 = arith.constant 0.000000e+00 : f32
    %40 = vector.broadcast %cst_34 : f32 to vector<256x128xf32>
    %41 = arith.maximumf %39, %40 : vector<256x128xf32>
    %cst_35 = arith.constant dense<0.000000e+00> : vector<256x128xf32>
    %42 = tpu.matmul %41, %31, %cst_35 {dimension_numbers = #tpu.dot_dimension_numbers<[1], [0], [0], [1], [0, 0, 1, 1], [], []>} : vector<256x128xf32>, vector<128x128xf32>, vector<256x128xf32> -> vector<256x128xf32>
    %43 = vector.broadcast %32 : vector<1x128xf32> to vector<256x128xf32>
    %44 = arith.addf %42, %43 : vector<256x128xf32>
    %cst_36 = arith.constant dense<0.000000e+00> : vector<256xf32>
    %45 = vector.multi_reduction <add>, %44, %cst_36 [1] : vector<256x128xf32> to vector<256xf32>
    %46 = vector.shape_cast %45 : vector<256xf32> to vector<256x1xf32>
    %cst_37 = arith.constant 1.280000e+02 : f32
    %47 = vector.broadcast %cst_37 : f32 to vector<256x1xf32>
    %48 = arith.divf %46, %47 : vector<256x1xf32>
    %49 = arith.mulf %44, %44 : vector<256x128xf32>
    %cst_38 = arith.constant dense<0.000000e+00> : vector<256xf32>
    %50 = vector.multi_reduction <add>, %49, %cst_38 [1] : vector<256x128xf32> to vector<256xf32>
    %51 = vector.shape_cast %50 : vector<256xf32> to vector<256x1xf32>
    %cst_39 = arith.constant 1.280000e+02 : f32
    %52 = vector.broadcast %cst_39 : f32 to vector<256x1xf32>
    %53 = arith.divf %51, %52 : vector<256x1xf32>
    %54 = arith.mulf %48, %48 : vector<256x1xf32>
    %55 = arith.subf %53, %54 : vector<256x1xf32>
    %56 = vector.broadcast %48 : vector<256x1xf32> to vector<256x128xf32>
    %57 = arith.subf %44, %56 : vector<256x128xf32>
    %cst_40 = arith.constant 9.99999974E-6 : f32
    %58 = vector.broadcast %cst_40 : f32 to vector<256x1xf32>
    %59 = arith.addf %55, %58 : vector<256x1xf32>
    %60 = math.rsqrt %59 : vector<256x1xf32>
    %61 = vector.broadcast %60 : vector<256x1xf32> to vector<256x128xf32>
    %62 = arith.mulf %57, %61 : vector<256x128xf32>
    %63 = vector.broadcast %33 : vector<1x128xf32> to vector<256x128xf32>
    %64 = arith.mulf %62, %63 : vector<256x128xf32>
    %65 = vector.broadcast %34 : vector<1x128xf32> to vector<256x128xf32>
    %66 = arith.addf %64, %65 : vector<256x128xf32>
    %67 = arith.addf %66, %4 : vector<256x128xf32>
    %c0_41 = arith.constant 0 : index
    %c0_42 = arith.constant 0 : index
    %68 = vector.load %arg24[%c0_41, %c0_42] : memref<256x128xf32, #tpu.memory_space<vmem>>, vector<256x128xf32>
    tpu.vector_store %arg24[%c0_41, %c0_42], %67 {strides = array<i32>} : memref<256x128xf32, #tpu.memory_space<vmem>>, vector<256x128xf32>,
    %c0_43 = arith.constant 0 : index
    %c0_44 = arith.constant 0 : index
    %69 = vector.load %arg26[%c0_43, %c0_44] : memref<64x128xf32, #tpu.memory_space<vmem>>, vector<64x128xf32>
    %cst_45 = arith.constant dense<0.000000e+00> : vector<64x128xf32>
    %70 = tpu.matmul %15, %66, %cst_45 {dimension_numbers = #tpu.dot_dimension_numbers<[0], [0], [1], [1], [0, 1, 1, 1], [], []>} : vector<256x64xf32>, vector<256x128xf32>, vector<64x128xf32> -> vector<64x128xf32>
    %71 = arith.addf %69, %70 : vector<64x128xf32>
    %c0_46 = arith.constant 0 : index
    %c0_47 = arith.constant 0 : index
    %72 = vector.load %arg26[%c0_46, %c0_47] : memref<64x128xf32, #tpu.memory_space<vmem>>, vector<64x128xf32>
    tpu.vector_store %arg26[%c0_46, %c0_47], %71 {strides = array<i32>} : memref<64x128xf32, #tpu.memory_space<vmem>>, vector<64x128xf32>,
    %c1_i32 = arith.constant 1 : i32
    %73 = arith.cmpi eq, %arg0, %c1_i32 : i32
    %74 = arith.extui %73 : i1 to i32
    %c0_i32_48 = arith.constant 0 : i32
    %75 = arith.cmpi ne, %74, %c0_i32_48 : i32
    scf.if %75 {
      %c0_49 = arith.constant 0 : index
      %c0_50 = arith.constant 0 : index
      %76 = vector.load %arg15[%c0_49, %c0_50] : memref<128x128xf32, #tpu.memory_space<vmem>>, vector<128x128xf32>
      %cst_51 = arith.constant dense<0.000000e+00> : vector<64x128xf32>
      %77 = tpu.matmul %3, %76, %cst_51 {dimension_numbers = #tpu.dot_dimension_numbers<[1], [0], [0], [1], [0, 0, 1, 1], [], []>} : vector<64x128xf32>, vector<128x128xf32>, vector<64x128xf32> -> vector<64x128xf32>
      %c0_52 = arith.constant 0 : index
      %c0_53 = arith.constant 0 : index
      %78 = vector.load %arg26[%c0_52, %c0_53] : memref<64x128xf32, #tpu.memory_space<vmem>>, vector<64x128xf32>
      %c0_54 = arith.constant 0 : index
      %c0_55 = arith.constant 0 : index
      %79 = vector.load %arg16[%c0_54, %c0_55] : memref<128x128xf32, #tpu.memory_space<vmem>>, vector<128x128xf32>
      %cst_56 = arith.constant dense<0.000000e+00> : vector<64x128xf32>
      %80 = tpu.matmul %78, %79, %cst_56 {dimension_numbers = #tpu.dot_dimension_numbers<[1], [0], [0], [1], [0, 0, 1, 1], [], []>} : vector<64x128xf32>, vector<128x128xf32>, vector<64x128xf32> -> vector<64x128xf32>
      %81 = arith.addf %77, %80 : vector<64x128xf32>
      %c0_57 = arith.constant 0 : index
      %c0_58 = arith.constant 0 : index
      %82 = vector.load %arg17[%c0_57, %c0_58] : memref<1x128xf32, #tpu.memory_space<vmem>>, vector<1x128xf32>
      %83 = vector.broadcast %82 : vector<1x128xf32> to vector<64x128xf32>
      %84 = arith.addf %81, %83 : vector<64x128xf32>
      %c0_59 = arith.constant 0 : index
      %c0_60 = arith.constant 0 : index
      %85 = vector.load %arg18[%c0_59, %c0_60] : memref<128x128xf32, #tpu.memory_space<vmem>>, vector<128x128xf32>
      %c0_61 = arith.constant 0 : index
      %c0_62 = arith.constant 0 : index
      %86 = vector.load %arg19[%c0_61, %c0_62] : memref<1x128xf32, #tpu.memory_space<vmem>>, vector<1x128xf32>
      %c0_63 = arith.constant 0 : index
      %c0_64 = arith.constant 0 : index
      %87 = vector.load %arg20[%c0_63, %c0_64] : memref<128x128xf32, #tpu.memory_space<vmem>>, vector<128x128xf32>
      %c0_65 = arith.constant 0 : index
      %c0_66 = arith.constant 0 : index
      %88 = vector.load %arg21[%c0_65, %c0_66] : memref<1x128xf32, #tpu.memory_space<vmem>>, vector<1x128xf32>
      %c0_67 = arith.constant 0 : index
      %c0_68 = arith.constant 0 : index
      %89 = vector.load %arg22[%c0_67, %c0_68] : memref<1x128xf32, #tpu.memory_space<vmem>>, vector<1x128xf32>
      %c0_69 = arith.constant 0 : index
      %c0_70 = arith.constant 0 : index
      %90 = vector.load %arg23[%c0_69, %c0_70] : memref<1x128xf32, #tpu.memory_space<vmem>>, vector<1x128xf32>
      %cst_71 = arith.constant 0.000000e+00 : f32
      %91 = vector.broadcast %cst_71 : f32 to vector<64x128xf32>
      %92 = arith.maximumf %84, %91 : vector<64x128xf32>
      %cst_72 = arith.constant dense<0.000000e+00> : vector<64x128xf32>
      %93 = tpu.matmul %92, %85, %cst_72 {dimension_numbers = #tpu.dot_dimension_numbers<[1], [0], [0], [1], [0, 0, 1, 1], [], []>} : vector<64x128xf32>, vector<128x128xf32>, vector<64x128xf32> -> vector<64x128xf32>
      %94 = vector.broadcast %86 : vector<1x128xf32> to vector<64x128xf32>
      %95 = arith.addf %93, %94 : vector<64x128xf32>
      %cst_73 = arith.constant 0.000000e+00 : f32
      %96 = vector.broadcast %cst_73 : f32 to vector<64x128xf32>
      %97 = arith.maximumf %95, %96 : vector<64x128xf32>
      %cst_74 = arith.constant dense<0.000000e+00> : vector<64x128xf32>
      %98 = tpu.matmul %97, %87, %cst_74 {dimension_numbers = #tpu.dot_dimension_numbers<[1], [0], [0], [1], [0, 0, 1, 1], [], []>} : vector<64x128xf32>, vector<128x128xf32>, vector<64x128xf32> -> vector<64x128xf32>
      %99 = vector.broadcast %88 : vector<1x128xf32> to vector<64x128xf32>
      %100 = arith.addf %98, %99 : vector<64x128xf32>
      %cst_75 = arith.constant dense<0.000000e+00> : vector<64xf32>
      %101 = vector.multi_reduction <add>, %100, %cst_75 [1] : vector<64x128xf32> to vector<64xf32>
      %102 = vector.shape_cast %101 : vector<64xf32> to vector<64x1xf32>
      %cst_76 = arith.constant 1.280000e+02 : f32
      %103 = vector.broadcast %cst_76 : f32 to vector<64x1xf32>
      %104 = arith.divf %102, %103 : vector<64x1xf32>
      %105 = arith.mulf %100, %100 : vector<64x128xf32>
      %cst_77 = arith.constant dense<0.000000e+00> : vector<64xf32>
      %106 = vector.multi_reduction <add>, %105, %cst_77 [1] : vector<64x128xf32> to vector<64xf32>
      %107 = vector.shape_cast %106 : vector<64xf32> to vector<64x1xf32>
      %cst_78 = arith.constant 1.280000e+02 : f32
      %108 = vector.broadcast %cst_78 : f32 to vector<64x1xf32>
      %109 = arith.divf %107, %108 : vector<64x1xf32>
      %110 = arith.mulf %104, %104 : vector<64x1xf32>
      %111 = arith.subf %109, %110 : vector<64x1xf32>
      %112 = vector.broadcast %104 : vector<64x1xf32> to vector<64x128xf32>
      %113 = arith.subf %100, %112 : vector<64x128xf32>
      %cst_79 = arith.constant 9.99999974E-6 : f32
      %114 = vector.broadcast %cst_79 : f32 to vector<64x1xf32>
      %115 = arith.addf %111, %114 : vector<64x1xf32>
      %116 = math.rsqrt %115 : vector<64x1xf32>
      %117 = vector.broadcast %116 : vector<64x1xf32> to vector<64x128xf32>
      %118 = arith.mulf %113, %117 : vector<64x128xf32>
      %119 = vector.broadcast %89 : vector<1x128xf32> to vector<64x128xf32>
      %120 = arith.mulf %118, %119 : vector<64x128xf32>
      %121 = vector.broadcast %90 : vector<1x128xf32> to vector<64x128xf32>
      %122 = arith.addf %120, %121 : vector<64x128xf32>
      %123 = arith.addf %122, %3 : vector<64x128xf32>
      %c0_80 = arith.constant 0 : index
      %c0_81 = arith.constant 0 : index
      %124 = vector.load %arg25[%c0_80, %c0_81] : memref<64x128xf32, #tpu.memory_space<vmem>>, vector<64x128xf32>
      tpu.vector_store %arg25[%c0_80, %c0_81], %123 {strides = array<i32>} : memref<64x128xf32, #tpu.memory_space<vmem>>, vector<64x128xf32>,
    } else {
    }
    return
  }
  func.func @transform_0(%arg0: i32) -> (i32, i32) {
    %c0_i32 = arith.constant 0 : i32
    %c0_i32_0 = arith.constant 0 : i32
    return %arg0, %c0_i32 : i32, i32
  }
  func.func @transform_1(%arg0: i32) -> (i32, i32) {
    %c0_i32 = arith.constant 0 : i32
    %c0_i32_0 = arith.constant 0 : i32
    return %arg0, %c0_i32 : i32, i32
  }
  func.func @transform_2(%arg0: i32) -> (i32, i32) {
    %c0_i32 = arith.constant 0 : i32
    %c0_i32_0 = arith.constant 0 : i32
    %c0_i32_1 = arith.constant 0 : i32
    return %c0_i32, %c0_i32_0 : i32, i32
  }
  func.func @transform_3(%arg0: i32) -> (i32, i32) {
    %c0_i32 = arith.constant 0 : i32
    %c0_i32_0 = arith.constant 0 : i32
    return %arg0, %c0_i32 : i32, i32
  }
  func.func @transform_4(%arg0: i32) -> (i32, i32) {
    %c0_i32 = arith.constant 0 : i32
    %c0_i32_0 = arith.constant 0 : i32
    %c0_i32_1 = arith.constant 0 : i32
    return %c0_i32, %c0_i32_0 : i32, i32
  }
  func.func @transform_5(%arg0: i32) -> (i32, i32) {
    %c0_i32 = arith.constant 0 : i32
    %c0_i32_0 = arith.constant 0 : i32
    %c0_i32_1 = arith.constant 0 : i32
    return %c0_i32, %c0_i32_0 : i32, i32
  }
  func.func @transform_6(%arg0: i32) -> (i32, i32) {
    %c0_i32 = arith.constant 0 : i32
    %c0_i32_0 = arith.constant 0 : i32
    %c0_i32_1 = arith.constant 0 : i32
    return %c0_i32, %c0_i32_0 : i32, i32
  }
  func.func @transform_7(%arg0: i32) -> (i32, i32) {
    %c0_i32 = arith.constant 0 : i32
    %c0_i32_0 = arith.constant 0 : i32
    %c0_i32_1 = arith.constant 0 : i32
    return %c0_i32, %c0_i32_0 : i32, i32
  }
  func.func @transform_8(%arg0: i32) -> (i32, i32) {
    %c0_i32 = arith.constant 0 : i32
    %c0_i32_0 = arith.constant 0 : i32
    %c0_i32_1 = arith.constant 0 : i32
    return %c0_i32, %c0_i32_0 : i32, i32
  }
  func.func @transform_9(%arg0: i32) -> (i32, i32) {
    %c0_i32 = arith.constant 0 : i32
    %c0_i32_0 = arith.constant 0 : i32
    %c0_i32_1 = arith.constant 0 : i32
    return %c0_i32, %c0_i32_0 : i32, i32
  }
  func.func @transform_10(%arg0: i32) -> (i32, i32) {
    %c0_i32 = arith.constant 0 : i32
    %c0_i32_0 = arith.constant 0 : i32
    %c0_i32_1 = arith.constant 0 : i32
    return %c0_i32, %c0_i32_0 : i32, i32
  }
  func.func @transform_11(%arg0: i32) -> (i32, i32) {
    %c0_i32 = arith.constant 0 : i32
    %c0_i32_0 = arith.constant 0 : i32
    %c0_i32_1 = arith.constant 0 : i32
    return %c0_i32, %c0_i32_0 : i32, i32
  }
  func.func @transform_12(%arg0: i32) -> (i32, i32) {
    %c0_i32 = arith.constant 0 : i32
    %c0_i32_0 = arith.constant 0 : i32
    %c0_i32_1 = arith.constant 0 : i32
    return %c0_i32, %c0_i32_0 : i32, i32
  }
  func.func @transform_13(%arg0: i32) -> (i32, i32) {
    %c0_i32 = arith.constant 0 : i32
    %c0_i32_0 = arith.constant 0 : i32
    %c0_i32_1 = arith.constant 0 : i32
    return %c0_i32, %c0_i32_0 : i32, i32
  }
  func.func @transform_14(%arg0: i32) -> (i32, i32) {
    %c0_i32 = arith.constant 0 : i32
    %c0_i32_0 = arith.constant 0 : i32
    %c0_i32_1 = arith.constant 0 : i32
    return %c0_i32, %c0_i32_0 : i32, i32
  }
  func.func @transform_15(%arg0: i32) -> (i32, i32) {
    %c0_i32 = arith.constant 0 : i32
    %c0_i32_0 = arith.constant 0 : i32
    %c0_i32_1 = arith.constant 0 : i32
    return %c0_i32, %c0_i32_0 : i32, i32
  }
  func.func @transform_16(%arg0: i32) -> (i32, i32) {
    %c0_i32 = arith.constant 0 : i32
    %c0_i32_0 = arith.constant 0 : i32
    %c0_i32_1 = arith.constant 0 : i32
    return %c0_i32, %c0_i32_0 : i32, i32
  }
  func.func @transform_17(%arg0: i32) -> (i32, i32) {
    %c0_i32 = arith.constant 0 : i32
    %c0_i32_0 = arith.constant 0 : i32
    %c0_i32_1 = arith.constant 0 : i32
    return %c0_i32, %c0_i32_0 : i32, i32
  }
  func.func @transform_18(%arg0: i32) -> (i32, i32) {
    %c0_i32 = arith.constant 0 : i32
    %c0_i32_0 = arith.constant 0 : i32
    %c0_i32_1 = arith.constant 0 : i32
    return %c0_i32, %c0_i32_0 : i32, i32
  }
  func.func @transform_19(%arg0: i32) -> (i32, i32) {
    %c0_i32 = arith.constant 0 : i32
    %c0_i32_0 = arith.constant 0 : i32
    %c0_i32_1 = arith.constant 0 : i32
    return %c0_i32, %c0_i32_0 : i32, i32
  }
  func.func @transform_20(%arg0: i32) -> (i32, i32) {
    %c0_i32 = arith.constant 0 : i32
    %c0_i32_0 = arith.constant 0 : i32
    %c0_i32_1 = arith.constant 0 : i32
    return %c0_i32, %c0_i32_0 : i32, i32
  }
  func.func @transform_21(%arg0: i32) -> (i32, i32) {
    %c0_i32 = arith.constant 0 : i32
    %c0_i32_0 = arith.constant 0 : i32
    %c0_i32_1 = arith.constant 0 : i32
    return %c0_i32, %c0_i32_0 : i32, i32
  }
  func.func @transform_22(%arg0: i32) -> (i32, i32) {
    %c0_i32 = arith.constant 0 : i32
    %c0_i32_0 = arith.constant 0 : i32
    %c0_i32_1 = arith.constant 0 : i32
    return %c0_i32, %c0_i32_0 : i32, i32
  }
  func.func @transform_23(%arg0: i32) -> (i32, i32) {
    %c0_i32 = arith.constant 0 : i32
    %c0_i32_0 = arith.constant 0 : i32
    return %arg0, %c0_i32 : i32, i32
  }
  func.func @transform_24(%arg0: i32) -> (i32, i32) {
    %c0_i32 = arith.constant 0 : i32
    %c0_i32_0 = arith.constant 0 : i32
    %c0_i32_1 = arith.constant 0 : i32
    return %c0_i32, %c0_i32_0 : i32, i32
  }
}

</mosaic_0001>

<bundles_post_ra>
// kernel: graph_net_block.1
= control target key start
LH: loop header
LB: loop body
LE: loop exit
PB: predicated region body
PF: predicated region fallthrough
CT: control target
= control target key end

     0   :  { %s8803_s0 = inlined_call_operand.vmem [shape: s32[512,1], index: 0, kind: input, shape index: {}]   ;;  %s8804_s1 = inlined_call_operand.vmem [shape: s32[512,1], index: 1, kind: input, shape index: {}]   ;;  %s8805_s2 = inlined_call_operand.vmem [shape: f32[64,128], index: 2, kind: input, shape index: {}]   ;;  %s8806_s3 = inlined_call_operand.vmem [shape: f32[512,128], index: 3, kind: input, shape index: {}]   ;;  %s8807_s4 = inlined_call_operand.vmem [shape: f32[128,128], index: 4, kind: input, shape index: {}]   ;;  %s8808_s5 = inlined_call_operand.vmem [shape: f32[128,128], index: 5, kind: input, shape index: {}]   ;;  %s8809_s6 = inlined_call_operand.vmem [shape: f32[128,128], index: 6, kind: input, shape index: {}]   ;;  %s8810_s7 = inlined_call_operand.vmem [shape: f32[1,128], index: 7, kind: input, shape index: {}]   ;;  %s8811_s8 = inlined_call_operand.vmem [shape: f32[128,128], index: 8, kind: input, shape index: {}]   ;;  %s8812_s9 = inlined_call_operand.vmem [shape: f32[1,128], index: 9, kind: input, shape index: {}]   ;;  %s8813_s10 = inlined_call_operand.vmem [shape: f32[128,128], index: 10, kind: input, shape index: {}]   ;;  %s8814_s11 = inlined_call_operand.vmem [shape: f32[1,128], index: 11, kind: input, shape index: {}]   ;;  %s8815_s12 = inlined_call_operand.vmem [shape: f32[1,128], index: 12, kind: input, shape index: {}]   ;;  %s8816_s13 = inlined_call_operand.vmem [shape: f32[1,128], index: 13, kind: input, shape index: {}]   ;;  %s8817_s14 = inlined_call_operand.vmem [shape: f32[128,128], index: 14, kind: input, shape index: {}]   ;;  %s8818_s15 = inlined_call_operand.vmem [shape: f32[128,128], index: 15, kind: input, shape index: {}]   ;;  %s8819_s16 = inlined_call_operand.vmem [shape: f32[1,128], index: 16, kind: input, shape index: {}]   ;;  %s8820_s17 = inlined_call_operand.vmem [shape: f32[128,128], index: 17, kind: input, shape index: {}]   ;;  %s8821_s18 = inlined_call_operand.vmem [shape: f32[1,128], index: 18, kind: input, shape index: {}]   ;;  %s8822_s19 = inlined_call_operand.vmem [shape: f32[128,128], index: 19, kind: input, shape index: {}]   ;;  %s8823_s20 = inlined_call_operand.vmem [shape: f32[1,128], index: 20, kind: input, shape index: {}]   ;;  %s8824_s21 = inlined_call_operand.vmem [shape: f32[1,128], index: 21, kind: input, shape index: {}]   ;;  %s8825_s22 = inlined_call_operand.vmem [shape: f32[1,128], index: 22, kind: input, shape index: {}]   ;;  %s8826_s23 = inlined_call_operand.vmem [shape: f32[512,128], index: 23, kind: output, shape index: {0}]   ;;  %s8827_s24 = inlined_call_operand.hbm [shape: f32[64,128], index: 24, kind: output, shape index: {1}]  }
   0x1   :  { %8874 = sst [smem:[#allocation38_spill]] %s8803_s0 }
   0x2   :  { %8875 = sst [smem:[#allocation39_spill]] %s8804_s1 }
   0x3   :  { %8876 = sst [smem:[#allocation40_spill]] %s8805_s2 }
   0x4   :  { %8877 = sst [smem:[#allocation41_spill]] %s8806_s3 }
   0x5   :  { %8878 = sst [smem:[#allocation42_spill]] %s8807_s4 }
   0x6   :  { %8879 = sst [smem:[#allocation43_spill]] %s8808_s5 }
   0x7   :  { %8880 = sst [smem:[#allocation44_spill]] %s8809_s6 }
   0x8   :  { %8881 = sst [smem:[#allocation45_spill]] %s8810_s7 }
   0x9   :  { %8882 = sst [smem:[#allocation46_spill]] %s8811_s8 }
   0xa   :  { %8883 = sst [smem:[#allocation47_spill]] %s8824_s21 }
   0xb   :  { %8884 = sst [smem:[#allocation48_spill]] %s8825_s22 }
   0xc   :  { %8885 = sst [smem:[#allocation49_spill]] %s8827_s24 }
   0xd   :  { %30 = vsyncpa [#allocation4], 0  ;;  %s6972_s5 = smov 0  }
   0xe LB: > { %8886 = sst [smem:[#allocation6_spill]] %s6839_s5  ;;  %s6978_s26 = sadd.s32 4294967295, %s6839_s5   ;;  %s6839_s5 = sphi %s6972_s5, %s36_s5  }
   0xf   : > { %p4836_p0 = scmp.ge.s32.totalorder %s6839_s5, 1  ;;  %p684_p1 = scmp.lt.s32.totalorder %s6839_s5, 3 }
  0x11   : > { %p685_p2 = pnand %p4836_p0, %p684_p1 }
  0x13   : > { %688 = sbr.rel (%p685_p2) target bundleno = 2636 (0xa4c), region = 112 }
  0x1a   : > { %s4837_s27 = sshll.u32 %s6978_s26, 5  ;;  %s8887_s29 = sld [smem:[#allocation38_spill]] }
  0x1b   : > { %p761_p3 = scmp.lt.s32.totalorder %s4837_s27, 63  ;;  %s8888_s3 = sld [smem:[#allocation39_spill]] }
  0x1c   : > { %s8889_s1 = sld [smem:[#allocation41_spill]]  ;;  %p4845_p4 = scmp.ne.s32.totalorder %s6978_s26, 0 }
  0x1d   : > { %s8980_s27 = smov (!%p761_p3, %s4837_s27), 63  ;;  %v6841_v0 = vmov (!%p4845_p4), 0.0  }
  0x1e   : > { %s4838_s28 = sshll.u32 %s8980_s27, 3  ;;  %787 = sbr.rel (%p4845_p4) target bundleno = 37 (0x25), region = 116  ;;  %788 = vst [vmem:[#allocation2] sm:$0xff] (!%p4845_p4), %v6841_v0  ;;  %789 = vst [vmem:[#allocation2 + $0x8] sm:$0xff] (!%p4845_p4), %v6841_v0 }
  0x1f   : > { %s7001_s21 = scalar_lea.vmem %s8826_s23, %s4838_s28  ;;  %790 = vst [vmem:[#allocation2 + $0x10] sm:$0xff] (!%p4845_p4), %v6841_v0  ;;  %791 = vst [vmem:[#allocation2 + $0x18] sm:$0xff] (!%p4845_p4), %v6841_v0 }
  0x20   : > { %s6986_s0 = scalar_lea.vmem %s8887_s29, %s4838_s28  ;;  %792 = vst [vmem:[#allocation2 + $0x20] sm:$0xff] (!%p4845_p4), %v6841_v0  ;;  %793 = vst [vmem:[#allocation2 + $0x28] sm:$0xff] (!%p4845_p4), %v6841_v0 }
  0x21   : > { %s6991_s25 = scalar_lea.vmem %s8888_s3, %s4838_s28  ;;  %794 = vst [vmem:[#allocation2 + $0x30] sm:$0xff] (!%p4845_p4), %v6841_v0  ;;  %795 = vst [vmem:[#allocation2 + $0x38] sm:$0xff] (!%p4845_p4), %v6841_v0 }
  0x22   : > { %s6996_s5 = scalar_lea.vmem %s8889_s1, %s4838_s28 }
  0x25 PF: > { %v864_v1 = vld [vmem:[%s6986_s0 + $0xd0] sm:$0xff]  ;;  %v862_v2 = vld [vmem:[%s6986_s0 + $0xc0] sm:$0xff]  ;;  %v6842_v3 = vmov 0   ;;  %v865_v4 = vld [vmem:[%s6986_s0 + $0xd8] sm:$0xff]  ;;  %s8890_s27 = sld [smem:[#allocation40_spill]]  ;;  %vm1286_vm0 = vcmask 523264  }
  0x26   : > { %6618 = vset.pattern.permute.xlu1 %v6842_v3  ;;  %6617 = vset.pattern.permute.xlu0 %v6842_v3  ;;  %v863_v5 = vld [vmem:[%s6986_s0 + $0xc8] sm:$0xff]  ;;  %v866_v7 = vld [vmem:[%s6986_s0 + $0xe0] sm:$0xff]  ;;  %v869_v8 = vld [vmem:[%s6986_s0 + $0xf8] sm:$0xff]  ;;  %s8899_s29 = sld [smem:[#allocation43_spill]]  ;;  %s8907_s1 = sld [smem:[#allocation42_spill]] }
  0x27   : > { %949 = vperm.xlu1 %6618, %v864_v1   ;;  %943 = vperm.xlu0 %6617, %v862_v2   ;;  %v867_v6 = vld [vmem:[%s6986_s0 + $0xe8] sm:$0xff]  ;;  %v868_v9 = vld [vmem:[%s6986_s0 + $0xf0] sm:$0xff]  ;;  %v1062_v11 = vld [vmem:[%s6991_s25] sm:$0xff]  ;;  %s8909_s2 = sld [smem:[#allocation46_spill]]  ;;  %s8910_s7 = sld [smem:[#allocation45_spill]] }
  0x28   : > { %v1063_v10 = vld [vmem:[%s6991_s25 + $0x8] sm:$0xff]  ;;  %v1065_v12 = vld [vmem:[%s6991_s25 + $0x18] sm:$0xff]  ;;  %v1064_v13 = vld [vmem:[%s6991_s25 + $0x10] sm:$0xff]  ;;  %p4979_p5 = scmp.ne.s32.totalorder %s6978_s26, 1 }
  0x29   : > { %v1067_v21 = vld [vmem:[%s6991_s25 + $0x28] sm:$0xff]  ;;  %v1066_v22 = vld [vmem:[%s6991_s25 + $0x20] sm:$0xff]  ;;  %v1069_v27 = vld [vmem:[%s6991_s25 + $0x38] sm:$0xff]  ;;  %s8975_s3 = sld [smem:[#allocation48_spill]] (!%p4979_p5) }
  0x2a   : > { %v1068_v28 = vld [vmem:[%s6991_s25 + $0x30] sm:$0xff]  ;;  %v1071_v30 = vld [vmem:[%s6991_s25 + $0x48] sm:$0xff]  ;;  %v1070_v31 = vld [vmem:[%s6991_s25 + $0x40] sm:$0xff] }
  0x2b   : > { %952 = vperm.xlu1 %6618, %v865_v4   ;;  %946 = vperm.xlu0 %6617, %v863_v5   ;;  %v7019_v14 = vld [vmem:[%s8890_s27] sm:$0xff]  ;;  %v7024_v15 = vld [vmem:[%s8890_s27 + $0x8] sm:$0xff]  ;;  %v7033_v17 = vld [vmem:[%s8890_s27 + $0x10] sm:$0xff] }
  0x2c   : > { %8891 = vst [vmem:[#allocation7_spill] sm:$0xff] %v7019_v14  ;;  %8892 = vst [vmem:[#allocation8_spill] sm:$0xff] %v7024_v15  ;;  %v7028_v16 = vpack.c.bf16 %v7024_v15, %v7019_v14  ;;  %v7038_v18 = vld [vmem:[%s8890_s27 + $0x18] sm:$0xff]  ;;  %v7047_v20 = vld [vmem:[%s8890_s27 + $0x20] sm:$0xff] }
  0x2d   : > { %8893 = vst [vmem:[#allocation9_spill] sm:$0xff] %v7033_v17  ;;  %8894 = vst [vmem:[#allocation10_spill] sm:$0xff] %v7038_v18  ;;  %v7042_v19 = vpack.c.bf16 %v7038_v18, %v7033_v17  ;;  %v7055_v23 = vld [vmem:[%s8890_s27 + $0x28] sm:$0xff]  ;;  %v7069_v25 = vld [vmem:[%s8890_s27 + $0x30] sm:$0xff] }
  0x2e   : > { %8895 = vst [vmem:[#allocation11_spill] sm:$0xff] %v7047_v20  ;;  %6517 = vmatprep.subr.bf16.mxu1 %v7028_v16  ;;  %8896 = vst [vmem:[#allocation12_spill] sm:$0xff] %v7055_v23  ;;  %6166 = vmatprep.subr.bf16.mxu0 %v7028_v16  ;;  %v7063_v24 = vpack.c.bf16 %v7055_v23, %v7047_v20  ;;  %v7074_v26 = vld [vmem:[%s8890_s27 + $0x38] sm:$0xff]  ;;  %v1072_v33 = vld [vmem:[%s6991_s25 + $0x50] sm:$0xff] }
  0x2f   : > { %958 = vperm.xlu1 %6618, %v867_v6   ;;  %955 = vperm.xlu0 %6617, %v866_v7   ;;  %8897 = vst [vmem:[#allocation13_spill] sm:$0xff] %v7069_v25  ;;  %8898 = vst [vmem:[#allocation14_spill] sm:$0xff] %v7074_v26  ;;  %v7083_v29 = vpack.c.bf16 %v7074_v26, %v7069_v25  ;;  %v1073_v32 = vld [vmem:[%s6991_s25 + $0x58] sm:$0xff]  ;;  %v1075_v34 = vld [vmem:[%s6991_s25 + $0x68] sm:$0xff] }
  0x30   : > { %6521 = vmatpush3.bf16.msra.mxu1 %v7028_v16  ;;  %6168 = vmatpush3.bf16.msra.mxu0 %v7028_v16  ;;  %v1074_v35 = vld [vmem:[%s6991_s25 + $0x60] sm:$0xff]  ;;  %v1077_v36 = vld [vmem:[%s6991_s25 + $0x78] sm:$0xff]  ;;  %v1076_v37 = vld [vmem:[%s6991_s25 + $0x70] sm:$0xff] }
  0x31   : > { %6518 = vmatprep.subr.bf16.mxu1 %v7042_v19  ;;  %6170 = vmatprep.subr.bf16.mxu0 %v7042_v19  ;;  %v1079_v38 = vld [vmem:[%s6991_s25 + $0x88] sm:$0xff]  ;;  %v1078_v39 = vld [vmem:[%s6991_s25 + $0x80] sm:$0xff]  ;;  %v1081_v40 = vld [vmem:[%s6991_s25 + $0x98] sm:$0xff] }
  0x32   : > { %v1080_v41 = vld [vmem:[%s6991_s25 + $0x90] sm:$0xff]  ;;  %v1083_v42 = vld [vmem:[%s6991_s25 + $0xa8] sm:$0xff]  ;;  %v1082_v43 = vld [vmem:[%s6991_s25 + $0xa0] sm:$0xff] }
  0x33   : > { %964 = vperm.xlu1 %6618, %v869_v8   ;;  %961 = vperm.xlu0 %6617, %v868_v9   ;;  %v1085_v44 = vld [vmem:[%s6991_s25 + $0xb8] sm:$0xff]  ;;  %v1084_v45 = vld [vmem:[%s6991_s25 + $0xb0] sm:$0xff]  ;;  %v1087_v46 = vld [vmem:[%s6991_s25 + $0xc8] sm:$0xff] }
  0x34   : > { %6522 = vmatpush3.bf16.msra.mxu1 %v7042_v19  ;;  %6172 = vmatpush3.bf16.msra.mxu0 %v7042_v19  ;;  %v1086_v47 = vld [vmem:[%s6991_s25 + $0xc0] sm:$0xff]  ;;  %v1089_v48 = vld [vmem:[%s6991_s25 + $0xd8] sm:$0xff]  ;;  %v1088_v49 = vld [vmem:[%s6991_s25 + $0xd0] sm:$0xff] }
  0x35   : > { %6519 = vmatprep.subr.bf16.mxu1 %v7063_v24  ;;  %6174 = vmatprep.subr.bf16.mxu0 %v7063_v24  ;;  %v1091_v50 = vld [vmem:[%s6991_s25 + $0xe8] sm:$0xff]  ;;  %v1090_v51 = vld [vmem:[%s6991_s25 + $0xe0] sm:$0xff]  ;;  %v1093_v52 = vld [vmem:[%s6991_s25 + $0xf8] sm:$0xff] }
  0x36   : > { %v1092_v53 = vld [vmem:[%s6991_s25 + $0xf0] sm:$0xff]  ;;  %v839_v54 = vld [vmem:[%s6986_s0 + $0x8] sm:$0xff]  ;;  %v838_v55 = vld [vmem:[%s6986_s0] sm:$0xff]  ;;  %s8974_s25 = sld [smem:[#allocation47_spill]] (!%p4979_p5) }
  0x37   : > { %1098 = vperm.xlu1 %6618, %v1063_v10   ;;  %1095 = vperm.xlu0 %6617, %v1062_v11   ;;  %v841_v56 = vld [vmem:[%s6986_s0 + $0x18] sm:$0xff]  ;;  %v840_v57 = vld [vmem:[%s6986_s0 + $0x10] sm:$0xff]  ;;  %v843_v58 = vld [vmem:[%s6986_s0 + $0x28] sm:$0xff] }
  0x38   : > { %6523 = vmatpush3.bf16.msra.mxu1 %v7063_v24  ;;  %6176 = vmatpush3.bf16.msra.mxu0 %v7063_v24  ;;  %v842_v59 = vld [vmem:[%s6986_s0 + $0x20] sm:$0xff]  ;;  %v845_v60 = vld [vmem:[%s6986_s0 + $0x38] sm:$0xff]  ;;  %v844_v61 = vld [vmem:[%s6986_s0 + $0x30] sm:$0xff] }
  0x39   : > { %6520 = vmatprep.subr.bf16.mxu1 %v7083_v29  ;;  %6178 = vmatprep.subr.bf16.mxu0 %v7083_v29  ;;  %v847_v62 = vld [vmem:[%s6986_s0 + $0x48] sm:$0xff]  ;;  %v846_v63 = vld [vmem:[%s6986_s0 + $0x40] sm:$0xff]  ;;  %v849_v0 = vld [vmem:[%s6986_s0 + $0x58] sm:$0xff] }
  0x3a   : > { %v848_v1 = vld [vmem:[%s6986_s0 + $0x50] sm:$0xff]  ;;  %v851_v2 = vld [vmem:[%s6986_s0 + $0x68] sm:$0xff]  ;;  %v850_v3 = vld [vmem:[%s6986_s0 + $0x60] sm:$0xff] }
  0x3b   : > { %1104 = vperm.xlu1 %6618, %v1065_v12   ;;  %1101 = vperm.xlu0 %6617, %v1064_v13   ;;  %v853_v4 = vld [vmem:[%s6986_s0 + $0x78] sm:$0xff]  ;;  %v852_v5 = vld [vmem:[%s6986_s0 + $0x70] sm:$0xff]  ;;  %v855_v6 = vld [vmem:[%s6986_s0 + $0x88] sm:$0xff]  ;;  %v836_v12 = vlaneseq }
  0x3c   : > { %6524 = vmatpush3.bf16.msra.mxu1 %v7083_v29  ;;  %6180 = vmatpush3.bf16.msra.mxu0 %v7083_v29  ;;  %v854_v7 = vld [vmem:[%s6986_s0 + $0x80] sm:$0xff]  ;;  %v857_v8 = vld [vmem:[%s6986_s0 + $0x98] sm:$0xff]  ;;  %v856_v9 = vld [vmem:[%s6986_s0 + $0x90] sm:$0xff] }
  0x3d   : > { %6182 = vmatprep.subr.bf16.mxu1 %v7028_v16  ;;  %v859_v10 = vld [vmem:[%s6986_s0 + $0xa8] sm:$0xff]  ;;  %v858_v11 = vld [vmem:[%s6986_s0 + $0xa0] sm:$0xff]  ;;  %v861_v13 = vld [vmem:[%s6986_s0 + $0xb8] sm:$0xff] }
  0x3f   : > { %1110 = vperm.xlu1 %6618, %v1067_v21   ;;  %1107 = vperm.xlu0 %6617, %v1066_v22   ;;  %v860_v21 = vld [vmem:[%s6986_s0 + $0xb0] sm:$0xff]  ;;  %v7141_v22 = vand.u32 127, %v836_v12  ;;  %s8908_s0 = sld [smem:[#allocation44_spill]] }
  0x43   : > { %1116 = vperm.xlu1 %6618, %v1069_v27   ;;  %1113 = vperm.xlu0 %6617, %v1068_v28  }
  0x45   : > { %v2418_v26 = vld [vmem:[%s8908_s0 + $0x38] sm:$0xff] }
  0x47   : > { %1122 = vperm.xlu1 %6618, %v1071_v30   ;;  %1119 = vperm.xlu0 %6617, %v1070_v31   ;;  %v1945_v30 = vld [vmem:[%s8899_s29] sm:$0xff]  ;;  %v1946_v31 = vld [vmem:[%s8899_s29 + $0x8] sm:$0xff] }
  0x4b   : > { %1128 = vperm.xlu1 %6618, %v1073_v32   ;;  %1125 = vperm.xlu0 %6617, %v1072_v33   ;;  %v7150_v32 = vpack.c.bf16 %v1946_v31, %v1945_v30  ;;  %v6843_v33 = vmov 0.0   ;;  %v2416_v30 = vld [vmem:[%s8908_s0 + $0x28] sm:$0xff] }
  0x4d   : > { %6198 = vmatprep.subr.bf16.mxu0 %v7150_v32 }
  0x4f   : > { %1134 = vperm.xlu1 %6618, %v1075_v34   ;;  %1131 = vperm.xlu0 %6617, %v1074_v35  }
  0x53   : > { %1140 = vperm.xlu1 %6618, %v1077_v36   ;;  %1137 = vperm.xlu0 %6617, %v1076_v37  }
  0x57   : > { %1146 = vperm.xlu1 %6618, %v1079_v38   ;;  %1143 = vperm.xlu0 %6617, %v1078_v39  }
  0x5b   : > { %1152 = vperm.xlu1 %6618, %v1081_v40   ;;  %1149 = vperm.xlu0 %6617, %v1080_v41  }
  0x5f   : > { %1158 = vperm.xlu1 %6618, %v1083_v42   ;;  %1155 = vperm.xlu0 %6617, %v1082_v43  }
  0x63   : > { %1164 = vperm.xlu1 %6618, %v1085_v44   ;;  %1161 = vperm.xlu0 %6617, %v1084_v45  }
  0x67   : > { %1170 = vperm.xlu1 %6618, %v1087_v46   ;;  %1167 = vperm.xlu0 %6617, %v1086_v47  }
  0x6b   : > { %1176 = vperm.xlu1 %6618, %v1089_v48   ;;  %1173 = vperm.xlu0 %6617, %v1088_v49  }
  0x6f   : > { %1182 = vperm.xlu1 %6618, %v1091_v50   ;;  %1179 = vperm.xlu0 %6617, %v1090_v51  }
  0x73   : > { %1188 = vperm.xlu1 %6618, %v1093_v52   ;;  %1185 = vperm.xlu0 %6617, %v1092_v53  }
  0x77   : > { %874 = vperm.xlu1 %6618, %v839_v54   ;;  %871 = vperm.xlu0 %6617, %v838_v55  }
  0x7b   : > { %880 = vperm.xlu1 %6618, %v841_v56   ;;  %877 = vperm.xlu0 %6617, %v840_v57  }
  0x7f   : > { %886 = vperm.xlu1 %6618, %v843_v58   ;;  %883 = vperm.xlu0 %6617, %v842_v59  }
  0x83   : > { %892 = vperm.xlu1 %6618, %v845_v60   ;;  %889 = vperm.xlu0 %6617, %v844_v61  }
  0x87   : > { %898 = vperm.xlu1 %6618, %v847_v62   ;;  %895 = vperm.xlu0 %6617, %v846_v63  }
  0x8b   : > { %904 = vperm.xlu1 %6618, %v849_v0   ;;  %901 = vperm.xlu0 %6617, %v848_v1  }
  0x8f   : > { %910 = vperm.xlu1 %6618, %v851_v2   ;;  %907 = vperm.xlu0 %6617, %v850_v3  }
  0x93   : > { %916 = vperm.xlu1 %6618, %v853_v4   ;;  %913 = vperm.xlu0 %6617, %v852_v5  }
  0x97   : > { %922 = vperm.xlu1 %6618, %v855_v6   ;;  %919 = vperm.xlu0 %6617, %v854_v7  }
  0x9b   : > { %928 = vperm.xlu1 %6618, %v857_v8   ;;  %925 = vperm.xlu0 %6617, %v856_v9  }
  0x9f   : > { %934 = vperm.xlu1 %6618, %v859_v10   ;;  %931 = vperm.xlu0 %6617, %v858_v11  }
  0xa3   : > { %940 = vperm.xlu1 %6618, %v861_v13   ;;  %937 = vperm.xlu0 %6617, %v860_v21  }
  0xa6   : > { %v950_v27 = vpop.permute.xlu1 %949  ;;  %v944_v28 = vpop.permute.xlu0 %943 }
  0xa7   : > { %vm990_vm1 = vcmp.eq.s32.totalorder %v944_v28, %v7141_v22  ;;  %vm992_vm2 = vcmp.eq.s32.totalorder %v950_v27, %v7141_v22 }
  0xa8   : > { %v4870_v34 = vsel %vm990_vm1, 1.0, %v6843_v33  ;;  %v4872_v37 = vsel %vm992_vm2, 1.0, %v6843_v33 }
  0xa9   : > { %5513 = vmatprep.mubr.msk.f32.mxu1 %vm1286_vm0, %v4870_v34 }
  0xaa   : > { %v953_v35 = vpop.permute.xlu1 %952  ;;  %v947_v36 = vpop.permute.xlu0 %946 }
  0xab   : > { %vm991_vm3 = vcmp.eq.s32.totalorder %v947_v36, %v7141_v22  ;;  %vm993_vm4 = vcmp.eq.s32.totalorder %v953_v35, %v7141_v22 }
  0xac   : > { %v4871_v38 = vsel %vm991_vm3, 1.0, %v6843_v33  ;;  %v4873_v41 = vsel %vm993_vm4, 1.0, %v6843_v33 }
  0xad   : > { %5514 = vmatmul.mubr.msk.f32.vlgmr.msra.gmra.mrb[0].mxu1 %vm1286_vm0, %v4871_v38 }
  0xae   : > { %6184 = vmatpush3.bf16.msra.mxu1 %v7028_v16  ;;  %v959_v39 = vpop.permute.xlu1 %958  ;;  %v956_v40 = vpop.permute.xlu0 %955  ;;  %5516 = vmatprep.mubr.msk.f32.mxu1 %vm1286_vm0, %v4872_v37 }
  0xaf   : > { %vm994_vm5 = vcmp.eq.s32.totalorder %v956_v40, %v7141_v22  ;;  %6186 = vmatprep.subr.bf16.mxu1 %v7042_v19  ;;  %vm995_vm6 = vcmp.eq.s32.totalorder %v959_v39, %v7141_v22 }
  0xb0   : > { %v4874_v42 = vsel %vm994_vm5, 1.0, %v6843_v33  ;;  %v4875_v44 = vsel %vm995_vm6, 1.0, %v6843_v33 }
  0xb1   : > { %5517 = vmatmul.mubr.msk.f32.gmra.mrb[2].mxu1 %vm1286_vm0, %v4873_v41 }
  0xb2   : > { %6188 = vmatpush3.bf16.msra.mxu1 %v7042_v19  ;;  %v965_v43 = vpop.permute.xlu1 %964  ;;  %v962_v16 = vpop.permute.xlu0 %961  ;;  %5519 = vmatprep.mubr.msk.f32.mxu1 %vm1286_vm0, %v4874_v42 }
  0xb3   : > { %vm996_vm7 = vcmp.eq.s32.totalorder %v962_v16, %v7141_v22  ;;  %6190 = vmatprep.subr.bf16.mxu1 %v7063_v24  ;;  %vm997_vm8 = vcmp.eq.s32.totalorder %v965_v43, %v7141_v22 }
  0xb4   : > { %v4876_v45 = vsel %vm996_vm7, 1.0, %v6843_v33  ;;  %v4877_v47 = vsel %vm997_vm8, 1.0, %v6843_v33 }
  0xb5   : > { %5520 = vmatmul.mubr.msk.f32.gmra.mrb[4].mxu1 %vm1286_vm0, %v4875_v44 }
  0xb6   : > { %6192 = vmatpush3.bf16.msra.mxu1 %v7063_v24  ;;  %v1099_v46 = vpop.permute.xlu1 %1098  ;;  %v1096_v19 = vpop.permute.xlu0 %1095  ;;  %5522 = vmatprep.mubr.msk.f32.mxu1 %vm1286_vm0, %v4876_v45 }
  0xb7   : > { %vm1190_vm9 = vcmp.eq.s32.totalorder %v1096_v19, %v7141_v22  ;;  %6194 = vmatprep.subr.bf16.mxu1 %v7083_v29  ;;  %vm1191_vm10 = vcmp.eq.s32.totalorder %v1099_v46, %v7141_v22 }
  0xb8   : > { %v7183_v48 = vsel %vm1190_vm9, 1.0, %v6843_v33  ;;  %v7192_v50 = vsel %vm1191_vm10, 1.0, %v6843_v33 }
  0xb9   : > { %5523 = vmatmul.mubr.msk.f32.gmra.mrb[6].mxu1 %vm1286_vm0, %v4877_v47 }
  0xba   : > { %6196 = vmatpush3.bf16.msra.mxu1 %v7083_v29  ;;  %v1105_v24 = vpop.permute.xlu1 %1104  ;;  %v1102_v49 = vpop.permute.xlu0 %1101  ;;  %5541 = vmatprep.mubr.msk.f32.mxu1 %vm1286_vm0, %v7183_v48 }
  0xbb   : > { %vm1192_vm11 = vcmp.eq.s32.totalorder %v1102_v49, %v7141_v22  ;;  %vm1193_vm12 = vcmp.eq.s32.totalorder %v1105_v24, %v7141_v22 }
  0xbc   : > { %v7195_v51 = vsel %vm1192_vm11, 1.0, %v6843_v33  ;;  %v7204_v53 = vsel %vm1193_vm12, 1.0, %v6843_v33 }
  0xbd   : > { %5542 = vmatmul.mubr.msk.f32.vlgmr.msra.gmra.mrb[8].mxu1 %vm1286_vm0, %v7192_v50 }
  0xbe   : > { %v1111_v52 = vpop.permute.xlu1 %1110  ;;  %v1108_v29 = vpop.permute.xlu0 %1107  ;;  %5544 = vmatprep.mubr.msk.f32.mxu1 %vm1286_vm0, %v7195_v51 }
  0xbf   : > { %vm1194_vm13 = vcmp.eq.s32.totalorder %v1108_v29, %v7141_v22  ;;  %vm1195_vm14 = vcmp.eq.s32.totalorder %v1111_v52, %v7141_v22 }
  0xc0   : > { %v7207_v54 = vsel %vm1194_vm13, 1.0, %v6843_v33  ;;  %v7216_v57 = vsel %vm1195_vm14, 1.0, %v6843_v33 }
  0xc1   : > { %5545 = vmatmul.mubr.msk.f32.gmra.mrb[10].mxu1 %vm1286_vm0, %v7204_v53 }
  0xc2   : > { %v1117_v55 = vpop.permute.xlu1 %1116  ;;  %v1114_v56 = vpop.permute.xlu0 %1113  ;;  %5547 = vmatprep.mubr.msk.f32.mxu1 %vm1286_vm0, %v7207_v54 }
  0xc3   : > { %vm1196_vm15 = vcmp.eq.s32.totalorder %v1114_v56, %v7141_v22  ;;  %vm1197_vm1 = vcmp.eq.s32.totalorder %v1117_v55, %v7141_v22  ;;  %v1933_v56 = vld [vmem:[%s8907_s1 + $0x20] sm:$0xff] }
  0xc4   : > { %v7219_v58 = vsel %vm1196_vm15, 1.0, %v6843_v33  ;;  %v7228_v61 = vsel %vm1197_vm1, 1.0, %v6843_v33 }
  0xc5   : > { %5548 = vmatmul.mubr.msk.f32.gmra.mrb[12].mxu1 %vm1286_vm0, %v7216_v57 }
  0xc6   : > { %v1123_v59 = vpop.permute.xlu1 %1122  ;;  %v1120_v60 = vpop.permute.xlu0 %1119  ;;  %5550 = vmatprep.mubr.msk.f32.mxu1 %vm1286_vm0, %v7219_v58 }
  0xc7   : > { %vm1198_vm2 = vcmp.eq.s32.totalorder %v1120_v60, %v7141_v22  ;;  %vm1199_vm3 = vcmp.eq.s32.totalorder %v1123_v59, %v7141_v22  ;;  %v1934_v59 = vld [vmem:[%s8907_s1 + $0x28] sm:$0xff] }
  0xc8   : > { %v7231_v62 = vsel %vm1198_vm2, 1.0, %v6843_v33  ;;  %v7240_v1 = vsel %vm1199_vm3, 1.0, %v6843_v33  ;;  %v6237_v43 = vpack.c.bf16 %v1934_v59, %v1933_v56  ;;  %v1937_v56 = vld [vmem:[%s8907_s1 + $0x40] sm:$0xff] }
  0xc9   : > { %5551 = vmatmul.mubr.msk.f32.gmra.mrb[14].mxu1 %vm1286_vm0, %v7228_v61 }
  0xca   : > { %v1129_v63 = vpop.permute.xlu1 %1128  ;;  %v1126_v0 = vpop.permute.xlu0 %1125  ;;  %5553 = vmatprep.mubr.msk.f32.mxu1 %vm1286_vm0, %v7231_v62 }
  0xcb   : > { %vm1200_vm4 = vcmp.eq.s32.totalorder %v1126_v0, %v7141_v22  ;;  %vm1201_vm5 = vcmp.eq.s32.totalorder %v1129_v63, %v7141_v22 }
  0xcc   : > { %v7243_v2 = vsel %vm1200_vm4, 1.0, %v6843_v33  ;;  %v7252_v5 = vsel %vm1201_vm5, 1.0, %v6843_v33 }
  0xcd   : > { %5554 = vmatmul.mubr.msk.f32.gmra.mrb[16].mxu1 %vm1286_vm0, %v7240_v1 }
  0xce   : > { %v1135_v3 = vpop.permute.xlu1 %1134  ;;  %v1132_v4 = vpop.permute.xlu0 %1131  ;;  %5556 = vmatprep.mubr.msk.f32.mxu1 %vm1286_vm0, %v7243_v2 }
  0xcf   : > { %vm1202_vm6 = vcmp.eq.s32.totalorder %v1132_v4, %v7141_v22  ;;  %vm1203_vm7 = vcmp.eq.s32.totalorder %v1135_v3, %v7141_v22  ;;  %v1951_v4 = vld [vmem:[%s8899_s29 + $0x30] sm:$0xff] }
  0xd0   : > { %v7255_v6 = vsel %vm1202_vm6, 1.0, %v6843_v33  ;;  %v7264_v9 = vsel %vm1203_vm7, 1.0, %v6843_v33 }
  0xd1   : > { %5557 = vmatmul.mubr.msk.f32.gmra.mrb[18].mxu1 %vm1286_vm0, %v7252_v5  ;;  %8900 = vst [vmem:[#allocation15_spill] sm:$0xff] %v7264_v9 }
  0xd2   : > { %v1141_v7 = vpop.permute.xlu1 %1140  ;;  %v1138_v8 = vpop.permute.xlu0 %1137  ;;  %5559 = vmatprep.mubr.msk.f32.mxu1 %vm1286_vm0, %v7255_v6 }
  0xd3   : > { %vm1204_vm8 = vcmp.eq.s32.totalorder %v1138_v8, %v7141_v22  ;;  %vm1205_vm9 = vcmp.eq.s32.totalorder %v1141_v7, %v7141_v22 }
  0xd4   : > { %v7267_v10 = vsel %vm1204_vm8, 1.0, %v6843_v33  ;;  %v7277_v13 = vsel %vm1205_vm9, 1.0, %v6843_v33 }
  0xd5   : > { %8901 = vst [vmem:[#allocation16_spill] sm:$0xff] %v7267_v10  ;;  %5560 = vmatmul.mubr.msk.f32.gmra.mrb[20].mxu1 %vm1286_vm0, %v7264_v9  ;;  %8902 = vst [vmem:[#allocation17_spill] sm:$0xff] %v7277_v13 }
  0xd6   : > { %v1147_v11 = vpop.permute.xlu1 %1146  ;;  %v1144_v12 = vpop.permute.xlu0 %1143  ;;  %5562 = vmatprep.mubr.msk.f32.mxu1 %vm1286_vm0, %v7267_v10 }
  0xd7   : > { %vm1207_vm10 = vcmp.eq.s32.totalorder %v1147_v11, %v7141_v22  ;;  %vm1206_vm11 = vcmp.eq.s32.totalorder %v1144_v12, %v7141_v22 }
  0xd8   : > { %v7280_v21 = vsel %vm1207_vm10, 1.0, %v6843_v33  ;;  %v7283_v27 = vsel %vm1206_vm11, 1.0, %v6843_v33 }
  0xd9   : > { %5563 = vmatmul.mubr.msk.f32.gmra.mrb[22].mxu1 %vm1286_vm0, %v7277_v13 }
  0xda   : > { %v1153_v31 = vpop.permute.xlu1 %1152  ;;  %v1150_v34 = vpop.permute.xlu0 %1149  ;;  %5565 = vmatprep.mubr.msk.f32.mxu1 %vm1286_vm0, %v7283_v27 }
  0xdb   : > { %vm1209_vm12 = vcmp.eq.s32.totalorder %v1153_v31, %v7141_v22  ;;  %vm1208_vm13 = vcmp.eq.s32.totalorder %v1150_v34, %v7141_v22  ;;  %v1949_v34 = vld [vmem:[%s8899_s29 + $0x20] sm:$0xff] }
  0xdc   : > { %v7296_v35 = vsel %vm1209_vm12, 1.0, %v6843_v33  ;;  %v7299_v36 = vsel %vm1208_vm13, 1.0, %v6843_v33 }
  0xdd   : > { %5566 = vmatmul.mubr.msk.f32.gmra.mrb[24].mxu1 %vm1286_vm0, %v7280_v21 }
  0xde   : > { %v1159_v39 = vpop.permute.xlu1 %1158  ;;  %v1156_v40 = vpop.permute.xlu0 %1155  ;;  %5568 = vmatprep.mubr.msk.f32.mxu1 %vm1286_vm0, %v7299_v36 }
  0xdf   : > { %vm1211_vm14 = vcmp.eq.s32.totalorder %v1159_v39, %v7141_v22  ;;  %vm1210_vm15 = vcmp.eq.s32.totalorder %v1156_v40, %v7141_v22 }
  0xe0   : > { %v7312_v41 = vsel %vm1211_vm14, 1.0, %v6843_v33  ;;  %v7315_v42 = vsel %vm1210_vm15, 1.0, %v6843_v33 }
  0xe1   : > { %5569 = vmatmul.mubr.msk.f32.gmra.mrb[26].mxu1 %vm1286_vm0, %v7296_v35 }
  0xe2   : > { %v1165_v44 = vpop.permute.xlu1 %1164  ;;  %v1162_v45 = vpop.permute.xlu0 %1161  ;;  %5571 = vmatprep.mubr.msk.f32.mxu1 %vm1286_vm0, %v7315_v42 }
  0xe3   : > { %vm1213_vm1 = vcmp.eq.s32.totalorder %v1165_v44, %v7141_v22  ;;  %vm1212_vm2 = vcmp.eq.s32.totalorder %v1162_v45, %v7141_v22 }
  0xe4   : > { %v7328_v46 = vsel %vm1213_vm1, 1.0, %v6843_v33  ;;  %v7331_v19 = vsel %vm1212_vm2, 1.0, %v6843_v33 }
  0xe5   : > { %5572 = vmatmul.mubr.msk.f32.gmra.mrb[28].mxu1 %vm1286_vm0, %v7312_v41 }
  0xe6   : > { %v1171_v49 = vpop.permute.xlu1 %1170  ;;  %v1168_v52 = vpop.permute.xlu0 %1167  ;;  %5574 = vmatprep.mubr.msk.f32.mxu1 %vm1286_vm0, %v7331_v19 }
  0xe7   : > { %vm1215_vm3 = vcmp.eq.s32.totalorder %v1171_v49, %v7141_v22  ;;  %vm1214_vm4 = vcmp.eq.s32.totalorder %v1168_v52, %v7141_v22 }
  0xe8   : > { %v7344_v29 = vsel %vm1215_vm3, 1.0, %v6843_v33  ;;  %v7347_v55 = vsel %vm1214_vm4, 1.0, %v6843_v33 }
  0xe9   : > { %5575 = vmatmul.mubr.msk.f32.gmra.mrb[30].mxu1 %vm1286_vm0, %v7328_v46 }
  0xea   : > { %v1177_v60 = vpop.permute.xlu1 %1176  ;;  %v1174_v63 = vpop.permute.xlu0 %1173  ;;  %5577 = vmatprep.mubr.msk.f32.mxu1 %vm1286_vm0, %v7347_v55 }
  0xeb   : > { %vm1217_vm5 = vcmp.eq.s32.totalorder %v1177_v60, %v7141_v22  ;;  %vm1216_vm6 = vcmp.eq.s32.totalorder %v1174_v63, %v7141_v22  ;;  %v1947_v63 = vld [vmem:[%s8899_s29 + $0x10] sm:$0xff] }
  0xec   : > { %v7360_v0 = vsel %vm1217_vm5, 1.0, %v6843_v33  ;;  %v7363_v3 = vsel %vm1216_vm6, 1.0, %v6843_v33 }
  0xed   : > { %5578 = vmatmul.mubr.msk.f32.gmra.mrb[32].mxu1 %vm1286_vm0, %v7344_v29 }
  0xee   : > { %v1183_v8 = vpop.permute.xlu1 %1182  ;;  %v1180_v11 = vpop.permute.xlu0 %1179  ;;  %5580 = vmatprep.mubr.msk.f32.mxu1 %vm1286_vm0, %v7363_v3 }
  0xef   : > { %vm1219_vm7 = vcmp.eq.s32.totalorder %v1183_v8, %v7141_v22  ;;  %vm1218_vm8 = vcmp.eq.s32.totalorder %v1180_v11, %v7141_v22  ;;  %v1948_v8 = vld [vmem:[%s8899_s29 + $0x18] sm:$0xff] }
  0xf0   : > { %v7376_v12 = vsel %vm1219_vm7, 1.0, %v6843_v33  ;;  %v7379_v31 = vsel %vm1218_vm8, 1.0, %v6843_v33  ;;  %v6201_v60 = vpack.c.bf16 %v1948_v8, %v1947_v63 }
  0xf1   : > { %8903 = vst [vmem:[#allocation18_spill] sm:$0xff] %v7376_v12  ;;  %8904 = vst [vmem:[#allocation19_spill] sm:$0xff] %v7379_v31  ;;  %5581 = vmatmul.mubr.msk.f32.gmra.mrb[34].mxu1 %vm1286_vm0, %v7360_v0 }
  0xf2   : > { %v1189_v40 = vpop.permute.xlu1 %1188  ;;  %v1186_v44 = vpop.permute.xlu0 %1185  ;;  %5583 = vmatprep.mubr.msk.f32.mxu1 %vm1286_vm0, %v7379_v31 }
  0xf3   : > { %vm1221_vm9 = vcmp.eq.s32.totalorder %v1189_v40, %v7141_v22  ;;  %vm1220_vm10 = vcmp.eq.s32.totalorder %v1186_v44, %v7141_v22 }
  0xf4   : > { %v7392_v45 = vsel %vm1221_vm9, 1.0, %v6843_v33  ;;  %v7395_v49 = vsel %vm1220_vm10, 1.0, %v6843_v33 }
  0xf5   : > { %8905 = vst [vmem:[#allocation20_spill] sm:$0xff] %v7392_v45  ;;  %8906 = vst [vmem:[#allocation21_spill] sm:$0xff] %v7395_v49  ;;  %5584 = vmatmul.mubr.msk.f32.gmra.mrb[36].mxu1 %vm1286_vm0, %v7376_v12 }
  0xf6   : > { %v875_v11 = vpop.permute.xlu1 %874  ;;  %v872_v40 = vpop.permute.xlu0 %871  ;;  %5586 = vmatprep.mubr.msk.f32.mxu1 %vm1286_vm0, %v7395_v49 }
  0xf7   : > { %vm967_vm11 = vcmp.eq.s32.totalorder %v875_v11, %v7141_v22  ;;  %vm966_vm12 = vcmp.eq.s32.totalorder %v872_v40, %v7141_v22  ;;  %v1950_v11 = vld [vmem:[%s8899_s29 + $0x28] sm:$0xff] }
  0xf8   : > { %v4847_v44 = vsel %vm967_vm11, 1.0, %v6843_v33  ;;  %v4846_v52 = vsel %vm966_vm12, 1.0, %v6843_v33  ;;  %v6205_v8 = vpack.c.bf16 %v1950_v11, %v1949_v34 }
  0xf9   : > { %5477 = vmatprep.mubr.msk.f32.mxu0 %vm1286_vm0, %v4846_v52  ;;  %5587 = vmatmul.mubr.msk.f32.gmra.mrb[38].mxu1 %vm1286_vm0, %v7392_v45 }
  0xfa   : > { %v881_v39 = vpop.permute.xlu1 %880  ;;  %v878_v40 = vpop.permute.xlu0 %877  ;;  %5478 = vmatmul.mubr.msk.f32.vlgmr.msra.gmra.mrb[0].mxu0 %vm1286_vm0, %v4847_v44 }
  0xfb   : > { %vm969_vm13 = vcmp.eq.s32.totalorder %v881_v39, %v7141_v22  ;;  %vm968_vm14 = vcmp.eq.s32.totalorder %v878_v40, %v7141_v22  ;;  %6200 = vmatpush3.bf16.msra.mxu0 %v7150_v32  ;;  %v1952_v39 = vld [vmem:[%s8899_s29 + $0x38] sm:$0xff] }
  0xfc   : > { %v4849_v52 = vsel %vm969_vm13, 1.0, %v6843_v33  ;;  %v4848_v63 = vsel %vm968_vm14, 1.0, %v6843_v33  ;;  %6202 = vmatprep.subr.bf16.mxu0 %v6201_v60  ;;  %v6209_v11 = vpack.c.bf16 %v1952_v39, %v1951_v4 }
  0xfd   : > { %5480 = vmatprep.mubr.msk.f32.mxu0 %vm1286_vm0, %v4848_v63  ;;  %v1953_v63 = vld [vmem:[%s8899_s29 + $0x40] sm:$0xff] }
  0xfe   : > { %v887_v44 = vpop.permute.xlu1 %886  ;;  %v884_v40 = vpop.permute.xlu0 %883  ;;  %5481 = vmatmul.mubr.msk.f32.gmra.mrb[2].mxu0 %vm1286_vm0, %v4849_v52  ;;  %v1954_v52 = vld [vmem:[%s8899_s29 + $0x48] sm:$0xff] }
  0xff   : > { %vm971_vm15 = vcmp.eq.s32.totalorder %v887_v44, %v7141_v22  ;;  %vm970_vm1 = vcmp.eq.s32.totalorder %v884_v40, %v7141_v22  ;;  %6204 = vmatpush3.bf16.msra.mxu0 %v6201_v60  ;;  %v6213_v39 = vpack.c.bf16 %v1954_v52, %v1953_v63  ;;  %v1955_v40 = vld [vmem:[%s8899_s29 + $0x50] sm:$0xff]  ;;  %v1957_v52 = vld [vmem:[%s8899_s29 + $0x60] sm:$0xff] }
 0x100   : > { %v4851_v32 = vsel %vm971_vm15, 1.0, %v6843_v33  ;;  %v4850_v34 = vsel %vm970_vm1, 1.0, %v6843_v33  ;;  %6206 = vmatprep.subr.bf16.mxu0 %v6205_v8 }
 0x101   : > { %5483 = vmatprep.mubr.msk.f32.mxu0 %vm1286_vm0, %v4850_v34 }
 0x102   : > { %v893_v44 = vpop.permute.xlu1 %892  ;;  %v890_v7 = vpop.permute.xlu0 %889  ;;  %5484 = vmatmul.mubr.msk.f32.gmra.mrb[4].mxu0 %vm1286_vm0, %v4851_v32  ;;  %v1956_v32 = vld [vmem:[%s8899_s29 + $0x58] sm:$0xff] }
 0x103   : > { %vm973_vm2 = vcmp.eq.s32.totalorder %v893_v44, %v7141_v22  ;;  %vm972_vm3 = vcmp.eq.s32.totalorder %v890_v7, %v7141_v22  ;;  %6208 = vmatpush3.bf16.msra.mxu0 %v6205_v8  ;;  %v6217_v63 = vpack.c.bf16 %v1956_v32, %v1955_v40 }
 0x104   : > { %v4853_v4 = vsel %vm973_vm2, 1.0, %v6843_v33  ;;  %v4852_v60 = vsel %vm972_vm3, 1.0, %v6843_v33  ;;  %6210 = vmatprep.subr.bf16.mxu0 %v6209_v11 }
 0x105   : > { %5486 = vmatprep.mubr.msk.f32.mxu0 %vm1286_vm0, %v4852_v60 }
 0x106   : > { %v899_v34 = vpop.permute.xlu1 %898  ;;  %v896_v44 = vpop.permute.xlu0 %895  ;;  %5487 = vmatmul.mubr.msk.f32.gmra.mrb[6].mxu0 %vm1286_vm0, %v4853_v4  ;;  %v1958_v4 = vld [vmem:[%s8899_s29 + $0x68] sm:$0xff] }
 0x107   : > { %vm975_vm4 = vcmp.eq.s32.totalorder %v899_v34, %v7141_v22  ;;  %vm974_vm5 = vcmp.eq.s32.totalorder %v896_v44, %v7141_v22  ;;  %6212 = vmatpush3.bf16.msra.mxu0 %v6209_v11  ;;  %v6221_v32 = vpack.c.bf16 %v1958_v4, %v1957_v52  ;;  %v1959_v44 = vld [vmem:[%s8899_s29 + $0x70] sm:$0xff] }
 0x108   : > { %v4855_v7 = vsel %vm975_vm4, 1.0, %v6843_v33  ;;  %v4854_v8 = vsel %vm974_vm5, 1.0, %v6843_v33  ;;  %6214 = vmatprep.subr.bf16.mxu0 %v6213_v39 }
 0x109   : > { %5489 = vmatprep.mubr.msk.f32.mxu0 %vm1286_vm0, %v4854_v8 }
 0x10a   : > { %v905_v60 = vpop.permute.xlu1 %904  ;;  %v902_v34 = vpop.permute.xlu0 %901  ;;  %5490 = vmatmul.mubr.msk.f32.gmra.mrb[8].mxu0 %vm1286_vm0, %v4855_v7  ;;  %v1960_v7 = vld [vmem:[%s8899_s29 + $0x78] sm:$0xff] }
 0x10b   : > { %vm977_vm6 = vcmp.eq.s32.totalorder %v905_v60, %v7141_v22  ;;  %vm976_vm7 = vcmp.eq.s32.totalorder %v902_v34, %v7141_v22  ;;  %6216 = vmatpush3.bf16.msra.mxu0 %v6213_v39  ;;  %v6225_v4 = vpack.c.bf16 %v1960_v7, %v1959_v44 }
 0x10c   : > { %v4857_v11 = vsel %vm977_vm6, 1.0, %v6843_v33  ;;  %v4856_v40 = vsel %vm976_vm7, 1.0, %v6843_v33  ;;  %6218 = vmatprep.subr.bf16.mxu0 %v6217_v63 }
 0x10d   : > { %5492 = vmatprep.mubr.msk.f32.mxu0 %vm1286_vm0, %v4856_v40 }
 0x10e   : > { %v911_v8 = vpop.permute.xlu1 %910  ;;  %v908_v60 = vpop.permute.xlu0 %907  ;;  %5493 = vmatmul.mubr.msk.f32.gmra.mrb[10].mxu0 %vm1286_vm0, %v4857_v11  ;;  %v1929_v11 = vld [vmem:[%s8907_s1] sm:$0xff] }
 0x10f   : > { %vm979_vm8 = vcmp.eq.s32.totalorder %v911_v8, %v7141_v22  ;;  %vm978_vm9 = vcmp.eq.s32.totalorder %v908_v60, %v7141_v22  ;;  %6220 = vmatpush3.bf16.msra.mxu0 %v6217_v63  ;;  %v1930_v63 = vld [vmem:[%s8907_s1 + $0x8] sm:$0xff] }
 0x110   : > { %v4859_v39 = vsel %vm979_vm8, 1.0, %v6843_v33  ;;  %v4858_v52 = vsel %vm978_vm9, 1.0, %v6843_v33  ;;  %6222 = vmatprep.subr.bf16.mxu0 %v6221_v32  ;;  %v6229_v8 = vpack.c.bf16 %v1930_v63, %v1929_v11 }
 0x111   : > { %5495 = vmatprep.mubr.msk.f32.mxu0 %vm1286_vm0, %v4858_v52 }
 0x112   : > { %v917_v34 = vpop.permute.xlu1 %916  ;;  %v914_v40 = vpop.permute.xlu0 %913  ;;  %5496 = vmatmul.mubr.msk.f32.gmra.mrb[12].mxu0 %vm1286_vm0, %v4859_v39 }
 0x113   : > { %vm981_vm10 = vcmp.eq.s32.totalorder %v917_v34, %v7141_v22  ;;  %vm980_vm11 = vcmp.eq.s32.totalorder %v914_v40, %v7141_v22  ;;  %6224 = vmatpush3.bf16.msra.mxu0 %v6221_v32 }
 0x114   : > { %v4861_v44 = vsel %vm981_vm10, 1.0, %v6843_v33  ;;  %v4860_v7 = vsel %vm980_vm11, 1.0, %v6843_v33  ;;  %6226 = vmatprep.subr.bf16.mxu0 %v6225_v4 }
 0x115   : > { %5498 = vmatprep.mubr.msk.f32.mxu0 %vm1286_vm0, %v4860_v7 }
 0x116   : > { %v923_v60 = vpop.permute.xlu1 %922  ;;  %v920_v39 = vpop.permute.xlu0 %919  ;;  %5499 = vmatmul.mubr.msk.f32.gmra.mrb[14].mxu0 %vm1286_vm0, %v4861_v44 }
 0x117   : > { %vm983_vm12 = vcmp.eq.s32.totalorder %v923_v60, %v7141_v22  ;;  %vm982_vm13 = vcmp.eq.s32.totalorder %v920_v39, %v7141_v22  ;;  %6228 = vmatpush3.bf16.msra.mxu0 %v6225_v4 }
 0x118   : > { %v4863_v52 = vsel %vm983_vm12, 1.0, %v6843_v33  ;;  %v4862_v32 = vsel %vm982_vm13, 1.0, %v6843_v33  ;;  %6230 = vmatprep.subr.bf16.mxu0 %v6229_v8 }
 0x119   : > { %5501 = vmatprep.mubr.msk.f32.mxu0 %vm1286_vm0, %v4862_v32 }
 0x11a   : > { %v929_v34 = vpop.permute.xlu1 %928  ;;  %v926_v40 = vpop.permute.xlu0 %925  ;;  %5502 = vmatmul.mubr.msk.f32.gmra.mrb[16].mxu0 %vm1286_vm0, %v4863_v52 }
 0x11b   : > { %vm985_vm14 = vcmp.eq.s32.totalorder %v929_v34, %v7141_v22  ;;  %vm984_vm15 = vcmp.eq.s32.totalorder %v926_v40, %v7141_v22 }
 0x11c   : > { %v4865_v11 = vsel %vm985_vm14, 1.0, %v6843_v33  ;;  %v4864_v63 = vsel %vm984_vm15, 1.0, %v6843_v33 }
 0x11d   : > { %5504 = vmatprep.mubr.msk.f32.mxu0 %vm1286_vm0, %v4864_v63 }
 0x11e   : > { %v935_v4 = vpop.permute.xlu1 %934  ;;  %v932_v44 = vpop.permute.xlu0 %931  ;;  %5505 = vmatmul.mubr.msk.f32.gmra.mrb[18].mxu0 %vm1286_vm0, %v4865_v11 }
 0x11f   : > { %vm987_vm1 = vcmp.eq.s32.totalorder %v935_v4, %v7141_v22  ;;  %vm986_vm2 = vcmp.eq.s32.totalorder %v932_v44, %v7141_v22 }
 0x120   : > { %v4867_v7 = vsel %vm987_vm1, 1.0, %v6843_v33  ;;  %v4866_v60 = vsel %vm986_vm2, 1.0, %v6843_v33 }
 0x121   : > { %5507 = vmatprep.mubr.msk.f32.mxu0 %vm1286_vm0, %v4866_v60 }
 0x122   : > { %v941_v39 = vpop.permute.xlu1 %940  ;;  %v938_v52 = vpop.permute.xlu0 %937  ;;  %5508 = vmatmul.mubr.msk.f32.gmra.mrb[20].mxu0 %vm1286_vm0, %v4867_v7 }
 0x123   : > { %vm989_vm3 = vcmp.eq.s32.totalorder %v941_v39, %v7141_v22  ;;  %vm988_vm4 = vcmp.eq.s32.totalorder %v938_v52, %v7141_v22  ;;  %v1932_v39 = vld [vmem:[%s8907_s1 + $0x18] sm:$0xff] }
 0x124   : > { %v4869_v32 = vsel %vm989_vm3, 1.0, %v6843_v33  ;;  %v4868_v34 = vsel %vm988_vm4, 1.0, %v6843_v33  ;;  %v1931_v33 = vld [vmem:[%s8907_s1 + $0x10] sm:$0xff] }
 0x125   : > { %5510 = vmatprep.mubr.msk.f32.mxu0 %vm1286_vm0, %v4868_v34  ;;  %v6233_v34 = vpack.c.bf16 %v1932_v39, %v1931_v33  ;;  %v1935_v33 = vld [vmem:[%s8907_s1 + $0x30] sm:$0xff]  ;;  %v1936_v39 = vld [vmem:[%s8907_s1 + $0x38] sm:$0xff] }
 0x126   : > { %5511 = vmatmul.mubr.msk.f32.gmra.mrb[22].mxu0 %vm1286_vm0, %v4869_v32 }
 0x180   : > { %v7528_v40 = vpop.f32.mrb[0].mxu1 }
 0x181   : > { %v7530_v11 = vpop.f32.mrb[1].mxu1 }
 0x184   : > { %v7532_v63 = vpop.f32.mrb[2].mxu1 }
 0x185   : > { %v7534_v4 = vpop.f32.mrb[3].mxu1 }
 0x188   : > { %v7536_v44 = vpop.f32.mrb[4].mxu1 }
 0x189   : > { %v7538_v7 = vpop.f32.mrb[5].mxu1 }
 0x18c   : > { %v7540_v22 = vpop.f32.mrb[6].mxu1 }
 0x18d   : > { %v7542_v60 = vpop.f32.mrb[7].mxu1 }
 0x190   : > { %v5543_v52 = vpop.f32.mrb[8].mxu1 }
 0x191   : > { %v1770_v32 = vpop.f32.mrb[9].mxu1 }
 0x192   : > { %5621 = vmatprep.mubr.f32.mxu0 %v1770_v32 }
 0x193   : > { %5622 = vmatmul.mubr.f32.vlgmr.msra.gmra.mrb[24].mxu0 %v5543_v52  ;;  %v6241_v52 = vpack.c.bf16 %v1936_v39, %v1935_v33 }
 0x194   : > { %6232 = vmatpush3.bf16.msra.mxu0 %v6229_v8  ;;  %v5546_v47 = vpop.f32.mrb[10].mxu1 }
 0x195   : > { %v1780_v24 = vpop.f32.mrb[11].mxu1  ;;  %6234 = vmatprep.subr.bf16.mxu0 %v6233_v34 }
 0x196   : > { %5624 = vmatprep.mubr.f32.mxu0 %v1780_v24  ;;  %v1938_v24 = vld [vmem:[%s8907_s1 + $0x48] sm:$0xff] }
 0x197   : > { %5625 = vmatmul.mubr.f32.gmra.mrb[26].mxu0 %v5546_v47  ;;  %v6245_v47 = vpack.c.bf16 %v1938_v24, %v1937_v56  ;;  %v1942_v56 = vld [vmem:[%s8907_s1 + $0x68] sm:$0xff] }
 0x198   : > { %v5549_v32 = vpop.f32.mrb[12].mxu1  ;;  %6236 = vmatpush3.bf16.msra.mxu0 %v6233_v34  ;;  %v1939_v34 = vld [vmem:[%s8907_s1 + $0x50] sm:$0xff] }
 0x199   : > { %v1790_v16 = vpop.f32.mrb[13].mxu1  ;;  %6238 = vmatprep.subr.bf16.mxu0 %v6237_v43 }
 0x19a   : > { %5627 = vmatprep.mubr.f32.mxu0 %v1790_v16  ;;  %v1940_v16 = vld [vmem:[%s8907_s1 + $0x58] sm:$0xff] }
 0x19b   : > { %5628 = vmatmul.mubr.f32.gmra.mrb[28].mxu0 %v5549_v32  ;;  %v6249_v32 = vpack.c.bf16 %v1940_v16, %v1939_v34  ;;  %v1944_v34 = vld [vmem:[%s8907_s1 + $0x78] sm:$0xff] }
 0x19c   : > { %v5552_v59 = vpop.f32.mrb[14].mxu1  ;;  %6240 = vmatpush3.bf16.msra.mxu0 %v6237_v43  ;;  %v1941_v43 = vld [vmem:[%s8907_s1 + $0x60] sm:$0xff] }
 0x19d   : > { %v1800_v8 = vpop.f32.mrb[15].mxu1  ;;  %6242 = vmatprep.subr.bf16.mxu0 %v6241_v52 }
 0x19e   : > { %5630 = vmatprep.mubr.f32.mxu0 %v1800_v8 }
 0x19f   : > { %5631 = vmatmul.mubr.f32.gmra.mrb[30].mxu0 %v5552_v59  ;;  %v6253_v59 = vpack.c.bf16 %v1942_v56, %v1941_v43  ;;  %v2412_v43 = vld [vmem:[%s8908_s0 + $0x8] sm:$0xff] }
 0x1a0   : > { %v5555_v33 = vpop.f32.mrb[16].mxu1  ;;  %6244 = vmatpush3.bf16.msra.mxu0 %v6241_v52  ;;  %v1943_v52 = vld [vmem:[%s8907_s1 + $0x70] sm:$0xff] }
 0x1a1   : > { %v1810_v39 = vpop.f32.mrb[17].mxu1  ;;  %6246 = vmatprep.subr.bf16.mxu0 %v6245_v47 }
 0x1a2   : > { %5633 = vmatprep.mubr.f32.mxu0 %v1810_v39 }
 0x1a3   : > { %5634 = vmatmul.mubr.f32.gmra.mrb[32].mxu0 %v5555_v33  ;;  %v6257_v33 = vpack.c.bf16 %v1944_v34, %v1943_v52 }
 0x1a4   : > { %v5558_v24 = vpop.f32.mrb[18].mxu1  ;;  %6248 = vmatpush3.bf16.msra.mxu0 %v6245_v47  ;;  %v2411_v47 = vld [vmem:[%s8908_s0] sm:$0xff] }
 0x1a5   : > { %v1820_v8 = vpop.f32.mrb[19].mxu1  ;;  %6250 = vmatprep.subr.bf16.mxu0 %v6249_v32 }
 0x1a6   : > { %5636 = vmatprep.mubr.f32.mxu0 %v1820_v8 }
 0x1a7   : > { %5637 = vmatmul.mubr.f32.gmra.mrb[34].mxu0 %v5558_v24  ;;  %v6261_v24 = vpack.c.bf16 %v2412_v43, %v2411_v47 }
 0x1a8   : > { %v5561_v16 = vpop.f32.mrb[20].mxu1  ;;  %6252 = vmatpush3.bf16.msra.mxu0 %v6249_v32 }
 0x1a9   : > { %v1830_v39 = vpop.f32.mrb[21].mxu1  ;;  %6254 = vmatprep.subr.bf16.mxu0 %v6253_v59 }
 0x1aa   : > { %5639 = vmatprep.mubr.f32.mxu0 %v1830_v39 }
 0x1ab   : > { %5640 = vmatmul.mubr.f32.gmra.mrb[36].mxu0 %v5561_v16 }
 0x1ac   : > { %v5564_v56 = vpop.f32.mrb[22].mxu1  ;;  %6256 = vmatpush3.bf16.msra.mxu0 %v6253_v59 }
 0x1ad   : > { %v1840_v8 = vpop.f32.mrb[23].mxu1  ;;  %6258 = vmatprep.subr.bf16.mxu0 %v6257_v33 }
 0x1ae   : > { %5642 = vmatprep.mubr.f32.mxu0 %v1840_v8 }
 0x1af   : > { %5643 = vmatmul.mubr.f32.gmra.mrb[38].mxu0 %v5564_v56 }
 0x1b0   : > { %v5567_v32 = vpop.f32.mrb[24].mxu1  ;;  %6260 = vmatpush3.bf16.msra.mxu0 %v6257_v33 }
 0x1b1   : > { %v1850_v52 = vpop.f32.mrb[25].mxu1  ;;  %6262 = vmatprep.subr.bf16.mxu0 %v6261_v24 }
 0x1b2   : > { %5645 = vmatprep.mubr.f32.mxu0 %v1850_v52 }
 0x1b3   : > { %5646 = vmatmul.mubr.f32.gmra.mrb[40].mxu0 %v5567_v32 }
 0x1b4   : > { %v5570_v34 = vpop.f32.mrb[26].mxu1 }
 0x1b5   : > { %v1860_v39 = vpop.f32.mrb[27].mxu1 }
 0x1b6   : > { %5648 = vmatprep.mubr.f32.mxu0 %v1860_v39  ;;  %v2413_v39 = vld [vmem:[%s8908_s0 + $0x10] sm:$0xff] }
 0x1b7   : > { %5649 = vmatmul.mubr.f32.gmra.mrb[42].mxu0 %v5570_v34 }
 0x1b8   : > { %v5573_v37 = vpop.f32.mrb[28].mxu1 }
 0x1b9   : > { %v1870_v38 = vpop.f32.mrb[29].mxu1 }
 0x1ba   : > { %5651 = vmatprep.mubr.f32.mxu0 %v1870_v38 }
 0x1bb   : > { %5652 = vmatmul.mubr.f32.gmra.mrb[44].mxu0 %v5573_v37 }
 0x1bc   : > { %v5576_v59 = vpop.f32.mrb[30].mxu1 }
 0x1bd   : > { %v1880_v16 = vpop.f32.mrb[31].mxu1 }
 0x1be   : > { %5654 = vmatprep.mubr.f32.mxu0 %v1880_v16  ;;  %v2723_v16 = vld [vmem:[%s8909_s2] sm:$0xff] }
 0x1bf   : > { %5655 = vmatmul.mubr.f32.gmra.mrb[46].mxu0 %v5576_v59  ;;  %v2414_v59 = vld [vmem:[%s8908_s0 + $0x18] sm:$0xff] }
 0x1c0   : > { %v5579_v47 = vpop.f32.mrb[32].mxu1 }
 0x1c1   : > { %v1890_v43 = vpop.f32.mrb[33].mxu1 }
 0x1c2   : > { %5657 = vmatprep.mubr.f32.mxu0 %v1890_v43  ;;  %v2725_v43 = vld [vmem:[%s8909_s2 + $0x10] sm:$0xff] }
 0x1c3   : > { %5658 = vmatmul.mubr.f32.gmra.mrb[48].mxu0 %v5579_v47  ;;  %v2724_v47 = vld [vmem:[%s8909_s2 + $0x8] sm:$0xff] }
 0x1c4   : > { %v5582_v33 = vpop.f32.mrb[34].mxu1 }
 0x1c5   : > { %v1900_v56 = vpop.f32.mrb[35].mxu1 }
 0x1c6   : > { %5660 = vmatprep.mubr.f32.mxu0 %v1900_v56  ;;  %v2726_v56 = vld [vmem:[%s8909_s2 + $0x18] sm:$0xff] }
 0x1c7   : > { %5661 = vmatmul.mubr.f32.gmra.mrb[50].mxu0 %v5582_v33  ;;  %v6293_v33 = vpack.c.bf16 %v2724_v47, %v2723_v16  ;;  %v2728_v16 = vld [vmem:[%s8909_s2 + $0x28] sm:$0xff]  ;;  %v2417_v47 = vld [vmem:[%s8908_s0 + $0x30] sm:$0xff] }
 0x1c8   : > { %v5585_v8 = vpop.f32.mrb[36].mxu1 }
 0x1c9   : > { %v1910_v32 = vpop.f32.mrb[37].mxu1  ;;  %6294 = vmatprep.subr.bf16.mxu1 %v6293_v33 }
 0x1ca   : > { %5663 = vmatprep.mubr.f32.mxu0 %v1910_v32  ;;  %v6265_v32 = vpack.c.bf16 %v2414_v59, %v2413_v39  ;;  %6296 = vmatpush3.bf16.msra.mxu1 %v6293_v33  ;;  %v2419_v33 = vld [vmem:[%s8908_s0 + $0x40] sm:$0xff] }
 0x1cb   : > { %5664 = vmatmul.mubr.f32.gmra.mrb[52].mxu0 %v5585_v8 }
 0x1cc   : > { %v5588_v52 = vpop.f32.mrb[38].mxu1 }
 0x1cd   : > { %v5479_v34 = vpop.f32.mrb[0].mxu0  ;;  %v1920_v38 = vpop.f32.mrb[39].mxu1 }
 0x1ce   : > { %v1449_v37 = vpop.f32.mrb[1].mxu0  ;;  %5666 = vmatprep.mubr.f32.mxu0 %v1920_v38  ;;  %v6297_v38 = vpack.c.bf16 %v2726_v56, %v2725_v43 }
 0x1cf   : > { %5667 = vmatmul.mubr.f32.gmra.mrb[54].mxu0 %v5588_v52  ;;  %v2415_v52 = vld [vmem:[%s8908_s0 + $0x20] sm:$0xff] }
 0x1d0   : > { %5701 = vmatprep.mubr.f32.mxu0 %v1449_v37  ;;  %v2727_v37 = vld [vmem:[%s8909_s2 + $0x20] sm:$0xff]  ;;  %v6269_v59 = vpack.c.bf16 %v2416_v30, %v2415_v52  ;;  %6298 = vmatprep.subr.bf16.mxu1 %v6297_v38 }
 0x1d1   : > { %v5482_v8 = vpop.f32.mrb[2].mxu0  ;;  %v6301_v43 = vpack.c.bf16 %v2728_v16, %v2727_v37  ;;  %6300 = vmatpush3.bf16.msra.mxu1 %v6297_v38  ;;  %v2420_v16 = vld [vmem:[%s8908_s0 + $0x48] sm:$0xff] }
 0x1d2   : > { %v1459_v28 = vpop.f32.mrb[3].mxu0  ;;  %v6277_v38 = vpack.c.bf16 %v2420_v16, %v2419_v33 }
 0x1d3   : > { %5702 = vmatmul.mubr.f32.vlgmr.msra.gmra.mrb[24].mxu0 %v5479_v34  ;;  %v2729_v34 = vld [vmem:[%s8909_s2 + $0x30] sm:$0xff]  ;;  %6302 = vmatprep.subr.bf16.mxu1 %v6301_v43 }
 0x1d4   : > { %6264 = vmatpush3.bf16.msra.mxu0 %v6261_v24  ;;  %5704 = vmatprep.mubr.f32.mxu0 %v1459_v28  ;;  %v2730_v28 = vld [vmem:[%s8909_s2 + $0x38] sm:$0xff]  ;;  %v6273_v24 = vpack.c.bf16 %v2418_v26, %v2417_v47  ;;  %v2421_v47 = vld [vmem:[%s8908_s0 + $0x50] sm:$0xff] }
 0x1d5   : > { %v5485_v39 = vpop.f32.mrb[4].mxu0  ;;  %6266 = vmatprep.subr.bf16.mxu0 %v6265_v32  ;;  %v6305_v52 = vpack.c.bf16 %v2730_v28, %v2729_v34  ;;  %6304 = vmatpush3.bf16.msra.mxu1 %v6301_v43  ;;  %v2422_v28 = vld [vmem:[%s8908_s0 + $0x58] sm:$0xff] }
 0x1d6   : > { %v1469_v56 = vpop.f32.mrb[5].mxu0  ;;  %v6281_v33 = vpack.c.bf16 %v2422_v28, %v2421_v47 }
 0x1d7   : > { %5705 = vmatmul.mubr.f32.gmra.mrb[26].mxu0 %v5482_v8  ;;  %v2731_v8 = vld [vmem:[%s8909_s2 + $0x40] sm:$0xff]  ;;  %6306 = vmatprep.subr.bf16.mxu1 %v6305_v52 }
 0x1d8   : > { %5707 = vmatprep.mubr.f32.mxu0 %v1469_v56  ;;  %6268 = vmatpush3.bf16.msra.mxu0 %v6265_v32  ;;  %v2732_v32 = vld [vmem:[%s8909_s2 + $0x48] sm:$0xff] }
 0x1d9   : > { %v5488_v30 = vpop.f32.mrb[6].mxu0  ;;  %6270 = vmatprep.subr.bf16.mxu0 %v6269_v59  ;;  %v6309_v56 = vpack.c.bf16 %v2732_v32, %v2731_v8  ;;  %6308 = vmatpush3.bf16.msra.mxu1 %v6305_v52  ;;  %v2424_v32 = vld [vmem:[%s8908_s0 + $0x68] sm:$0xff] }
 0x1da   : > { %v1479_v37 = vpop.f32.mrb[7].mxu0 }
 0x1db   : > { %5708 = vmatmul.mubr.f32.gmra.mrb[28].mxu0 %v5485_v39  ;;  %v2733_v39 = vld [vmem:[%s8909_s2 + $0x50] sm:$0xff]  ;;  %6310 = vmatprep.subr.bf16.mxu1 %v6309_v56 }
 0x1dc   : > { %5710 = vmatprep.mubr.f32.mxu0 %v1479_v37  ;;  %6272 = vmatpush3.bf16.msra.mxu0 %v6269_v59  ;;  %v2734_v59 = vld [vmem:[%s8909_s2 + $0x58] sm:$0xff]  ;;  %v2423_v37 = vld [vmem:[%s8908_s0 + $0x60] sm:$0xff] }
 0x1dd   : > { %v5491_v26 = vpop.f32.mrb[8].mxu0  ;;  %6274 = vmatprep.subr.bf16.mxu0 %v6273_v24  ;;  %v6313_v16 = vpack.c.bf16 %v2734_v59, %v2733_v39  ;;  %6312 = vmatpush3.bf16.msra.mxu1 %v6309_v56  ;;  %v6285_v47 = vpack.c.bf16 %v2424_v32, %v2423_v37  ;;  %v2426_v59 = vld [vmem:[%s8908_s0 + $0x78] sm:$0xff] }
 0x1de   : > { %v1489_v34 = vpop.f32.mrb[9].mxu0 }
 0x1df   : > { %5711 = vmatmul.mubr.f32.gmra.mrb[30].mxu0 %v5488_v30  ;;  %v2735_v30 = vld [vmem:[%s8909_s2 + $0x60] sm:$0xff]  ;;  %6314 = vmatprep.subr.bf16.mxu1 %v6313_v16 }
 0x1e0   : > { %5713 = vmatprep.mubr.f32.mxu0 %v1489_v34  ;;  %6276 = vmatpush3.bf16.msra.mxu0 %v6273_v24  ;;  %v2736_v24 = vld [vmem:[%s8909_s2 + $0x68] sm:$0xff]  ;;  %v2425_v34 = vld [vmem:[%s8908_s0 + $0x70] sm:$0xff] }
 0x1e1   : > { %v5494_v43 = vpop.f32.mrb[10].mxu0  ;;  %6278 = vmatprep.subr.bf16.mxu0 %v6277_v38  ;;  %v6317_v28 = vpack.c.bf16 %v2736_v24, %v2735_v30  ;;  %6316 = vmatpush3.bf16.msra.mxu1 %v6313_v16  ;;  %v6289_v37 = vpack.c.bf16 %v2426_v59, %v2425_v34  ;;  %v814_v59 = vld [vmem:[%s6996_s5 + $0x50] sm:$0xff] }
 0x1e2   : > { %v1499_v8 = vpop.f32.mrb[11].mxu0 }
 0x1e3   : > { %5714 = vmatmul.mubr.f32.gmra.mrb[32].mxu0 %v5491_v26  ;;  %v2737_v26 = vld [vmem:[%s8909_s2 + $0x70] sm:$0xff]  ;;  %6318 = vmatprep.subr.bf16.mxu1 %v6317_v28 }
 0x1e4   : > { %5716 = vmatprep.mubr.f32.mxu0 %v1499_v8  ;;  %6280 = vmatpush3.bf16.msra.mxu0 %v6277_v38  ;;  %v2738_v38 = vld [vmem:[%s8909_s2 + $0x78] sm:$0xff] }
 0x1e5   : > { %v5497_v52 = vpop.f32.mrb[12].mxu0  ;;  %6282 = vmatprep.subr.bf16.mxu0 %v6281_v33  ;;  %v6321_v8 = vpack.c.bf16 %v2738_v38, %v2737_v26  ;;  %6320 = vmatpush3.bf16.msra.mxu1 %v6317_v28  ;;  %v804_v28 = vld [vmem:[%s6996_s5] sm:$0xff]  ;;  %v815_v26 = vld [vmem:[%s6996_s5 + $0x58] sm:$0xff] }
 0x1e6   : > { %v1509_v39 = vpop.f32.mrb[13].mxu0  ;;  %v816_v38 = vld [vmem:[%s6996_s5 + $0x60] sm:$0xff] }
 0x1e7   : > { %5717 = vmatmul.mubr.f32.gmra.mrb[34].mxu0 %v5494_v43  ;;  %6322 = vmatprep.subr.bf16.mxu1 %v6321_v8 }
 0x1e8   : > { %5719 = vmatprep.mubr.f32.mxu0 %v1509_v39  ;;  %6284 = vmatpush3.bf16.msra.mxu0 %v6281_v33  ;;  %v813_v39 = vld [vmem:[%s6996_s5 + $0x48] sm:$0xff] }
 0x1e9   : > { %v5500_v56 = vpop.f32.mrb[14].mxu0  ;;  %6286 = vmatprep.subr.bf16.mxu0 %v6285_v47  ;;  %6324 = vmatpush3.bf16.msra.mxu1 %v6321_v8  ;;  %v819_v8 = vld [vmem:[%s6996_s5 + $0x78] sm:$0xff] }
 0x1ea   : > { %v1519_v32 = vpop.f32.mrb[15].mxu0 }
 0x1eb   : > { %5720 = vmatmul.mubr.f32.gmra.mrb[36].mxu0 %v5497_v52 }
 0x1ec   : > { %5722 = vmatprep.mubr.f32.mxu0 %v1519_v32  ;;  %6288 = vmatpush3.bf16.msra.mxu0 %v6285_v47  ;;  %v820_v32 = vld [vmem:[%s6996_s5 + $0x80] sm:$0xff] }
 0x1ed   : > { %v5503_v30 = vpop.f32.mrb[16].mxu0  ;;  %6290 = vmatprep.subr.bf16.mxu0 %v6289_v37 }
 0x1ee   : > { %v1529_v24 = vpop.f32.mrb[17].mxu0 }
 0x1ef   : > { %5723 = vmatmul.mubr.f32.gmra.mrb[38].mxu0 %v5500_v56  ;;  %v817_v56 = vld [vmem:[%s6996_s5 + $0x68] sm:$0xff] }
 0x1f0   : > { %5725 = vmatprep.mubr.f32.mxu0 %v1529_v24  ;;  %6292 = vmatpush3.bf16.msra.mxu0 %v6289_v37  ;;  %v818_v37 = vld [vmem:[%s6996_s5 + $0x70] sm:$0xff] }
 0x1f1   : > { %v5506_v43 = vpop.f32.mrb[18].mxu0  ;;  %v822_v24 = vld [vmem:[%s6996_s5 + $0x90] sm:$0xff] }
 0x1f2   : > { %v1539_v33 = vpop.f32.mrb[19].mxu0 }
 0x1f3   : > { %5726 = vmatmul.mubr.f32.gmra.mrb[40].mxu0 %v5503_v30  ;;  %v821_v30 = vld [vmem:[%s6996_s5 + $0x88] sm:$0xff] }
 0x1f4   : > { %5728 = vmatprep.mubr.f32.mxu0 %v1539_v33  ;;  %v824_v33 = vld [vmem:[%s6996_s5 + $0xa0] sm:$0xff] }
 0x1f5   : > { %v5509_v16 = vpop.f32.mrb[20].mxu0 }
 0x1f6   : > { %v1549_v34 = vpop.f32.mrb[21].mxu0 }
 0x1f7   : > { %5729 = vmatmul.mubr.f32.gmra.mrb[42].mxu0 %v5506_v43  ;;  %v823_v43 = vld [vmem:[%s6996_s5 + $0x98] sm:$0xff] }
 0x1f8   : > { %5731 = vmatprep.mubr.f32.mxu0 %v1549_v34  ;;  %v826_v34 = vld [vmem:[%s6996_s5 + $0xb0] sm:$0xff] }
 0x1f9   : > { %v5512_v52 = vpop.f32.mrb[22].mxu0 }
 0x1fa   : > { %v1559_v47 = vpop.f32.mrb[23].mxu0 }
 0x1fb   : > { %5732 = vmatmul.mubr.f32.gmra.mrb[44].mxu0 %v5509_v16  ;;  %v825_v16 = vld [vmem:[%s6996_s5 + $0xa8] sm:$0xff] }
 0x1fc   : > { %5734 = vmatprep.mubr.f32.mxu0 %v1559_v47  ;;  %v828_v47 = vld [vmem:[%s6996_s5 + $0xc0] sm:$0xff] }
 0x1ff   : > { %5735 = vmatmul.mubr.f32.gmra.mrb[46].mxu0 %v5512_v52  ;;  %v827_v52 = vld [vmem:[%s6996_s5 + $0xb8] sm:$0xff] }
 0x200   : > { %5737 = vmatprep.mubr.f32.mxu0 %v7530_v11  ;;  %v805_v11 = vld [vmem:[%s6996_s5 + $0x8] sm:$0xff] }
 0x203   : > { %5738 = vmatmul.mubr.f32.gmra.mrb[48].mxu0 %v7528_v40  ;;  %v806_v40 = vld [vmem:[%s6996_s5 + $0x10] sm:$0xff] }
 0x204   : > { %5740 = vmatprep.mubr.f32.mxu0 %v7534_v4  ;;  %v808_v4 = vld [vmem:[%s6996_s5 + $0x20] sm:$0xff] }
 0x207   : > { %5741 = vmatmul.mubr.f32.gmra.mrb[50].mxu0 %v7532_v63  ;;  %v807_v63 = vld [vmem:[%s6996_s5 + $0x18] sm:$0xff] }
 0x208   : > { %5743 = vmatprep.mubr.f32.mxu0 %v7538_v7  ;;  %v810_v7 = vld [vmem:[%s6996_s5 + $0x30] sm:$0xff] }
 0x20b   : > { %5744 = vmatmul.mubr.f32.gmra.mrb[52].mxu0 %v7536_v44  ;;  %v809_v44 = vld [vmem:[%s6996_s5 + $0x28] sm:$0xff] }
 0x20c   : > { %5746 = vmatprep.mubr.f32.mxu0 %v7542_v60  ;;  %v812_v60 = vld [vmem:[%s6996_s5 + $0x40] sm:$0xff] }
 0x20f   : > { %5747 = vmatmul.mubr.f32.gmra.mrb[54].mxu0 %v7540_v22  ;;  %v811_v22 = vld [vmem:[%s6996_s5 + $0x38] sm:$0xff] }
 0x210   : > { %5781 = vmatprep.mubr.f32.mxu0 %v804_v28  ;;  %v829_v28 = vld [vmem:[%s6996_s5 + $0xc8] sm:$0xff] }
 0x213   : > { %5782 = vmatmul.mubr.f32.vlgmr.msra.gmra.mrb[24].mxu0 %v805_v11  ;;  %v830_v11 = vld [vmem:[%s6996_s5 + $0xd0] sm:$0xff] }
 0x214   : > { %5784 = vmatprep.mubr.f32.mxu0 %v806_v40  ;;  %v831_v40 = vld [vmem:[%s6996_s5 + $0xd8] sm:$0xff] }
 0x217   : > { %5785 = vmatmul.mubr.f32.gmra.mrb[26].mxu0 %v807_v63  ;;  %v832_v63 = vld [vmem:[%s6996_s5 + $0xe0] sm:$0xff] }
 0x218   : > { %5787 = vmatprep.mubr.f32.mxu0 %v808_v4  ;;  %v833_v4 = vld [vmem:[%s6996_s5 + $0xe8] sm:$0xff] }
 0x21b   : > { %5788 = vmatmul.mubr.f32.gmra.mrb[28].mxu0 %v809_v44  ;;  %v834_v44 = vld [vmem:[%s6996_s5 + $0xf0] sm:$0xff] }
 0x21c   : > { %5790 = vmatprep.mubr.f32.mxu0 %v810_v7  ;;  %v835_v7 = vld [vmem:[%s6996_s5 + $0xf8] sm:$0xff] }
 0x21f   : > { %5791 = vmatmul.mubr.f32.gmra.mrb[30].mxu0 %v811_v22  ;;  %v2740_v22 = vld [vmem:[%s8813_s10] sm:$0xff] }
 0x220   : > { %5793 = vmatprep.mubr.f32.mxu0 %v812_v60  ;;  %v2741_v60 = vld [vmem:[%s8813_s10 + $0x8] sm:$0xff] }
 0x223   : > { %5794 = vmatmul.mubr.f32.gmra.mrb[32].mxu0 %v813_v39  ;;  %v6325_v39 = vpack.c.bf16 %v2741_v60, %v2740_v22  ;;  %v2746_v60 = vld [vmem:[%s8813_s10 + $0x30] sm:$0xff] }
 0x224   : > { %5796 = vmatprep.mubr.f32.mxu0 %v814_v59  ;;  %v7731_v59 = vld [vmem:[%s8910_s7] ss:$0 sm:$0xff] }
 0x225   : > { %6326 = vmatprep.subr.bf16.mxu1 %v6325_v39 }
 0x227   : > { %5797 = vmatmul.mubr.f32.gmra.mrb[34].mxu0 %v815_v26 }
 0x228   : > { %5799 = vmatprep.mubr.f32.mxu0 %v816_v38 }
 0x22b   : > { %5800 = vmatmul.mubr.f32.gmra.mrb[36].mxu0 %v817_v56 }
 0x22c   : > { %5802 = vmatprep.mubr.f32.mxu0 %v818_v37 }
 0x22f   : > { %5803 = vmatmul.mubr.f32.gmra.mrb[38].mxu0 %v819_v8  ;;  %v2742_v8 = vld [vmem:[%s8813_s10 + $0x10] sm:$0xff] }
 0x230   : > { %5805 = vmatprep.mubr.f32.mxu0 %v820_v32  ;;  %v2743_v32 = vld [vmem:[%s8813_s10 + $0x18] sm:$0xff] }
 0x233   : > { %5806 = vmatmul.mubr.f32.gmra.mrb[40].mxu0 %v821_v30 }
 0x234   : > { %5808 = vmatprep.mubr.f32.mxu0 %v822_v24 }
 0x237   : > { %5809 = vmatmul.mubr.f32.gmra.mrb[42].mxu0 %v823_v43 }
 0x238   : > { %5811 = vmatprep.mubr.f32.mxu0 %v824_v33 }
 0x23b   : > { %5812 = vmatmul.mubr.f32.gmra.mrb[44].mxu0 %v825_v16 }
 0x23c   : > { %5814 = vmatprep.mubr.f32.mxu0 %v826_v34  ;;  %v6329_v34 = vpack.c.bf16 %v2743_v32, %v2742_v8 }
 0x23f   : > { %5815 = vmatmul.mubr.f32.gmra.mrb[46].mxu0 %v827_v52 }
 0x240   : > { %5817 = vmatprep.mubr.f32.mxu0 %v828_v47  ;;  %v2744_v47 = vld [vmem:[%s8813_s10 + $0x20] sm:$0xff] }
 0x243   : > { %5818 = vmatmul.mubr.f32.gmra.mrb[48].mxu0 %v829_v28  ;;  %v2745_v28 = vld [vmem:[%s8813_s10 + $0x28] sm:$0xff] }
 0x244   : > { %5820 = vmatprep.mubr.f32.mxu0 %v830_v11 }
 0x247   : > { %5821 = vmatmul.mubr.f32.gmra.mrb[50].mxu0 %v831_v40 }
 0x248   : > { %5823 = vmatprep.mubr.f32.mxu0 %v832_v63 }
 0x24b   : > { %5824 = vmatmul.mubr.f32.gmra.mrb[52].mxu0 %v833_v4 }
 0x24c   : > { %5826 = vmatprep.mubr.f32.mxu0 %v834_v44 }
 0x24f   : > { %5827 = vmatmul.mubr.f32.gmra.mrb[54].mxu0 %v835_v7  ;;  %v6333_v7 = vpack.c.bf16 %v2745_v28, %v2744_v47 }
 0x2e6   : > { %v5783_v26 = vpop.f32.mrb[24].mxu0 }
 0x2e7   : > { %v2692_v38 = vadd.f32 %v5783_v26, %v7731_v59  ;;  %v2493_v56 = vpop.f32.mrb[25].mxu0  ;;  %v2747_v26 = vld [vmem:[%s8813_s10 + $0x38] sm:$0xff] }
 0x2e8   : > { %v2691_v37 = vadd.f32 %v7731_v59, %v2493_v56  ;;  %v6337_v32 = vpack.c.bf16 %v2747_v26, %v2746_v60 }
 0x2e9   : > { %v2760_v43 = vmax.f32 %v2692_v38, 0.0 }
 0x2ea   : > { %v2759_v30 = vmax.f32 %v2691_v37, 0.0  ;;  %v5786_v24 = vpop.f32.mrb[26].mxu0 }
 0x2eb   : > { %v2694_v33 = vadd.f32 %v5786_v24, %v7731_v59  ;;  %v2503_v16 = vpop.f32.mrb[27].mxu0  ;;  %v2748_v24 = vld [vmem:[%s8813_s10 + $0x40] sm:$0xff] }
 0x2ec   : > { %v2693_v52 = vadd.f32 %v7731_v59, %v2503_v16  ;;  %5861 = vmatprep.mubr.f32.mxu1 %v2759_v30 }
 0x2ed   : > { %5862 = vmatmul.mubr.f32.vlgmr.msra.gmra.mrb[40].mxu1 %v2760_v43  ;;  %v2762_v63 = vmax.f32 %v2694_v33, 0.0  ;;  %v2749_v43 = vld [vmem:[%s8813_s10 + $0x48] sm:$0xff] }
 0x2ee   : > { %v2761_v11 = vmax.f32 %v2693_v52, 0.0  ;;  %v5789_v40 = vpop.f32.mrb[28].mxu0  ;;  %6328 = vmatpush3.bf16.msra.mxu1 %v6325_v39  ;;  %v6341_v28 = vpack.c.bf16 %v2749_v43, %v2748_v24 }
 0x2ef   : > { %v2696_v4 = vadd.f32 %v5789_v40, %v7731_v59  ;;  %v2513_v44 = vpop.f32.mrb[29].mxu0  ;;  %6330 = vmatprep.subr.bf16.mxu1 %v6329_v34  ;;  %v2750_v40 = vld [vmem:[%s8813_s10 + $0x50] sm:$0xff] }
 0x2f0   : > { %v2695_v22 = vadd.f32 %v7731_v59, %v2513_v44  ;;  %5864 = vmatprep.mubr.f32.mxu1 %v2761_v11 }
 0x2f1   : > { %5865 = vmatmul.mubr.f32.gmra.mrb[42].mxu1 %v2762_v63  ;;  %v2764_v56 = vmax.f32 %v2696_v4, 0.0  ;;  %v2751_v63 = vld [vmem:[%s8813_s10 + $0x58] sm:$0xff] }
 0x2f2   : > { %v2763_v38 = vmax.f32 %v2695_v22, 0.0  ;;  %v5792_v39 = vpop.f32.mrb[30].mxu0  ;;  %6332 = vmatpush3.bf16.msra.mxu1 %v6329_v34  ;;  %v6345_v26 = vpack.c.bf16 %v2751_v63, %v2750_v40 }
 0x2f3   : > { %v2698_v37 = vadd.f32 %v5792_v39, %v7731_v59  ;;  %v2523_v8 = vpop.f32.mrb[31].mxu0  ;;  %6334 = vmatprep.subr.bf16.mxu1 %v6333_v7  ;;  %v2752_v39 = vld [vmem:[%s8813_s10 + $0x60] sm:$0xff] }
 0x2f4   : > { %v2697_v30 = vadd.f32 %v7731_v59, %v2523_v8  ;;  %5867 = vmatprep.mubr.f32.mxu1 %v2763_v38 }
 0x2f5   : > { %5868 = vmatmul.mubr.f32.gmra.mrb[44].mxu1 %v2764_v56  ;;  %v2766_v34 = vmax.f32 %v2698_v37, 0.0  ;;  %v2753_v56 = vld [vmem:[%s8813_s10 + $0x68] sm:$0xff] }
 0x2f6   : > { %v2765_v33 = vmax.f32 %v2697_v30, 0.0  ;;  %v5795_v16 = vpop.f32.mrb[32].mxu0  ;;  %6336 = vmatpush3.bf16.msra.mxu1 %v6333_v7  ;;  %v6349_v43 = vpack.c.bf16 %v2753_v56, %v2752_v39 }
 0x2f7   : > { %v2700_v52 = vadd.f32 %v5795_v16, %v7731_v59  ;;  %v2533_v47 = vpop.f32.mrb[33].mxu0  ;;  %6338 = vmatprep.subr.bf16.mxu1 %v6337_v32  ;;  %v2754_v16 = vld [vmem:[%s8813_s10 + $0x70] sm:$0xff] }
 0x2f8   : > { %v2699_v11 = vadd.f32 %v7731_v59, %v2533_v47  ;;  %5870 = vmatprep.mubr.f32.mxu1 %v2765_v33 }
 0x2f9   : > { %5871 = vmatmul.mubr.f32.gmra.mrb[46].mxu1 %v2766_v34  ;;  %v2768_v7 = vmax.f32 %v2700_v52, 0.0  ;;  %v2755_v34 = vld [vmem:[%s8813_s10 + $0x78] sm:$0xff] }
 0x2fa   : > { %v2767_v4 = vmax.f32 %v2699_v11, 0.0  ;;  %v5798_v44 = vpop.f32.mrb[34].mxu0  ;;  %6340 = vmatpush3.bf16.msra.mxu1 %v6337_v32  ;;  %v6353_v63 = vpack.c.bf16 %v2755_v34, %v2754_v16 }
 0x2fb   : > { %v2702_v22 = vadd.f32 %v5798_v44, %v7731_v59  ;;  %v2543_v60 = vpop.f32.mrb[35].mxu0  ;;  %6342 = vmatprep.subr.bf16.mxu1 %v6341_v28 }
 0x2fc   : > { %v2701_v38 = vadd.f32 %v7731_v59, %v2543_v60  ;;  %5873 = vmatprep.mubr.f32.mxu1 %v2767_v4 }
 0x2fd   : > { %5874 = vmatmul.mubr.f32.gmra.mrb[48].mxu1 %v2768_v7  ;;  %v2770_v32 = vmax.f32 %v2702_v22, 0.0 }
 0x2fe   : > { %v2769_v37 = vmax.f32 %v2701_v38, 0.0  ;;  %v5801_v8 = vpop.f32.mrb[36].mxu0  ;;  %6344 = vmatpush3.bf16.msra.mxu1 %v6341_v28 }
 0x2ff   : > { %v2704_v30 = vadd.f32 %v5801_v8, %v7731_v59  ;;  %v2553_v24 = vpop.f32.mrb[37].mxu0  ;;  %6346 = vmatprep.subr.bf16.mxu1 %v6345_v26 }
 0x300   : > { %v2703_v33 = vadd.f32 %v7731_v59, %v2553_v24  ;;  %5876 = vmatprep.mubr.f32.mxu1 %v2769_v37 }
 0x301   : > { %5877 = vmatmul.mubr.f32.gmra.mrb[50].mxu1 %v2770_v32  ;;  %v2772_v28 = vmax.f32 %v2704_v30, 0.0 }
 0x302   : > { %v2771_v52 = vmax.f32 %v2703_v33, 0.0  ;;  %v5804_v47 = vpop.f32.mrb[38].mxu0  ;;  %6348 = vmatpush3.bf16.msra.mxu1 %v6345_v26 }
 0x303   : > { %v2706_v11 = vadd.f32 %v5804_v47, %v7731_v59  ;;  %v2563_v40 = vpop.f32.mrb[39].mxu0  ;;  %6350 = vmatprep.subr.bf16.mxu1 %v6349_v43 }
 0x304   : > { %v2705_v4 = vadd.f32 %v7731_v59, %v2563_v40  ;;  %5879 = vmatprep.mubr.f32.mxu1 %v2771_v52 }
 0x305   : > { %5880 = vmatmul.mubr.f32.gmra.mrb[52].mxu1 %v2772_v28  ;;  %v2774_v22 = vmax.f32 %v2706_v11, 0.0 }
 0x306   : > { %v2773_v44 = vmax.f32 %v2705_v4, 0.0  ;;  %v5807_v7 = vpop.f32.mrb[40].mxu0  ;;  %6352 = vmatpush3.bf16.msra.mxu1 %v6349_v43 }
 0x307   : > { %v2708_v60 = vadd.f32 %v5807_v7, %v7731_v59  ;;  %v2573_v38 = vpop.f32.mrb[41].mxu0  ;;  %6354 = vmatprep.subr.bf16.mxu1 %v6353_v63 }
 0x308   : > { %v2707_v26 = vadd.f32 %v7731_v59, %v2573_v38  ;;  %5882 = vmatprep.mubr.f32.mxu1 %v2773_v44 }
 0x309   : > { %5883 = vmatmul.mubr.f32.gmra.mrb[54].mxu1 %v2774_v22  ;;  %v2776_v37 = vmax.f32 %v2708_v60, 0.0 }
 0x30a   : > { %v2775_v39 = vmax.f32 %v2707_v26, 0.0  ;;  %v5810_v56 = vpop.f32.mrb[42].mxu0  ;;  %6356 = vmatpush3.bf16.msra.mxu1 %v6353_v63 }
 0x30b   : > { %v2710_v8 = vadd.f32 %v5810_v56, %v7731_v59  ;;  %v2583_v32 = vpop.f32.mrb[43].mxu0 }
 0x30c   : > { %v2709_v30 = vadd.f32 %v7731_v59, %v2583_v32  ;;  %5885 = vmatprep.mubr.f32.mxu1 %v2775_v39 }
 0x30d   : > { %5886 = vmatmul.mubr.f32.gmra.mrb[56].mxu1 %v2776_v37  ;;  %v2778_v33 = vmax.f32 %v2710_v8, 0.0 }
 0x30e   : > { %v2777_v24 = vmax.f32 %v2709_v30, 0.0  ;;  %v5813_v43 = vpop.f32.mrb[44].mxu0 }
 0x30f   : > { %v2712_v16 = vadd.f32 %v5813_v43, %v7731_v59  ;;  %v2593_v34 = vpop.f32.mrb[45].mxu0 }
 0x310   : > { %v2711_v52 = vadd.f32 %v7731_v59, %v2593_v34  ;;  %5888 = vmatprep.mubr.f32.mxu1 %v2777_v24 }
 0x311   : > { %5889 = vmatmul.mubr.f32.gmra.mrb[58].mxu1 %v2778_v33  ;;  %v2780_v11 = vmax.f32 %v2712_v16, 0.0 }
 0x312   : > { %v2779_v47 = vmax.f32 %v2711_v52, 0.0  ;;  %v5816_v28 = vpop.f32.mrb[46].mxu0 }
 0x313   : > { %v2714_v40 = vadd.f32 %v5816_v28, %v7731_v59  ;;  %v2603_v63 = vpop.f32.mrb[47].mxu0 }
 0x314   : > { %v2713_v4 = vadd.f32 %v7731_v59, %v2603_v63  ;;  %5891 = vmatprep.mubr.f32.mxu1 %v2779_v47 }
 0x315   : > { %5892 = vmatmul.mubr.f32.gmra.mrb[60].mxu1 %v2780_v11  ;;  %v2782_v22 = vmax.f32 %v2714_v40, 0.0 }
 0x316   : > { %v2781_v44 = vmax.f32 %v2713_v4, 0.0  ;;  %v5819_v7 = vpop.f32.mrb[48].mxu0 }
 0x317   : > { %v2716_v60 = vadd.f32 %v5819_v7, %v7731_v59  ;;  %v2613_v38 = vpop.f32.mrb[49].mxu0 }
 0x318   : > { %v2715_v26 = vadd.f32 %v7731_v59, %v2613_v38  ;;  %5894 = vmatprep.mubr.f32.mxu1 %v2781_v44 }
 0x319   : > { %5895 = vmatmul.mubr.f32.gmra.mrb[62].mxu1 %v2782_v22  ;;  %v2784_v37 = vmax.f32 %v2716_v60, 0.0  ;;  %v7810_v22 = vld [vmem:[%s8812_s9] ss:$0 sm:$0xff] }
 0x31a   : > { %v2783_v39 = vmax.f32 %v2715_v26, 0.0  ;;  %v5822_v56 = vpop.f32.mrb[50].mxu0 }
 0x31b   : > { %v2718_v8 = vadd.f32 %v5822_v56, %v7731_v59  ;;  %v2623_v32 = vpop.f32.mrb[51].mxu0 }
 0x31c   : > { %v2717_v30 = vadd.f32 %v7731_v59, %v2623_v32  ;;  %5897 = vmatprep.mubr.f32.mxu1 %v2783_v39 }
 0x31d   : > { %5898 = vmatmul.mubr.f32.gmra.mrb[64].mxu1 %v2784_v37  ;;  %v2786_v33 = vmax.f32 %v2718_v8, 0.0 }
 0x31e   : > { %v2785_v24 = vmax.f32 %v2717_v30, 0.0  ;;  %v5825_v43 = vpop.f32.mrb[52].mxu0 }
 0x31f   : > { %v2720_v16 = vadd.f32 %v5825_v43, %v7731_v59  ;;  %v2633_v34 = vpop.f32.mrb[53].mxu0 }
 0x320   : > { %v2719_v52 = vadd.f32 %v7731_v59, %v2633_v34  ;;  %5900 = vmatprep.mubr.f32.mxu1 %v2785_v24 }
 0x321   : > { %5901 = vmatmul.mubr.f32.gmra.mrb[66].mxu1 %v2786_v33  ;;  %v2788_v11 = vmax.f32 %v2720_v16, 0.0 }
 0x322   : > { %v2787_v47 = vmax.f32 %v2719_v52, 0.0  ;;  %v5828_v28 = vpop.f32.mrb[54].mxu0 }
 0x323   : > { %v2722_v40 = vadd.f32 %v5828_v28, %v7731_v59  ;;  %v2643_v63 = vpop.f32.mrb[55].mxu0 }
 0x324   : > { %v2721_v4 = vadd.f32 %v7731_v59, %v2643_v63  ;;  %5903 = vmatprep.mubr.f32.mxu1 %v2787_v47 }
 0x325   : > { %5904 = vmatmul.mubr.f32.gmra.mrb[68].mxu1 %v2788_v11  ;;  %v2790_v7 = vmax.f32 %v2722_v40, 0.0 }
 0x326   : > { %v2789_v44 = vmax.f32 %v2721_v4, 0.0 }
 0x328   : > { %5906 = vmatprep.mubr.f32.mxu1 %v2789_v44 }
 0x329   : > { %5907 = vmatmul.mubr.f32.gmra.mrb[70].mxu1 %v2790_v7 }
 0x3c0   : > { %v5863_v60 = vpop.f32.mrb[40].mxu1 }
 0x3c1   : > { %v2869_v38 = vadd.f32 %v5863_v60, %v7810_v22  ;;  %v2863_v26 = vpop.f32.mrb[41].mxu1 }
 0x3c2   : > { %v2864_v39 = vadd.f32 %v7810_v22, %v2863_v26 }
 0x3c3   : > { %v3023_v59 = vmax.f32 %v2869_v38, 0.0 }
 0x3c4   : > { %v3022_v56 = vmax.f32 %v2864_v39, 0.0  ;;  %v5866_v37 = vpop.f32.mrb[42].mxu1 }
 0x3c5   : > { %v2879_v8 = vadd.f32 %v5866_v37, %v7810_v22  ;;  %v2873_v32 = vpop.f32.mrb[43].mxu1 }
 0x3c6   : > { %v2874_v30 = vadd.f32 %v7810_v22, %v2873_v32  ;;  %5941 = vmatprep.mubr.f32.mxu1 %v3022_v56 }
 0x3c7   : > { %5942 = vmatmul.mubr.f32.vlgmr.msra.gmra.mrb[72].mxu1 %v3023_v59  ;;  %v3025_v33 = vmax.f32 %v2879_v8, 0.0 }
 0x3c8   : > { %v3024_v24 = vmax.f32 %v2874_v30, 0.0  ;;  %v5869_v43 = vpop.f32.mrb[44].mxu1 }
 0x3c9   : > { %v2889_v16 = vadd.f32 %v5869_v43, %v7810_v22  ;;  %v2883_v34 = vpop.f32.mrb[45].mxu1 }
 0x3ca   : > { %v2884_v52 = vadd.f32 %v7810_v22, %v2883_v34  ;;  %5944 = vmatprep.mubr.f32.mxu1 %v3024_v24 }
 0x3cb   : > { %5945 = vmatmul.mubr.f32.gmra.mrb[74].mxu1 %v3025_v33  ;;  %v3027_v11 = vmax.f32 %v2889_v16, 0.0 }
 0x3cc   : > { %v3026_v47 = vmax.f32 %v2884_v52, 0.0  ;;  %v5872_v28 = vpop.f32.mrb[46].mxu1 }
 0x3cd   : > { %v2899_v40 = vadd.f32 %v5872_v28, %v7810_v22  ;;  %v2893_v63 = vpop.f32.mrb[47].mxu1 }
 0x3ce   : > { %v2894_v4 = vadd.f32 %v7810_v22, %v2893_v63  ;;  %5947 = vmatprep.mubr.f32.mxu1 %v3026_v47 }
 0x3cf   : > { %5948 = vmatmul.mubr.f32.gmra.mrb[76].mxu1 %v3027_v11  ;;  %v3029_v60 = vmax.f32 %v2899_v40, 0.0 }
 0x3d0   : > { %v3028_v44 = vmax.f32 %v2894_v4, 0.0  ;;  %v5875_v7 = vpop.f32.mrb[48].mxu1 }
 0x3d1   : > { %v2909_v38 = vadd.f32 %v5875_v7, %v7810_v22  ;;  %v2903_v26 = vpop.f32.mrb[49].mxu1 }
 0x3d2   : > { %v2904_v39 = vadd.f32 %v7810_v22, %v2903_v26  ;;  %5950 = vmatprep.mubr.f32.mxu1 %v3028_v44 }
 0x3d3   : > { %5951 = vmatmul.mubr.f32.gmra.mrb[78].mxu1 %v3029_v60  ;;  %v3031_v59 = vmax.f32 %v2909_v38, 0.0 }
 0x3d4   : > { %v3030_v56 = vmax.f32 %v2904_v39, 0.0  ;;  %v5878_v37 = vpop.f32.mrb[50].mxu1 }
 0x3d5   : > { %v2919_v8 = vadd.f32 %v5878_v37, %v7810_v22  ;;  %v2913_v32 = vpop.f32.mrb[51].mxu1 }
 0x3d6   : > { %v2914_v30 = vadd.f32 %v7810_v22, %v2913_v32  ;;  %5953 = vmatprep.mubr.f32.mxu1 %v3030_v56 }
 0x3d7   : > { %5954 = vmatmul.mubr.f32.gmra.mrb[80].mxu1 %v3031_v59  ;;  %v3033_v33 = vmax.f32 %v2919_v8, 0.0 }
 0x3d8   : > { %v3032_v24 = vmax.f32 %v2914_v30, 0.0  ;;  %v5881_v43 = vpop.f32.mrb[52].mxu1 }
 0x3d9   : > { %v2929_v16 = vadd.f32 %v5881_v43, %v7810_v22  ;;  %v2923_v34 = vpop.f32.mrb[53].mxu1 }
 0x3da   : > { %v2924_v52 = vadd.f32 %v7810_v22, %v2923_v34  ;;  %5956 = vmatprep.mubr.f32.mxu1 %v3032_v24 }
 0x3db   : > { %5957 = vmatmul.mubr.f32.gmra.mrb[82].mxu1 %v3033_v33  ;;  %v3035_v11 = vmax.f32 %v2929_v16, 0.0 }
 0x3dc   : > { %v3034_v47 = vmax.f32 %v2924_v52, 0.0  ;;  %v5884_v28 = vpop.f32.mrb[54].mxu1 }
 0x3dd   : > { %v2939_v40 = vadd.f32 %v5884_v28, %v7810_v22  ;;  %v2933_v63 = vpop.f32.mrb[55].mxu1 }
 0x3de   : > { %v2934_v4 = vadd.f32 %v7810_v22, %v2933_v63  ;;  %5959 = vmatprep.mubr.f32.mxu1 %v3034_v47 }
 0x3df   : > { %5960 = vmatmul.mubr.f32.gmra.mrb[84].mxu1 %v3035_v11  ;;  %v3037_v60 = vmax.f32 %v2939_v40, 0.0 }
 0x3e0   : > { %v3036_v44 = vmax.f32 %v2934_v4, 0.0  ;;  %v5887_v7 = vpop.f32.mrb[56].mxu1 }
 0x3e1   : > { %v2949_v38 = vadd.f32 %v5887_v7, %v7810_v22  ;;  %v2943_v26 = vpop.f32.mrb[57].mxu1 }
 0x3e2   : > { %v2944_v39 = vadd.f32 %v7810_v22, %v2943_v26  ;;  %5962 = vmatprep.mubr.f32.mxu1 %v3036_v44 }
 0x3e3   : > { %5963 = vmatmul.mubr.f32.gmra.mrb[86].mxu1 %v3037_v60  ;;  %v3039_v59 = vmax.f32 %v2949_v38, 0.0 }
 0x3e4   : > { %v3038_v56 = vmax.f32 %v2944_v39, 0.0  ;;  %v5890_v37 = vpop.f32.mrb[58].mxu1 }
 0x3e5   : > { %v2959_v8 = vadd.f32 %v5890_v37, %v7810_v22  ;;  %v2953_v32 = vpop.f32.mrb[59].mxu1 }
 0x3e6   : > { %v2954_v30 = vadd.f32 %v7810_v22, %v2953_v32  ;;  %5965 = vmatprep.mubr.f32.mxu1 %v3038_v56 }
 0x3e7   : > { %5966 = vmatmul.mubr.f32.gmra.mrb[88].mxu1 %v3039_v59  ;;  %v3041_v33 = vmax.f32 %v2959_v8, 0.0 }
 0x3e8   : > { %v3040_v24 = vmax.f32 %v2954_v30, 0.0  ;;  %v5893_v43 = vpop.f32.mrb[60].mxu1 }
 0x3e9   : > { %v2969_v16 = vadd.f32 %v5893_v43, %v7810_v22  ;;  %v2963_v34 = vpop.f32.mrb[61].mxu1 }
 0x3ea   : > { %v2964_v52 = vadd.f32 %v7810_v22, %v2963_v34  ;;  %5968 = vmatprep.mubr.f32.mxu1 %v3040_v24 }
 0x3eb   : > { %5969 = vmatmul.mubr.f32.gmra.mrb[90].mxu1 %v3041_v33  ;;  %v3043_v11 = vmax.f32 %v2969_v16, 0.0 }
 0x3ec   : > { %v3042_v47 = vmax.f32 %v2964_v52, 0.0  ;;  %v5896_v28 = vpop.f32.mrb[62].mxu1 }
 0x3ed   : > { %v2979_v40 = vadd.f32 %v5896_v28, %v7810_v22  ;;  %v2973_v63 = vpop.f32.mrb[63].mxu1 }
 0x3ee   : > { %v2974_v4 = vadd.f32 %v7810_v22, %v2973_v63  ;;  %5971 = vmatprep.mubr.f32.mxu1 %v3042_v47 }
 0x3ef   : > { %5972 = vmatmul.mubr.f32.gmra.mrb[92].mxu1 %v3043_v11  ;;  %v3045_v60 = vmax.f32 %v2979_v40, 0.0 }
 0x3f0   : > { %v3044_v44 = vmax.f32 %v2974_v4, 0.0  ;;  %v5899_v7 = vpop.f32.mrb[64].mxu1 }
 0x3f1   : > { %v2989_v38 = vadd.f32 %v5899_v7, %v7810_v22  ;;  %v2983_v26 = vpop.f32.mrb[65].mxu1 }
 0x3f2   : > { %v2984_v39 = vadd.f32 %v7810_v22, %v2983_v26  ;;  %5974 = vmatprep.mubr.f32.mxu1 %v3044_v44 }
 0x3f3   : > { %5975 = vmatmul.mubr.f32.gmra.mrb[94].mxu1 %v3045_v60  ;;  %v3047_v59 = vmax.f32 %v2989_v38, 0.0  ;;  %v7847_v60 = vld [vmem:[%s8814_s11] ss:$0 sm:$0xff] }
 0x3f4   : > { %v3046_v56 = vmax.f32 %v2984_v39, 0.0  ;;  %v5902_v37 = vpop.f32.mrb[66].mxu1 }
 0x3f5   : > { %v2999_v8 = vadd.f32 %v5902_v37, %v7810_v22  ;;  %v2993_v32 = vpop.f32.mrb[67].mxu1 }
 0x3f6   : > { %v2994_v30 = vadd.f32 %v7810_v22, %v2993_v32  ;;  %5977 = vmatprep.mubr.f32.mxu1 %v3046_v56 }
 0x3f7   : > { %5978 = vmatmul.mubr.f32.gmra.mrb[96].mxu1 %v3047_v59  ;;  %v3049_v33 = vmax.f32 %v2999_v8, 0.0 }
 0x3f8   : > { %v3048_v24 = vmax.f32 %v2994_v30, 0.0  ;;  %v5905_v43 = vpop.f32.mrb[68].mxu1 }
 0x3f9   : > { %v3009_v16 = vadd.f32 %v5905_v43, %v7810_v22  ;;  %v3003_v34 = vpop.f32.mrb[69].mxu1 }
 0x3fa   : > { %v3004_v52 = vadd.f32 %v7810_v22, %v3003_v34  ;;  %5980 = vmatprep.mubr.f32.mxu1 %v3048_v24 }
 0x3fb   : > { %5981 = vmatmul.mubr.f32.gmra.mrb[98].mxu1 %v3049_v33  ;;  %v3051_v11 = vmax.f32 %v3009_v16, 0.0 }
 0x3fc   : > { %v3050_v47 = vmax.f32 %v3004_v52, 0.0  ;;  %v5908_v28 = vpop.f32.mrb[70].mxu1 }
 0x3fd   : > { %v3019_v40 = vadd.f32 %v5908_v28, %v7810_v22  ;;  %v3013_v63 = vpop.f32.mrb[71].mxu1 }
 0x3fe   : > { %v3014_v4 = vadd.f32 %v7810_v22, %v3013_v63  ;;  %5983 = vmatprep.mubr.f32.mxu1 %v3050_v47 }
 0x3ff   : > { %5984 = vmatmul.mubr.f32.gmra.mrb[100].mxu1 %v3051_v11  ;;  %v3053_v7 = vmax.f32 %v3019_v40, 0.0 }
 0x400   : > { %v3052_v44 = vmax.f32 %v3014_v4, 0.0 }
 0x402   : > { %5986 = vmatprep.mubr.f32.mxu1 %v3052_v44 }
 0x403   : > { %5987 = vmatmul.mubr.f32.gmra.mrb[102].mxu1 %v3053_v7 }
 0x49a   : > { %v5943_v38 = vpop.f32.mrb[72].mxu1 }
 0x49b   : > { %v7850_v26 = vadd.f32 %v5943_v38, %v7847_v60  ;;  %v3126_v39 = vpop.f32.mrb[73].mxu1 }
 0x49c   : > { %v7853_v56 = vadd.f32 %v7847_v60, %v3126_v39 }
 0x49d   : > { %3287 = vadd.xlane.f32.xlu0 %v7850_v26  ;;  %v3383_v24 = vmul.f32 %v7850_v26, %v7850_v26 }
 0x49e   : > { %v5946_v22 = vpop.f32.mrb[74].mxu1  ;;  %v3382_v37 = vmul.f32 %v7853_v56, %v7853_v56 }
 0x49f   : > { %v3136_v59 = vpop.f32.mrb[75].mxu1  ;;  %v7868_v16 = vadd.f32 %v5946_v22, %v7847_v60 }
 0x4a0   : > { %3414 = vadd.xlane.f32.xlu1 %v3382_v37  ;;  %v7860_v8 = vadd.f32 %v7847_v60, %v3136_v59 }
 0x4a1   : > { %3285 = vadd.xlane.f32.xlu0 %v7853_v56  ;;  %v3385_v11 = vmul.f32 %v7868_v16, %v7868_v16 }
 0x4a2   : > { %v5949_v32 = vpop.f32.mrb[76].mxu1  ;;  %v3384_v33 = vmul.f32 %v7860_v8, %v7860_v8 }
 0x4a3   : > { %v3146_v30 = vpop.f32.mrb[77].mxu1  ;;  %v7880_v4 = vadd.f32 %v5949_v32, %v7847_v60 }
 0x4a4   : > { %3289 = vadd.xlane.f32.xlu1 %v7860_v8  ;;  %v7872_v52 = vadd.f32 %v7847_v60, %v3146_v30 }
 0x4a5   : > { %3416 = vadd.xlane.f32.xlu0 %v3383_v24  ;;  %v3387_v22 = vmul.f32 %v7880_v4, %v7880_v4 }
 0x4a6   : > { %v5952_v43 = vpop.f32.mrb[78].mxu1  ;;  %v3386_v63 = vmul.f32 %v7872_v52, %v7872_v52 }
 0x4a7   : > { %v3156_v34 = vpop.f32.mrb[79].mxu1  ;;  %v7894_v32 = vadd.f32 %v5952_v43, %v7847_v60 }
 0x4a8   : > { %3418 = vadd.xlane.f32.xlu1 %v3384_v33  ;;  %v7884_v7 = vadd.f32 %v7847_v60, %v3156_v34 }
 0x4a9   : > { %3291 = vadd.xlane.f32.xlu0 %v7868_v16 }
 0x4aa   : > { %v5955_v47 = vpop.f32.mrb[80].mxu1  ;;  %v3388_v59 = vmul.f32 %v7884_v7, %v7884_v7 }
 0x4ab   : > { %v3166_v28 = vpop.f32.mrb[81].mxu1 }
 0x4ac   : > { %3293 = vadd.xlane.f32.xlu1 %v7872_v52  ;;  %v7898_v24 = vadd.f32 %v7847_v60, %v3166_v28 }
 0x4ad   : > { %3420 = vadd.xlane.f32.xlu0 %v3385_v11  ;;  %v3389_v11 = vmul.f32 %v7894_v32, %v7894_v32 }
 0x4ae   : > { %v5958_v40 = vpop.f32.mrb[82].mxu1 }
 0x4af   : > { %v3176_v44 = vpop.f32.mrb[83].mxu1 }
 0x4b0   : > { %3422 = vadd.xlane.f32.xlu1 %v3386_v63 }
 0x4b1   : > { %3295 = vadd.xlane.f32.xlu0 %v7880_v4 }
 0x4b2   : > { %v5961_v38 = vpop.f32.mrb[84].mxu1 }
 0x4b3   : > { %v3186_v39 = vpop.f32.mrb[85].mxu1 }
 0x4b4   : > { %3297 = vadd.xlane.f32.xlu1 %v7884_v7 }
 0x4b5   : > { %3424 = vadd.xlane.f32.xlu0 %v3387_v22  ;;  %v3390_v22 = vmul.f32 %v7898_v24, %v7898_v24 }
 0x4b6   : > { %v7889_v37 = vpop.f32.mrb[86].mxu1 }
 0x4b7   : > { %v3196_v30 = vpop.f32.mrb[87].mxu1 }
 0x4b8   : > { %3426 = vadd.xlane.f32.xlu1 %v3388_v59  ;;  %v7909_v59 = vadd.f32 %v5955_v47, %v7847_v60 }
 0x4b9   : > { %3299 = vadd.xlane.f32.xlu0 %v7894_v32 }
 0x4ba   : > { %v5967_v33 = vpop.f32.mrb[88].mxu1  ;;  %v3391_v47 = vmul.f32 %v7909_v59, %v7909_v59 }
 0x4bb   : > { %v3206_v34 = vpop.f32.mrb[89].mxu1 }
 0x4bc   : > { %v7903_v63 = vadd.f32 %v7847_v60, %v3206_v34  ;;  %3301 = vadd.xlane.f32.xlu1 %v7898_v24  ;;  %v7919_v34 = vadd.f32 %v7847_v60, %v3176_v44  ;;  %v7933_v44 = vadd.f32 %v5958_v40, %v7847_v60 }
 0x4bd   : > { %3428 = vadd.xlane.f32.xlu0 %v3389_v11 }
 0x4be   : > { %v5970_v43 = vpop.f32.mrb[90].mxu1  ;;  %v3393_v40 = vmul.f32 %v7933_v44, %v7933_v44 }
 0x4bf   : > { %v7912_v28 = vadd.f32 %v5970_v43, %v7847_v60  ;;  %v3216_v25 = vpop.f32.mrb[91].mxu1 }
 0x4c0   : > { %v7915_v23 = vadd.f32 %v7847_v60, %v3216_v25  ;;  %3430 = vadd.xlane.f32.xlu1 %v3390_v22  ;;  %v3392_v22 = vmul.f32 %v7919_v34, %v7919_v34 }
 0x4c1   : > { %8911 = vst [vmem:[#allocation22_spill] sm:$0xff] %v7912_v28  ;;  %3303 = vadd.xlane.f32.xlu0 %v7909_v59 }
 0x4c2   : > { %8912 = vst [vmem:[#allocation23_spill] sm:$0xff] %v7915_v23  ;;  %v5973_v11 = vpop.f32.mrb[92].mxu1 }
 0x4c3   : > { %v7922_v20 = vadd.f32 %v5973_v11, %v7847_v60  ;;  %v3226_v18 = vpop.f32.mrb[93].mxu1 }
 0x4c4   : > { %v7927_v43 = vadd.f32 %v7847_v60, %v3226_v18  ;;  %3305 = vadd.xlane.f32.xlu1 %v7919_v34  ;;  %v7943_v18 = vadd.f32 %v7847_v60, %v3186_v39  ;;  %v7957_v39 = vadd.f32 %v5961_v38, %v7847_v60 }
 0x4c5   : > { %8913 = vst [vmem:[#allocation24_spill] sm:$0xff] %v7922_v20  ;;  %3432 = vadd.xlane.f32.xlu0 %v3391_v47 }
 0x4c6   : > { %8914 = vst [vmem:[#allocation25_spill] sm:$0xff] %v7927_v43  ;;  %v5976_v25 = vpop.f32.mrb[94].mxu1  ;;  %v3395_v38 = vmul.f32 %v7957_v39, %v7957_v39 }
 0x4c7   : > { %v7936_v11 = vadd.f32 %v5976_v25, %v7847_v60  ;;  %v3236_v17 = vpop.f32.mrb[95].mxu1 }
 0x4c8   : > { %v7939_v15 = vadd.f32 %v7847_v60, %v3236_v17  ;;  %3434 = vadd.xlane.f32.xlu1 %v3392_v22  ;;  %v3394_v22 = vmul.f32 %v7943_v18, %v7943_v18 }
 0x4c9   : > { %8915 = vst [vmem:[#allocation26_spill] sm:$0xff] %v7936_v11  ;;  %3307 = vadd.xlane.f32.xlu0 %v7933_v44 }
 0x4ca   : > { %8916 = vst [vmem:[#allocation27_spill] sm:$0xff] %v7939_v15  ;;  %v5979_v47 = vpop.f32.mrb[96].mxu1 }
 0x4cb   : > { %v7946_v14 = vadd.f32 %v5979_v47, %v7847_v60  ;;  %v3246_v45 = vpop.f32.mrb[97].mxu1 }
 0x4cc   : > { %v7951_v25 = vadd.f32 %v7847_v60, %v3246_v45  ;;  %3309 = vadd.xlane.f32.xlu1 %v7943_v18  ;;  %v7967_v45 = vadd.f32 %v7847_v60, %v3196_v30  ;;  %v7982_v30 = vadd.f32 %v7889_v37, %v7847_v60  ;;  %v3398_v37 = vmul.f32 %v7903_v63, %v7903_v63 }
 0x4cd   : > { %8917 = vst [vmem:[#allocation28_spill] sm:$0xff] %v7946_v14  ;;  %3436 = vadd.xlane.f32.xlu0 %v3393_v40 }
 0x4ce   : > { %8918 = vst [vmem:[#allocation29_spill] sm:$0xff] %v7951_v25  ;;  %v5982_v17 = vpop.f32.mrb[98].mxu1  ;;  %8923 = vst [vmem:[#allocation34_spill] sm:$0xff] %v7982_v30 }
 0x4cf   : > { %v7960_v47 = vadd.f32 %v5982_v17, %v7847_v60  ;;  %v3256_v13 = vpop.f32.mrb[99].mxu1 }
 0x4d0   : > { %v7963_v49 = vadd.f32 %v7847_v60, %v3256_v13  ;;  %3438 = vadd.xlane.f32.xlu1 %v3394_v22  ;;  %v3396_v22 = vmul.f32 %v7967_v45, %v7967_v45 }
 0x4d1   : > { %8919 = vst [vmem:[#allocation30_spill] sm:$0xff] %v7960_v47  ;;  %3311 = vadd.xlane.f32.xlu0 %v7957_v39 }
 0x4d2   : > { %8920 = vst [vmem:[#allocation31_spill] sm:$0xff] %v7963_v49  ;;  %v5985_v40 = vpop.f32.mrb[100].mxu1 }
 0x4d3   : > { %v7970_v10 = vadd.f32 %v5985_v40, %v7847_v60  ;;  %v3266_v12 = vpop.f32.mrb[101].mxu1 }
 0x4d4   : > { %v7975_v17 = vadd.f32 %v7847_v60, %v3266_v12  ;;  %3313 = vadd.xlane.f32.xlu1 %v7967_v45  ;;  %v7992_v12 = vadd.f32 %v5967_v33, %v7847_v60  ;;  %v3402_v33 = vmul.f32 %v7927_v43, %v7927_v43 }
 0x4d5   : > { %8921 = vst [vmem:[#allocation32_spill] sm:$0xff] %v7970_v10  ;;  %3440 = vadd.xlane.f32.xlu0 %v3395_v38 }
 0x4d6   : > { %8922 = vst [vmem:[#allocation33_spill] sm:$0xff] %v7975_v17  ;;  %v5988_v13 = vpop.f32.mrb[102].mxu1  ;;  %8926 = vst [vmem:[#allocation37_spill] sm:$0xff] %v7992_v12  ;;  %v3399_v38 = vmul.f32 %v7992_v12, %v7992_v12 }
 0x4d7   : > { %v7985_v40 = vadd.f32 %v5988_v13, %v7847_v60  ;;  %v3276_v9 = vpop.f32.mrb[103].mxu1  ;;  %v3403_v13 = vmul.f32 %v7922_v20, %v7922_v20 }
 0x4d8   : > { %v7988_v31 = vadd.f32 %v7847_v60, %v3276_v9  ;;  %3442 = vadd.xlane.f32.xlu1 %v3396_v22  ;;  %v3400_v9 = vmul.f32 %v7915_v23, %v7915_v23  ;;  %v3401_v60 = vmul.f32 %v7912_v28, %v7912_v28  ;;  %v3404_v22 = vmul.f32 %v7939_v15, %v7939_v15 }
 0x4d9   : > { %8924 = vst [vmem:[#allocation35_spill] sm:$0xff] %v7985_v40  ;;  %3315 = vadd.xlane.f32.xlu0 %v7982_v30 }
 0x4da   : > { %8925 = vst [vmem:[#allocation36_spill] sm:$0xff] %v7988_v31 }
 0x4dc   : > { %3319 = vadd.xlane.f32.xlu1 %v7992_v12 }
 0x4dd   : > { %3317 = vadd.xlane.f32.xlu0 %v7903_v63 }
 0x4e0   : > { %3446 = vadd.xlane.f32.xlu1 %v3398_v37  ;;  %v3405_v37 = vmul.f32 %v7936_v11, %v7936_v11 }
 0x4e1   : > { %3448 = vadd.xlane.f32.xlu0 %v3399_v38  ;;  %v3406_v38 = vmul.f32 %v7951_v25, %v7951_v25 }
 0x4e4   : > { %3321 = vadd.xlane.f32.xlu1 %v7915_v23 }
 0x4e5   : > { %3323 = vadd.xlane.f32.xlu0 %v7912_v28 }
 0x4e8   : > { %3450 = vadd.xlane.f32.xlu1 %v3400_v9  ;;  %v3407_v9 = vmul.f32 %v7946_v14, %v7946_v14 }
 0x4e9   : > { %3452 = vadd.xlane.f32.xlu0 %v3401_v60  ;;  %v3408_v60 = vmul.f32 %v7963_v49, %v7963_v49 }
 0x4ec   : > { %3325 = vadd.xlane.f32.xlu1 %v7927_v43 }
 0x4ed   : > { %3327 = vadd.xlane.f32.xlu0 %v7922_v20 }
 0x4f0   : > { %3454 = vadd.xlane.f32.xlu1 %v3402_v33  ;;  %v3409_v33 = vmul.f32 %v7960_v47, %v7960_v47 }
 0x4f1   : > { %3456 = vadd.xlane.f32.xlu0 %v3403_v13  ;;  %v3410_v13 = vmul.f32 %v7975_v17, %v7975_v17 }
 0x4f4   : > { %3329 = vadd.xlane.f32.xlu1 %v7939_v15 }
 0x4f5   : > { %3331 = vadd.xlane.f32.xlu0 %v7936_v11 }
 0x4f8   : > { %3458 = vadd.xlane.f32.xlu1 %v3404_v22  ;;  %v3411_v22 = vmul.f32 %v7970_v10, %v7970_v10 }
 0x4f9   : > { %3460 = vadd.xlane.f32.xlu0 %v3405_v37  ;;  %v3412_v37 = vmul.f32 %v7988_v31, %v7988_v31 }
 0x4fc   : > { %3333 = vadd.xlane.f32.xlu1 %v7951_v25 }
 0x4fd   : > { %3335 = vadd.xlane.f32.xlu0 %v7946_v14 }
 0x500   : > { %3462 = vadd.xlane.f32.xlu1 %v3406_v38  ;;  %v3413_v38 = vmul.f32 %v7985_v40, %v7985_v40 }
 0x501   : > { %3464 = vadd.xlane.f32.xlu0 %v3407_v9  ;;  %v3397_v9 = vmul.f32 %v7982_v30, %v7982_v30 }
 0x504   : > { %3337 = vadd.xlane.f32.xlu1 %v7963_v49 }
 0x505   : > { %3339 = vadd.xlane.f32.xlu0 %v7960_v47 }
 0x508   : > { %3466 = vadd.xlane.f32.xlu1 %v3408_v60 }
 0x509   : > { %3468 = vadd.xlane.f32.xlu0 %v3409_v33 }
 0x50c   : > { %3341 = vadd.xlane.f32.xlu1 %v7975_v17 }
 0x50d   : > { %3343 = vadd.xlane.f32.xlu0 %v7970_v10 }
 0x510   : > { %3470 = vadd.xlane.f32.xlu1 %v3410_v13 }
 0x511   : > { %3472 = vadd.xlane.f32.xlu0 %v3411_v22 }
 0x514   : > { %3345 = vadd.xlane.f32.xlu1 %v7988_v31 }
 0x515   : > { %3347 = vadd.xlane.f32.xlu0 %v7985_v40 }
 0x518   : > { %3474 = vadd.xlane.f32.xlu1 %v3412_v37 }
 0x519   : > { %3476 = vadd.xlane.f32.xlu0 %v3413_v38 }
 0x51d   : > { %3444 = vadd.xlane.f32.xlu0 %v3397_v9 }
 0x52a   : > { %v3288_v60 = vpop.xlane.xlu0 %3287 }
 0x52b   : > { %v3351_v22 = vmul.f32 0.0078125, %v3288_v60 }
 0x52d   : > { %v3415_v33 = vpop.xlane.xlu1 %3414  ;;  %v3511_v31 = vmul.f32 %v3351_v22, %v3351_v22 }
 0x52e   : > { %v3286_v13 = vpop.xlane.xlu0 %3285  ;;  %v3478_v17 = vmul.f32 0.0078125, %v3415_v33 }
 0x52f   : > { %v3350_v10 = vmul.f32 0.0078125, %v3286_v13 }
 0x531   : > { %v3510_v47 = vmul.f32 %v3350_v10, %v3350_v10  ;;  %v3290_v49 = vpop.xlane.xlu1 %3289 }
 0x532   : > { %v3352_v14 = vmul.f32 0.0078125, %v3290_v49  ;;  %v3417_v25 = vpop.xlane.xlu0 %3416 }
 0x533   : > { %v3542_v11 = vsub.f32 %v3478_v17, %v3510_v47  ;;  %v3479_v15 = vmul.f32 0.0078125, %v3417_v25 }
 0x534   : > { %v3512_v20 = vmul.f32 %v3352_v14, %v3352_v14 }
 0x535   : > { %v3606_v40 = vadd.f32 1e-05, %v3542_v11  ;;  %v3543_v37 = vsub.f32 %v3479_v15, %v3511_v31  ;;  %v3419_v38 = vpop.xlane.xlu1 %3418 }
 0x536   : > { %v3480_v43 = vmul.f32 0.0078125, %v3419_v38  ;;  %v3292_v30 = vpop.xlane.xlu0 %3291 }
 0x537   : > { %6691 = vrsqrt.f32 %v3606_v40  ;;  %v3607_v9 = vadd.f32 1e-05, %v3543_v37  ;;  %v8044_v28 = vmul.f32 0.0078125, %v3292_v30 }
 0x538   : > { %v3544_v60 = vsub.f32 %v3480_v43, %v3512_v20  ;;  %v3574_v43 = vsub.f32 %v7853_v56, %v3350_v10  ;;  %v8066_v10 = vld [vmem:[%s8816_s13] ss:$0 sm:$0xff] }
 0x539   : > { %6693 = vrsqrt.f32 %v3607_v9  ;;  %v3294_v33 = vpop.xlane.xlu1 %3293  ;;  %v3513_v25 = vmul.f32 %v8044_v28, %v8044_v28  ;;  %v8058_v9 = vld [vmem:[%s8815_s12] ss:$0 sm:$0xff] }
 0x53a   : > { %v3608_v13 = vadd.f32 1e-05, %v3544_v60  ;;  %v8046_v23 = vmul.f32 0.0078125, %v3294_v33  ;;  %v3421_v49 = vpop.xlane.xlu0 %3420 }
 0x53b   : > { %v3481_v11 = vmul.f32 0.0078125, %v3421_v49 }
 0x53c   : > { %6695 = vrsqrt.f32 %v3608_v13  ;;  %v3514_v47 = vmul.f32 %v8046_v23, %v8046_v23 }
 0x53d   : > { %v3545_v15 = vsub.f32 %v3481_v11, %v3513_v25  ;;  %v3423_v31 = vpop.xlane.xlu1 %3422 }
 0x53e   : > { %v3482_v17 = vmul.f32 0.0078125, %v3423_v31  ;;  %v3296_v30 = vpop.xlane.xlu0 %3295 }
 0x53f   : > { %v3609_v40 = vadd.f32 1e-05, %v3545_v15  ;;  %v8052_v20 = vmul.f32 0.0078125, %v3296_v30  ;;  %v3575_v15 = vsub.f32 %v7850_v26, %v3351_v22 }
 0x540   : > { %v3546_v37 = vsub.f32 %v3482_v17, %v3514_v47  ;;  %v3576_v17 = vsub.f32 %v7860_v8, %v3352_v14  ;;  %v6755_v14 = vld [vmem:[%s6996_s5] sm:$0xff] }
 0x541   : > { %v6692_v38 = vpop.eup %6691  ;;  %6697 = vrsqrt.f32 %v3609_v40  ;;  %v3298_v60 = vpop.xlane.xlu1 %3297  ;;  %v3515_v56 = vmul.f32 %v8052_v20, %v8052_v20 }
 0x542   : > { %v3670_v33 = vmul.f32 %v6692_v38, %v3574_v43  ;;  %v3610_v13 = vadd.f32 1e-05, %v3546_v37  ;;  %v8060_v49 = vmul.f32 0.0078125, %v3298_v60  ;;  %v3425_v25 = vpop.xlane.xlu0 %3424 }
 0x543   : > { %v6694_v11 = vpop.eup %6693  ;;  %v3483_v31 = vmul.f32 0.0078125, %v3425_v25 }
 0x544   : > { %v3708_v47 = vmul.f32 %v8058_v9, %v3670_v33  ;;  %6699 = vrsqrt.f32 %v3610_v13  ;;  %v3671_v43 = vmul.f32 %v6694_v11, %v3575_v15  ;;  %v3516_v37 = vmul.f32 %v8060_v49, %v8060_v49 }
 0x545   : > { %v3547_v30 = vsub.f32 %v3483_v31, %v3515_v56  ;;  %v3427_v40 = vpop.xlane.xlu1 %3426  ;;  %v3577_v31 = vsub.f32 %v7868_v16, %v8044_v28  ;;  %v3578_v28 = vsub.f32 %v7872_v52, %v8046_v23  ;;  %v8928_v23 = vpack.i.bf16 %v7192_v50, %v7280_v21  ;;  %v6757_v52 = vld [vmem:[%s6996_s5 + $0x10] sm:$0xff] }
 0x546   : > { %v6696_v26 = vpop.eup %6695  ;;  %v8073_v22 = vadd.f32 %v8066_v10, %v3708_v47  ;;  %v3484_v38 = vmul.f32 0.0078125, %v3427_v40  ;;  %v3300_v60 = vpop.xlane.xlu0 %3299  ;;  %v3709_v33 = vmul.f32 %v8058_v9, %v3671_v43 }
 0x547   : > { %v3611_v25 = vadd.f32 1e-05, %v3547_v30  ;;  %v8077_v12 = vmul.f32 0.0078125, %v3300_v60  ;;  %v3672_v13 = vmul.f32 %v6696_v26, %v3576_v17  ;;  %v6756_v60 = vld [vmem:[%s6996_s5 + $0x8] sm:$0xff] }
 0x548   : > { %v3778_v8 = vadd.f32 %v6755_v14, %v8073_v22  ;;  %v3548_v11 = vsub.f32 %v3484_v38, %v3516_v37  ;;  %v8083_v56 = vadd.f32 %v8066_v10, %v3709_v33  ;;  %v8927_v38 = vpack.i.bf16 %v7183_v48, %v7283_v27 }
 0x549   : > { %6701 = vrsqrt.f32 %v3611_v25  ;;  %v3302_v15 = vpop.xlane.xlu1 %3301  ;;  %v3710_v17 = vmul.f32 %v8058_v9, %v3672_v13  ;;  %v3517_v26 = vmul.f32 %v8077_v12, %v8077_v12 }
 0x54a   : > { %3810 = vst [vmem:[%s7001_s21] sm:$0xff] %v3778_v8  ;;  %v3612_v47 = vadd.f32 1e-05, %v3548_v11  ;;  %v8088_v30 = vmul.f32 0.0078125, %v3302_v15  ;;  %v3429_v40 = vpop.xlane.xlu0 %3428  ;;  %v3779_v25 = vadd.f32 %v6756_v60, %v8083_v56  ;;  %v3579_v60 = vsub.f32 %v7880_v4, %v8052_v20 }
 0x54b   : > { %v6698_v43 = vpop.eup %6697  ;;  %v3485_v37 = vmul.f32 0.0078125, %v3429_v40  ;;  %6620 = vxpose.xlu1.b32.start [1/16] (narrow) %v8927_v38, 64  ;;  %v8102_v14 = vadd.f32 %v8066_v10, %v3710_v17  ;;  %v3580_v20 = vsub.f32 %v7884_v7, %v8060_v49  ;;  %v8930_v7 = vpack.i.bf16 %v7204_v53, %v7296_v35  ;;  %v6760_v35 = vld [vmem:[%s6996_s5 + $0x28] sm:$0xff] }
 0x54c   : > { %6703 = vrsqrt.f32 %v3612_v47  ;;  %v3673_v16 = vmul.f32 %v6698_v43, %v3577_v31  ;;  %3811 = vst [vmem:[%s7001_s21 + $0x8] sm:$0xff] %v3779_v25  ;;  %v3518_v48 = vmul.f32 %v8088_v30, %v8088_v30 }
 0x54d   : > { %v3549_v33 = vsub.f32 %v3485_v37, %v3517_v26  ;;  %v3431_v13 = vpop.xlane.xlu1 %3430  ;;  %v3780_v40 = vadd.f32 %v6757_v52, %v8102_v14 }
 0x54e   : > { %v6700_v8 = vpop.eup %6699  ;;  %v3486_v27 = vmul.f32 0.0078125, %v3431_v13  ;;  %v3304_v11 = vpop.xlane.xlu0 %3303  ;;  %v3711_v15 = vmul.f32 %v8058_v9, %v3673_v16  ;;  %v6758_v16 = vld [vmem:[%s6996_s5 + $0x18] sm:$0xff] }
 0x54f   : > { %v3613_v47 = vadd.f32 1e-05, %v3549_v33  ;;  %v8107_v31 = vmul.f32 0.0078125, %v3304_v11  ;;  %6622 = vxpose.xlu1.b32.cont [2/16] (narrow) %v8928_v23, 64  ;;  %v3674_v17 = vmul.f32 %v6700_v8, %v3578_v28  ;;  %3812 = vst [vmem:[%s7001_s21 + $0x10] sm:$0xff] %v3780_v40 }
 0x550   : > { %v3550_v43 = vsub.f32 %v3486_v27, %v3518_v48  ;;  %v8115_v26 = vadd.f32 %v8066_v10, %v3711_v15  ;;  %v8929_v48 = vpack.i.bf16 %v7195_v51, %v7299_v36 }
 0x551   : > { %6705 = vrsqrt.f32 %v3613_v47  ;;  %v3306_v37 = vpop.xlane.xlu1 %3305  ;;  %v3712_v38 = vmul.f32 %v8058_v9, %v3674_v17  ;;  %v3519_v13 = vmul.f32 %v8107_v31, %v8107_v31  ;;  %v6759_v47 = vld [vmem:[%s6996_s5 + $0x20] sm:$0xff] }
 0x552   : > { %v3614_v25 = vadd.f32 1e-05, %v3550_v43  ;;  %v8121_v50 = vmul.f32 0.0078125, %v3306_v37  ;;  %v3433_v21 = vpop.xlane.xlu0 %3432  ;;  %v3781_v28 = vadd.f32 %v6758_v16, %v8115_v26  ;;  %v3581_v16 = vsub.f32 %v7894_v32, %v8077_v12 }
 0x553   : > { %v6702_v33 = vpop.eup %6701  ;;  %v3487_v8 = vmul.f32 0.0078125, %v3433_v21  ;;  %6624 = vxpose.xlu1.b32.cont [3/16] (narrow) %v8929_v48, 64  ;;  %v8131_v27 = vadd.f32 %v8066_v10, %v3712_v38  ;;  %v3582_v12 = vsub.f32 %v7898_v24, %v8088_v30  ;;  %v8932_v24 = vpack.i.bf16 %v7216_v57, %v7312_v41  ;;  %v6762_v41 = vld [vmem:[%s6996_s5 + $0x38] sm:$0xff] }
 0x554   : > { %6707 = vrsqrt.f32 %v3614_v25  ;;  %3813 = vst [vmem:[%s7001_s21 + $0x18] sm:$0xff] %v3781_v28  ;;  %v3675_v4 = vmul.f32 %v6702_v33, %v3579_v60  ;;  %v3520_v51 = vmul.f32 %v8121_v50, %v8121_v50 }
 0x555   : > { %v3551_v11 = vsub.f32 %v3487_v8, %v3519_v13  ;;  %v3435_v15 = vpop.xlane.xlu1 %3434  ;;  %v3782_v23 = vadd.f32 %v6759_v47, %v8131_v27 }
 0x556   : > { %v6704_v52 = vpop.eup %6703  ;;  %v3488_v36 = vmul.f32 0.0078125, %v3435_v15  ;;  %v3308_v40 = vpop.xlane.xlu0 %3307  ;;  %v3713_v17 = vmul.f32 %v8058_v9, %v3675_v4 }
 0x557   : > { %v3615_v43 = vadd.f32 1e-05, %v3551_v11  ;;  %v8141_v37 = vmul.f32 0.0078125, %v3308_v40  ;;  %6626 = vxpose.xlu1.b32.cont [4/16] (narrow) %v8930_v7, 64  ;;  %3814 = vst [vmem:[%s7001_s21 + $0x20] sm:$0xff] %v3782_v23  ;;  %v3676_v49 = vmul.f32 %v6704_v52, %v3580_v20  ;;  %v8931_v20 = vpack.i.bf16 %v7207_v54, %v7315_v42  ;;  %v6761_v23 = vld [vmem:[%s6996_s5 + $0x30] sm:$0xff] }
 0x558   : > { %v3552_v38 = vsub.f32 %v3488_v36, %v3520_v51  ;;  %v8148_v60 = vadd.f32 %v8066_v10, %v3713_v17 }
 0x559   : > { %6709 = vrsqrt.f32 %v3615_v43  ;;  %v3310_v25 = vpop.xlane.xlu1 %3309  ;;  %v3714_v21 = vmul.f32 %v8058_v9, %v3676_v49  ;;  %v3521_v48 = vmul.f32 %v8141_v37, %v8141_v37 }
 0x55a   : > { %v3616_v28 = vadd.f32 1e-05, %v3552_v38  ;;  %v8153_v33 = vmul.f32 0.0078125, %v3310_v25  ;;  %v3437_v53 = vpop.xlane.xlu0 %3436  ;;  %v3783_v13 = vadd.f32 %v6760_v35, %v8148_v60 }
 0x55b   : > { %v6706_v8 = vpop.eup %6705  ;;  %v3489_v4 = vmul.f32 0.0078125, %v3437_v53  ;;  %6628 = vxpose.xlu1.b32.cont [5/16] (narrow) %v8931_v20, 64  ;;  %v8163_v11 = vadd.f32 %v8066_v10, %v3714_v21  ;;  %v3583_v21 = vsub.f32 %v7909_v59, %v8107_v31  ;;  %v3584_v31 = vsub.f32 %v7919_v34, %v8121_v50 }
 0x55c   : > { %6711 = vrsqrt.f32 %v3616_v28  ;;  %3815 = vst [vmem:[%s7001_s21 + $0x28] sm:$0xff] %v3783_v13  ;;  %v3677_v32 = vmul.f32 %v6706_v8, %v3581_v16  ;;  %v3522_v54 = vmul.f32 %v8153_v33, %v8153_v33 }
 0x55d   : > { %v3553_v15 = vsub.f32 %v3489_v4, %v3521_v48  ;;  %v3439_v47 = vpop.xlane.xlu1 %3438  ;;  %v3784_v52 = vadd.f32 %v6761_v23, %v8163_v11  ;;  %v8933_v48 = vpack.i.bf16 %v7219_v58, %v7331_v19 }
 0x55e   : > { %v6708_v51 = vpop.eup %6707  ;;  %v3490_v42 = vmul.f32 0.0078125, %v3439_v47  ;;  %v3312_v36 = vpop.xlane.xlu0 %3311  ;;  %v3715_v40 = vmul.f32 %v8058_v9, %v3677_v32 }
 0x55f   : > { %v3617_v17 = vadd.f32 1e-05, %v3553_v15  ;;  %v8173_v43 = vmul.f32 0.0078125, %v3312_v36  ;;  %6630 = vxpose.xlu1.b32.cont [6/16] (narrow) %v8932_v24, 64  ;;  %3816 = vst [vmem:[%s7001_s21 + $0x30] sm:$0xff] %v3784_v52  ;;  %v3678_v30 = vmul.f32 %v6708_v51, %v3582_v12  ;;  %v6763_v12 = vld [vmem:[%s6996_s5 + $0x40] sm:$0xff] }
 0x560   : > { %v3554_v7 = vsub.f32 %v3490_v42, %v3522_v54  ;;  %v8180_v49 = vadd.f32 %v8066_v10, %v3715_v40  ;;  %v8934_v54 = vpack.i.bf16 %v7228_v61, %v7328_v46 }
 0x561   : > { %6713 = vrsqrt.f32 %v3617_v17  ;;  %v3314_v38 = vpop.xlane.xlu1 %3313  ;;  %v3716_v25 = vmul.f32 %v8058_v9, %v3678_v30  ;;  %v3523_v13 = vmul.f32 %v8173_v43, %v8173_v43  ;;  %v3585_v17 = vsub.f32 %v7933_v44, %v8141_v37 }
 0x562   : > { %v3618_v16 = vadd.f32 1e-05, %v3554_v7  ;;  %v8185_v28 = vmul.f32 0.0078125, %v3314_v38  ;;  %v3441_v57 = vpop.xlane.xlu0 %3440  ;;  %v3785_v53 = vadd.f32 %v6762_v41, %v8180_v49  ;;  %v6764_v7 = vld [vmem:[%s6996_s5 + $0x48] sm:$0xff]  ;;  %v3586_v37 = vsub.f32 %v7943_v18, %v8153_v33 }
 0x563   : > { %v6710_v35 = vpop.eup %6709  ;;  %v3491_v8 = vmul.f32 0.0078125, %v3441_v57  ;;  %6632 = vxpose.xlu1.b32.cont [7/16] (narrow) %v8933_v48, 64  ;;  %v8195_v4 = vadd.f32 %v8066_v10, %v3716_v25  ;;  %v8936_v18 = vpack.i.bf16 %v7240_v1, %v7344_v29  ;;  %v6766_v29 = vld [vmem:[%s6996_s5 + $0x58] sm:$0xff] }
 0x564   : > { %6715 = vrsqrt.f32 %v3618_v16  ;;  %3817 = vst [vmem:[%s7001_s21 + $0x38] sm:$0xff] %v3785_v53  ;;  %v3679_v59 = vmul.f32 %v6710_v35, %v3583_v21  ;;  %v3524_v58 = vmul.f32 %v8185_v28, %v8185_v28  ;;  %v8935_v21 = vpack.i.bf16 %v7231_v62, %v7347_v55  ;;  %v6765_v53 = vld [vmem:[%s6996_s5 + $0x50] sm:$0xff] }
 0x565   : > { %v3555_v20 = vsub.f32 %v3491_v8, %v3523_v13  ;;  %v3443_v32 = vpop.xlane.xlu1 %3442  ;;  %v3786_v15 = vadd.f32 %v6763_v12, %v8195_v4 }
 0x566   : > { %v6712_v47 = vpop.eup %6711  ;;  %v3492_v19 = vmul.f32 0.0078125, %v3443_v32  ;;  %v8204_v23 = vpop.xlane.xlu0 %3315  ;;  %v3717_v52 = vmul.f32 %v8058_v9, %v3679_v59 }
 0x567   : > { %v3619_v51 = vadd.f32 1e-05, %v3555_v20  ;;  %6634 = vxpose.xlu1.b32.cont [8/16] (narrow) %v8934_v54, 64  ;;  %3818 = vst [vmem:[%s7001_s21 + $0x40] sm:$0xff] %v3786_v15  ;;  %v3680_v34 = vmul.f32 %v6712_v47, %v3584_v31  ;;  %v3587_v47 = vsub.f32 %v7957_v39, %v8173_v43  ;;  %v3588_v43 = vsub.f32 %v7967_v45, %v8185_v28 }
 0x568   : > { %v3556_v50 = vsub.f32 %v3492_v19, %v3524_v58  ;;  %v8212_v42 = vadd.f32 %v8066_v10, %v3717_v52  ;;  %v8938_v45 = vpack.i.bf16 %v7252_v5, %v7360_v0 }
 0x569   : > { %6717 = vrsqrt.f32 %v3619_v51  ;;  %v3320_v36 = vpop.xlane.xlu1 %3319  ;;  %v3718_v40 = vmul.f32 %v8058_v9, %v3680_v34 }
 0x56a   : > { %v3620_v24 = vadd.f32 1e-05, %v3556_v50  ;;  %v3318_v30 = vpop.xlane.xlu0 %3317  ;;  %v3787_v61 = vadd.f32 %v6764_v7, %v8212_v42  ;;  %v8219_v38 = vmul.f32 0.0078125, %v3320_v36  ;;  %v8937_v50 = vpack.i.bf16 %v7243_v2, %v7363_v3 }
 0x56b   : > { %v6714_v46 = vpop.eup %6713  ;;  %v8221_v25 = vmul.f32 0.0078125, %v3318_v30  ;;  %6636 = vxpose.xlu1.b32.cont [9/16] (narrow) %v8935_v21, 64  ;;  %v8227_v16 = vadd.f32 %v8066_v10, %v3718_v40 }
 0x56c   : > { %6719 = vrsqrt.f32 %v3620_v24  ;;  %3819 = vst [vmem:[%s7001_s21 + $0x48] sm:$0xff] %v3787_v61  ;;  %v3681_v44 = vmul.f32 %v6714_v46, %v3585_v17  ;;  %v3527_v48 = vmul.f32 %v8219_v38, %v8219_v38  ;;  %v6767_v17 = vld [vmem:[%s6996_s5 + $0x60] sm:$0xff] }
 0x56d   : > { %v3526_v57 = vmul.f32 %v8221_v25, %v8221_v25  ;;  %v3447_v41 = vpop.xlane.xlu1 %3446  ;;  %v3788_v35 = vadd.f32 %v6765_v53, %v8227_v16 }
 0x56e   : > { %v6716_v13 = vpop.eup %6715  ;;  %v3494_v62 = vmul.f32 0.0078125, %v3447_v41  ;;  %v3449_v55 = vpop.xlane.xlu0 %3448  ;;  %v3719_v8 = vmul.f32 %v8058_v9, %v3681_v44 }
 0x56f   : > { %v3495_v59 = vmul.f32 0.0078125, %v3449_v55  ;;  %6638 = vxpose.xlu1.b32.cont [10/16] (narrow) %v8936_v18, 64  ;;  %3820 = vst [vmem:[%s7001_s21 + $0x50] sm:$0xff] %v3788_v35  ;;  %v3682_v33 = vmul.f32 %v6716_v13, %v3586_v37  ;;  %v6768_v55 = vld [vmem:[%s6996_s5 + $0x68] sm:$0xff] }
 0x570   : > { %v3558_v31 = vsub.f32 %v3494_v62, %v3526_v57  ;;  %v8244_v20 = vadd.f32 %v8066_v10, %v3719_v8 }
 0x571   : > { %v3559_v32 = vsub.f32 %v3495_v59, %v3527_v48  ;;  %v3322_v12 = vpop.xlane.xlu1 %3321  ;;  %v3720_v15 = vmul.f32 %v8058_v9, %v3682_v33  ;;  %v8939_v48 = vld [vmem:[#allocation19_spill] sm:$0xff]  ;;  %v3590_v33 = vsub.f32 %v7903_v63, %v8221_v25  ;;  %v8943_v25 = vld [vmem:[#allocation18_spill] sm:$0xff] }
 0x572   : > { %v3622_v58 = vadd.f32 1e-05, %v3558_v31  ;;  %v8249_v19 = vmul.f32 0.0078125, %v3322_v12  ;;  %v3324_v1 = vpop.xlane.xlu0 %3323  ;;  %v3789_v52 = vadd.f32 %v6766_v29, %v8244_v20  ;;  %v8940_v59 = vpack.i.bf16 %v7255_v6, %v8939_v48  ;;  %v8942_v63 = vld [vmem:[#allocation15_spill] sm:$0xff] }
 0x573   : > { %v6718_v51 = vpop.eup %6717  ;;  %v3623_v54 = vadd.f32 1e-05, %v3559_v32  ;;  %v8253_v34 = vmul.f32 0.0078125, %v3324_v1  ;;  %6640 = vxpose.xlu1.b32.cont [11/16] (narrow) %v8937_v50, 64  ;;  %v8259_v36 = vadd.f32 %v8066_v10, %v3720_v15  ;;  %v6769_v32 = vld [vmem:[%s6996_s5 + $0x70] sm:$0xff]  ;;  %v8944_v50 = vpack.i.bf16 %v8942_v63, %v8943_v25 }
 0x574   : > { %6721 = vrsqrt.f32 %v3622_v58  ;;  %3821 = vst [vmem:[%s7001_s21 + $0x58] sm:$0xff] %v3789_v52  ;;  %v3683_v39 = vmul.f32 %v6718_v51, %v3587_v47  ;;  %v3528_v2 = vmul.f32 %v8249_v19, %v8249_v19  ;;  %v8941_v47 = vld [vmem:[#allocation37_spill] sm:$0xff] }
 0x575   : > { %6723 = vrsqrt.f32 %v3623_v54  ;;  %v3451_v40 = vpop.xlane.xlu1 %3450  ;;  %v3790_v24 = vadd.f32 %v6767_v17, %v8259_v36  ;;  %v3529_v46 = vmul.f32 %v8253_v34, %v8253_v34  ;;  %v3591_v58 = vsub.f32 %v8941_v47, %v8219_v38 }
 0x576   : > { %v6720_v30 = vpop.eup %6719  ;;  %v3496_v3 = vmul.f32 0.0078125, %v3451_v40  ;;  %v3453_v7 = vpop.xlane.xlu0 %3452  ;;  %v3721_v61 = vmul.f32 %v8058_v9, %v3683_v39 }
 0x577   : > { %v3497_v21 = vmul.f32 0.0078125, %v3453_v7  ;;  %6642 = vxpose.xlu1.b32.cont [12/16] (narrow) %v8938_v45, 64  ;;  %3822 = vst [vmem:[%s7001_s21 + $0x60] sm:$0xff] %v3790_v24  ;;  %v3684_v28 = vmul.f32 %v6720_v30, %v3588_v43  ;;  %v8946_v45 = vld [vmem:[#allocation21_spill] sm:$0xff] }
 0x578   : > { %v3560_v44 = vsub.f32 %v3496_v3, %v3528_v2  ;;  %v8276_v37 = vadd.f32 %v8066_v10, %v3721_v61 }
 0x579   : > { %v3561_v57 = vsub.f32 %v3497_v21, %v3529_v46  ;;  %v3326_v41 = vpop.xlane.xlu1 %3325  ;;  %v3722_v53 = vmul.f32 %v8058_v9, %v3684_v28  ;;  %v8945_v21 = vld [vmem:[#allocation16_spill] sm:$0xff] }
 0x57a   : > { %v3624_v35 = vadd.f32 1e-05, %v3560_v44  ;;  %v8279_v13 = vmul.f32 0.0078125, %v3326_v41  ;;  %v3328_v62 = vpop.xlane.xlu0 %3327  ;;  %v3791_v5 = vadd.f32 %v6768_v55, %v8276_v37  ;;  %v8947_v28 = vpack.i.bf16 %v8945_v21, %v8946_v45  ;;  %v8948_v41 = vld [vmem:[#allocation23_spill] sm:$0xff]  ;;  %v6772_v45 = vld [vmem:[%s6996_s5 + $0x90] sm:$0xff] }
 0x57b   : > { %v3625_v0 = vadd.f32 1e-05, %v3561_v57  ;;  %v8283_v8 = vmul.f32 0.0078125, %v3328_v62  ;;  %6644 = vxpose.xlu1.b32.cont [13/16] (narrow) %v8940_v59, 64  ;;  %v8289_v18 = vadd.f32 %v8066_v10, %v3722_v53  ;;  %v3592_v53 = vsub.f32 %v8948_v41, %v8249_v19 }
 0x57c   : > { %6725 = vrsqrt.f32 %v3624_v35  ;;  %3823 = vst [vmem:[%s7001_s21 + $0x68] sm:$0xff] %v3791_v5  ;;  %v3530_v6 = vmul.f32 %v8279_v13, %v8279_v13  ;;  %v8949_v35 = vld [vmem:[#allocation22_spill] sm:$0xff]  ;;  %v6770_v5 = vld [vmem:[%s6996_s5 + $0x80] sm:$0xff] }
 0x57d   : > { %6727 = vrsqrt.f32 %v3625_v0  ;;  %v3455_v31 = vpop.xlane.xlu1 %3454  ;;  %v3792_v12 = vadd.f32 %v6769_v32, %v8289_v18  ;;  %v3531_v51 = vmul.f32 %v8283_v8, %v8283_v8  ;;  %v3593_v62 = vsub.f32 %v8949_v35, %v8253_v34  ;;  %v6771_v32 = vld [vmem:[%s6996_s5 + $0x88] sm:$0xff]  ;;  %v6773_v35 = vld [vmem:[%s6996_s5 + $0x98] sm:$0xff] }
 0x57e   : > { %v6722_v15 = vpop.eup %6721  ;;  %v3498_v1 = vmul.f32 0.0078125, %v3455_v31  ;;  %v3457_v29 = vpop.xlane.xlu0 %3456 }
 0x57f   : > { %v6724_v52 = vpop.eup %6723  ;;  %v3499_v54 = vmul.f32 0.0078125, %v3457_v29  ;;  %6646 = vxpose.xlu1.b32.cont [14/16] (narrow) %v8944_v50, 64  ;;  %v3686_v39 = vmul.f32 %v6722_v15, %v3590_v33  ;;  %3824 = vst [vmem:[%s7001_s21 + $0x70] sm:$0xff] %v3792_v12  ;;  %v6359_v29 = vpack.c.bf16 %v8083_v56, %v8073_v22 }
 0x580   : > { %v3562_v43 = vsub.f32 %v3498_v1, %v3530_v6  ;;  %v3687_v40 = vmul.f32 %v6724_v52, %v3591_v58  ;;  %v8950_v58 = vld [vmem:[#allocation17_spill] sm:$0xff]  ;;  %v8951_v6 = vld [vmem:[#allocation20_spill] sm:$0xff] }
 0x581   : > { %v3563_v17 = vsub.f32 %v3499_v54, %v3531_v51  ;;  %v3330_v38 = vpop.xlane.xlu1 %3329  ;;  %v3724_v24 = vmul.f32 %v8058_v9, %v3686_v39  ;;  %v8952_v1 = vpack.i.bf16 %v8950_v58, %v8951_v6 }
 0x582   : > { %v3626_v30 = vadd.f32 1e-05, %v3562_v43  ;;  %v8307_v2 = vmul.f32 0.0078125, %v3330_v38  ;;  %v3332_v3 = vpop.xlane.xlu0 %3331  ;;  %v3725_v7 = vmul.f32 %v8058_v9, %v3687_v40 }
 0x583   : > { %v3627_v61 = vadd.f32 1e-05, %v3563_v17  ;;  %v8310_v46 = vmul.f32 0.0078125, %v3332_v3  ;;  %6648 = vxpose.xlu1.b32.cont [15/16] (narrow) %v8947_v28, 64  ;;  %v3762_v44 = vadd.f32 %v8066_v10, %v3724_v24 }
 0x584   : > { %6729 = vrsqrt.f32 %v3626_v30  ;;  %v3763_v57 = vadd.f32 %v8066_v10, %v3725_v7  ;;  %v3532_v59 = vmul.f32 %v8307_v2, %v8307_v2  ;;  %v8953_v30 = vld [vmem:[#allocation25_spill] sm:$0xff]  ;;  %v8954_v7 = vld [vmem:[#allocation24_spill] sm:$0xff] }
 0x585   : > { %6731 = vrsqrt.f32 %v3627_v61  ;;  %v3459_v55 = vpop.xlane.xlu1 %3458  ;;  %v3794_v0 = vadd.f32 %v6770_v5, %v3762_v44  ;;  %v3533_v19 = vmul.f32 %v8310_v46, %v8310_v46  ;;  %v3594_v3 = vsub.f32 %v8953_v30, %v8279_v13 }
 0x586   : > { %v6726_v48 = vpop.eup %6725  ;;  %v3500_v33 = vmul.f32 0.0078125, %v3459_v55  ;;  %v3461_v31 = vpop.xlane.xlu0 %3460  ;;  %v3795_v12 = vadd.f32 %v6771_v32, %v3763_v57  ;;  %v6357_v15 = vpack.c.bf16 %v3763_v57, %v3762_v44  ;;  %v3595_v61 = vsub.f32 %v8954_v7, %v8283_v8 }
 0x587   : > { %v6728_v47 = vpop.eup %6727  ;;  %v3501_v34 = vmul.f32 0.0078125, %v3461_v31  ;;  %6650 = vxpose.xlu1.b32.end [16/16] (narrow) %v8952_v1, 64  ;;  %3826 = vst [vmem:[%s7001_s21 + $0x80] sm:$0xff] %v3794_v0  ;;  %v3688_v52 = vmul.f32 %v6726_v48, %v3592_v53  ;;  %v6363_v8 = vpack.c.bf16 %v8115_v26, %v8102_v14  ;;  %v8955_v1 = vld [vmem:[#allocation27_spill] sm:$0xff] }
 0x588   : > { %v3564_v51 = vsub.f32 %v3500_v33, %v3532_v59  ;;  %3827 = vst [vmem:[%s7001_s21 + $0x88] sm:$0xff] %v3795_v12  ;;  %6358 = vmatprep.subr.bf16.mxu1 %v6357_v15  ;;  %v3689_v54 = vmul.f32 %v6728_v47, %v3593_v62 }
 0x589   : > { %v3565_v63 = vsub.f32 %v3501_v34, %v3533_v19  ;;  %6360 = vmatpush3.bf16.msra.mxu1 %v6359_v29  ;;  %v3334_v25 = vpop.xlane.xlu1 %3333  ;;  %v3726_v50 = vmul.f32 %v8058_v9, %v3688_v52  ;;  %v3596_v29 = vsub.f32 %v8955_v1, %v8307_v2  ;;  %v8956_v52 = vld [vmem:[#allocation26_spill] sm:$0xff] }
 0x58a   : > { %v3628_v39 = vadd.f32 1e-05, %v3564_v51  ;;  %v8335_v43 = vmul.f32 0.0078125, %v3334_v25  ;;  %v3336_v40 = vpop.xlane.xlu0 %3335  ;;  %v3727_v17 = vmul.f32 %v8058_v9, %v3689_v54  ;;  %v3597_v51 = vsub.f32 %v8956_v52, %v8310_v46 }
 0x58b   : > { %v3629_v38 = vadd.f32 1e-05, %v3565_v63  ;;  %v8338_v22 = vmul.f32 0.0078125, %v3336_v40  ;;  %v3764_v56 = vadd.f32 %v8066_v10, %v3726_v50  ;;  %v6774_v63 = vld [vmem:[%s6996_s5 + $0xa0] sm:$0xff]  ;;  %v6367_v46 = vpack.c.bf16 %v8148_v60, %v8131_v27 }
 0x58c   : > { %6733 = vrsqrt.f32 %v3628_v39  ;;  %v3765_v24 = vadd.f32 %v8066_v10, %v3727_v17  ;;  %v3534_v57 = vmul.f32 %v8335_v43, %v8335_v43 }
 0x58d   : > { %6735 = vrsqrt.f32 %v3629_v38  ;;  %v3463_v21 = vpop.xlane.xlu1 %3462  ;;  %v3796_v28 = vadd.f32 %v6772_v45, %v3764_v56  ;;  %v3535_v13 = vmul.f32 %v8338_v22, %v8338_v22  ;;  %v6775_v38 = vld [vmem:[%s6996_s5 + $0xa8] sm:$0xff] }
 0x58e   : > { %v6730_v44 = vpop.eup %6729  ;;  %v3502_v41 = vmul.f32 0.0078125, %v3463_v21  ;;  %v3465_v53 = vpop.xlane.xlu0 %3464  ;;  %v3797_v62 = vadd.f32 %v6773_v35, %v3765_v24  ;;  %v6361_v55 = vpack.c.bf16 %v3765_v24, %v3764_v56 }
 0x58f   : > { %v6732_v5 = vpop.eup %6731  ;;  %v3503_v0 = vmul.f32 0.0078125, %v3465_v53  ;;  %3828 = vst [vmem:[%s7001_s21 + $0x90] sm:$0xff] %v3796_v28  ;;  %v3690_v48 = vmul.f32 %v6730_v44, %v3594_v3 }
 0x590   : > { %v3566_v59 = vsub.f32 %v3502_v41, %v3534_v57  ;;  %3829 = vst [vmem:[%s7001_s21 + $0x98] sm:$0xff] %v3797_v62  ;;  %6362 = vmatprep.subr.bf16.mxu1 %v6361_v55  ;;  %v3691_v33 = vmul.f32 %v6732_v5, %v3595_v61  ;;  %v8957_v5 = vld [vmem:[#allocation29_spill] sm:$0xff] }
 0x591   : > { %v3567_v31 = vsub.f32 %v3503_v0, %v3535_v13  ;;  %6364 = vmatpush3.bf16.msra.mxu1 %v6363_v8  ;;  %v3338_v32 = vpop.xlane.xlu1 %3337  ;;  %v3728_v12 = vmul.f32 %v8058_v9, %v3690_v48  ;;  %v3598_v13 = vsub.f32 %v8957_v5, %v8335_v43  ;;  %v8958_v0 = vld [vmem:[#allocation28_spill] sm:$0xff] }
 0x592   : > { %v3630_v15 = vadd.f32 1e-05, %v3566_v59  ;;  %v8357_v47 = vmul.f32 0.0078125, %v3338_v32  ;;  %v3340_v19 = vpop.xlane.xlu0 %3339  ;;  %v3729_v34 = vmul.f32 %v8058_v9, %v3691_v33  ;;  %v3599_v8 = vsub.f32 %v8958_v0, %v8338_v22  ;;  %v6776_v59 = vld [vmem:[%s6996_s5 + $0xb0] sm:$0xff] }
 0x593   : > { %v3631_v58 = vadd.f32 1e-05, %v3567_v31  ;;  %v8360_v14 = vmul.f32 0.0078125, %v3340_v19  ;;  %v3766_v26 = vadd.f32 %v8066_v10, %v3728_v12  ;;  %v6777_v19 = vld [vmem:[%s6996_s5 + $0xb8] sm:$0xff]  ;;  %v6371_v22 = vpack.c.bf16 %v8180_v49, %v8163_v11 }
 0x594   : > { %6737 = vrsqrt.f32 %v3630_v15  ;;  %v3767_v6 = vadd.f32 %v8066_v10, %v3729_v34  ;;  %v3536_v39 = vmul.f32 %v8357_v47, %v8357_v47 }
 0x595   : > { %6739 = vrsqrt.f32 %v3631_v58  ;;  %v3467_v54 = vpop.xlane.xlu1 %3466  ;;  %v3798_v25 = vadd.f32 %v6774_v63, %v3766_v26  ;;  %v3537_v2 = vmul.f32 %v8360_v14, %v8360_v14 }
 0x596   : > { %v6734_v50 = vpop.eup %6733  ;;  %v3504_v40 = vmul.f32 0.0078125, %v3467_v54  ;;  %v3469_v17 = vpop.xlane.xlu0 %3468  ;;  %v3799_v56 = vadd.f32 %v6775_v38, %v3767_v6  ;;  %v6365_v24 = vpack.c.bf16 %v3767_v6, %v3766_v26  ;;  %v8408_v38 = vmul.f32 0.0078125, %v8204_v23 }
 0x597   : > { %v6736_v30 = vpop.eup %6735  ;;  %v3505_v3 = vmul.f32 0.0078125, %v3469_v17  ;;  %3830 = vst [vmem:[%s7001_s21 + $0xa0] sm:$0xff] %v3798_v25  ;;  %v3692_v7 = vmul.f32 %v6734_v50, %v3596_v29 }
 0x598   : > { %v3568_v61 = vsub.f32 %v3504_v40, %v3536_v39  ;;  %3831 = vst [vmem:[%s7001_s21 + $0xa8] sm:$0xff] %v3799_v56  ;;  %6366 = vmatprep.subr.bf16.mxu1 %v6365_v24  ;;  %v3693_v21 = vmul.f32 %v6736_v30, %v3597_v51  ;;  %v8959_v24 = vld [vmem:[#allocation31_spill] sm:$0xff] }
 0x599   : > { %v3569_v45 = vsub.f32 %v3505_v3, %v3537_v2  ;;  %6368 = vmatpush3.bf16.msra.mxu1 %v6367_v46  ;;  %v3342_v28 = vpop.xlane.xlu1 %3341  ;;  %v3730_v44 = vmul.f32 %v8058_v9, %v3692_v7  ;;  %v3600_v30 = vsub.f32 %v8959_v24, %v8357_v47  ;;  %v8960_v2 = vld [vmem:[#allocation30_spill] sm:$0xff]  ;;  %v6778_v7 = vld [vmem:[%s6996_s5 + $0xc0] sm:$0xff] }
 0x59a   : > { %v3632_v57 = vadd.f32 1e-05, %v3568_v61  ;;  %v8379_v41 = vmul.f32 0.0078125, %v3342_v28  ;;  %v3344_v53 = vpop.xlane.xlu0 %3343  ;;  %v3731_v35 = vmul.f32 %v8058_v9, %v3693_v21  ;;  %v3601_v3 = vsub.f32 %v8960_v2, %v8360_v14  ;;  %v8964_v24 = vld [vmem:[#allocation35_spill] sm:$0xff]  ;;  %v6783_v2 = vld [vmem:[%s6996_s5 + $0xe8] sm:$0xff] }
 0x59b   : > { %v3633_v62 = vadd.f32 1e-05, %v3569_v45  ;;  %v8382_v27 = vmul.f32 0.0078125, %v3344_v53  ;;  %v3768_v60 = vadd.f32 %v8066_v10, %v3730_v44  ;;  %v6779_v44 = vld [vmem:[%s6996_s5 + $0xc8] sm:$0xff]  ;;  %v6375_v14 = vpack.c.bf16 %v8212_v42, %v8195_v4 }
 0x59c   : > { %6741 = vrsqrt.f32 %v3632_v57  ;;  %v3769_v55 = vadd.f32 %v8066_v10, %v3731_v35  ;;  %v3538_v32 = vmul.f32 %v8379_v41, %v8379_v41 }
 0x59d   : > { %6743 = vrsqrt.f32 %v3633_v62  ;;  %v3471_v48 = vpop.xlane.xlu1 %3470  ;;  %v3800_v33 = vadd.f32 %v6776_v59, %v3768_v60  ;;  %v3539_v43 = vmul.f32 %v8382_v27, %v8382_v27 }
 0x59e   : > { %v6738_v31 = vpop.eup %6737  ;;  %v3506_v12 = vmul.f32 0.0078125, %v3471_v48  ;;  %v3473_v15 = vpop.xlane.xlu0 %3472  ;;  %v3801_v34 = vadd.f32 %v6777_v19, %v3769_v55  ;;  %v6369_v58 = vpack.c.bf16 %v3769_v55, %v3768_v60 }
 0x59f   : > { %v6740_v26 = vpop.eup %6739  ;;  %v3507_v6 = vmul.f32 0.0078125, %v3473_v15  ;;  %3832 = vst [vmem:[%s7001_s21 + $0xb0] sm:$0xff] %v3800_v33  ;;  %v3694_v1 = vmul.f32 %v6738_v31, %v3598_v13  ;;  %v3525_v33 = vmul.f32 %v8408_v38, %v8408_v38 }
 0x5a0   : > { %v3570_v29 = vsub.f32 %v3506_v12, %v3538_v32  ;;  %3833 = vst [vmem:[%s7001_s21 + $0xb8] sm:$0xff] %v3801_v34  ;;  %6370 = vmatprep.subr.bf16.mxu1 %v6369_v58  ;;  %v3695_v52 = vmul.f32 %v6740_v26, %v3599_v8  ;;  %v8961_v12 = vld [vmem:[#allocation33_spill] sm:$0xff] }
 0x5a1   : > { %v3571_v51 = vsub.f32 %v3507_v6, %v3539_v43  ;;  %6372 = vmatpush3.bf16.msra.mxu1 %v6371_v22  ;;  %v3346_v54 = vpop.xlane.xlu1 %3345  ;;  %v3732_v63 = vmul.f32 %v8058_v9, %v3694_v1  ;;  %v3602_v15 = vsub.f32 %v8961_v12, %v8379_v41  ;;  %v6780_v34 = vld [vmem:[%s6996_s5 + $0xd0] sm:$0xff]  ;;  %v8962_v43 = vld [vmem:[#allocation32_spill] sm:$0xff]  ;;  %v6781_v22 = vld [vmem:[%s6996_s5 + $0xd8] sm:$0xff] }
 0x5a2   : > { %v3634_v25 = vadd.f32 1e-05, %v3570_v29  ;;  %v8401_v50 = vmul.f32 0.0078125, %v3346_v54  ;;  %v3348_v39 = vpop.xlane.xlu0 %3347  ;;  %v3733_v40 = vmul.f32 %v8058_v9, %v3695_v52  ;;  %v3603_v6 = vsub.f32 %v8962_v43, %v8382_v27 }
 0x5a3   : > { %v3635_v17 = vadd.f32 1e-05, %v3571_v51  ;;  %v8404_v11 = vmul.f32 0.0078125, %v3348_v39  ;;  %v3770_v49 = vadd.f32 %v8066_v10, %v3732_v63  ;;  %v6379_v54 = vpack.c.bf16 %v8244_v20, %v8227_v16  ;;  %v6782_v20 = vld [vmem:[%s6996_s5 + $0xe0] sm:$0xff] }
 0x5a4   : > { %6745 = vrsqrt.f32 %v3634_v25  ;;  %v3771_v56 = vadd.f32 %v8066_v10, %v3733_v40  ;;  %v3540_v23 = vmul.f32 %v8401_v50, %v8401_v50 }
 0x5a5   : > { %6747 = vrsqrt.f32 %v3635_v17  ;;  %v3475_v46 = vpop.xlane.xlu1 %3474  ;;  %v3802_v61 = vadd.f32 %v6778_v7, %v3770_v49  ;;  %v3541_v47 = vmul.f32 %v8404_v11, %v8404_v11  ;;  %v8963_v17 = vld [vmem:[#allocation36_spill] sm:$0xff] }
 0x5a6   : > { %v6742_v21 = vpop.eup %6741  ;;  %v3508_v45 = vmul.f32 0.0078125, %v3475_v46  ;;  %v3477_v28 = vpop.xlane.xlu0 %3476  ;;  %v3803_v57 = vadd.f32 %v6779_v44, %v3771_v56  ;;  %v6373_v53 = vpack.c.bf16 %v3771_v56, %v3770_v49  ;;  %v3604_v16 = vsub.f32 %v8963_v17, %v8401_v50 }
 0x5a7   : > { %v6744_v35 = vpop.eup %6743  ;;  %v3509_v62 = vmul.f32 0.0078125, %v3477_v28  ;;  %3834 = vst [vmem:[%s7001_s21 + $0xc0] sm:$0xff] %v3802_v61  ;;  %v3696_v60 = vmul.f32 %v6742_v21, %v3600_v30  ;;  %v3605_v30 = vsub.f32 %v8964_v24, %v8404_v11  ;;  %v6383_v61 = vpack.c.bf16 %v8276_v37, %v8259_v36  ;;  %v8965_v11 = vld [vmem:[#allocation34_spill] sm:$0xff] }
 0x5a8   : > { %v3572_v55 = vsub.f32 %v3508_v45, %v3540_v23  ;;  %3835 = vst [vmem:[%s7001_s21 + $0xc8] sm:$0xff] %v3803_v57  ;;  %6374 = vmatprep.subr.bf16.mxu1 %v6373_v53  ;;  %v3697_v5 = vmul.f32 %v6744_v35, %v3601_v3  ;;  %v3589_v45 = vsub.f32 %v8965_v11, %v8408_v38  ;;  %v6784_v53 = vld [vmem:[%s6996_s5 + $0xf0] sm:$0xff] }
 0x5a9   : > { %v3573_v13 = vsub.f32 %v3509_v62, %v3541_v47  ;;  %6376 = vmatpush3.bf16.msra.mxu1 %v6375_v14  ;;  %v3734_v0 = vmul.f32 %v8058_v9, %v3696_v60  ;;  %v6785_v47 = vld [vmem:[%s6996_s5 + $0xf8] sm:$0xff] }
 0x5aa   : > { %v3636_v8 = vadd.f32 1e-05, %v3572_v55  ;;  %v3445_v48 = vpop.xlane.xlu0 %3444  ;;  %v3735_v59 = vmul.f32 %v8058_v9, %v3697_v5  ;;  %v6786_v55 = vld [vmem:[%s6996_s5 + $0x78] sm:$0xff] }
 0x5ab   : > { %v3637_v31 = vadd.f32 1e-05, %v3573_v13  ;;  %v3493_v4 = vmul.f32 0.0078125, %v3445_v48  ;;  %v3772_v42 = vadd.f32 %v8066_v10, %v3734_v0 }
 0x5ac   : > { %6749 = vrsqrt.f32 %v3636_v8  ;;  %v3773_v32 = vadd.f32 %v8066_v10, %v3735_v59 }
 0x5ad   : > { %6751 = vrsqrt.f32 %v3637_v31  ;;  %v3557_v19 = vsub.f32 %v3493_v4, %v3525_v33  ;;  %v3804_v58 = vadd.f32 %v6780_v34, %v3772_v42 }
 0x5ae   : > { %v6746_v26 = vpop.eup %6745  ;;  %v3805_v1 = vadd.f32 %v6781_v22, %v3773_v32  ;;  %v6377_v29 = vpack.c.bf16 %v3773_v32, %v3772_v42 }
 0x5af   : > { %v6748_v52 = vpop.eup %6747  ;;  %v3621_v51 = vadd.f32 1e-05, %v3557_v19  ;;  %3836 = vst [vmem:[%s7001_s21 + $0xd0] sm:$0xff] %v3804_v58  ;;  %v3698_v41 = vmul.f32 %v6746_v26, %v3602_v15 }
 0x5b0   : > { %3837 = vst [vmem:[%s7001_s21 + $0xd8] sm:$0xff] %v3805_v1  ;;  %6378 = vmatprep.subr.bf16.mxu1 %v6377_v29  ;;  %v3699_v63 = vmul.f32 %v6748_v52, %v3603_v6 }
 0x5b1   : > { %6753 = vrsqrt.f32 %v3621_v51  ;;  %6380 = vmatpush3.bf16.msra.mxu1 %v6379_v54  ;;  %v3736_v27 = vmul.f32 %v8058_v9, %v3698_v41  ;;  %v3842_v54 = vld [vmem:[#allocation2] sm:$0xff] }
 0x5b2   : > { %v3737_v25 = vmul.f32 %v8058_v9, %v3699_v63 }
 0x5b3   : > { %v3774_v39 = vadd.f32 %v8066_v10, %v3736_v27 }
 0x5b4   : > { %v3775_v40 = vadd.f32 %v8066_v10, %v3737_v25 }
 0x5b5   : > { %v3806_v49 = vadd.f32 %v6782_v20, %v3774_v39 }
 0x5b6   : > { %v6750_v56 = vpop.eup %6749  ;;  %v3807_v3 = vadd.f32 %v6783_v2, %v3775_v40  ;;  %v6381_v46 = vpack.c.bf16 %v3775_v40, %v3774_v39  ;;  %v3843_v39 = vld [vmem:[#allocation2 + $0x8] sm:$0xff] }
 0x5b7   : > { %v6752_v7 = vpop.eup %6751  ;;  %3838 = vst [vmem:[%s7001_s21 + $0xe0] sm:$0xff] %v3806_v49  ;;  %v3700_v21 = vmul.f32 %v6750_v56, %v3604_v16  ;;  %v3844_v49 = vld [vmem:[#allocation2 + $0x10] sm:$0xff] }
 0x5b8   : > { %3839 = vst [vmem:[%s7001_s21 + $0xe8] sm:$0xff] %v3807_v3  ;;  %6382 = vmatprep.subr.bf16.mxu1 %v6381_v46  ;;  %v3701_v50 = vmul.f32 %v6752_v7, %v3605_v30  ;;  %v3845_v3 = vld [vmem:[#allocation2 + $0x18] sm:$0xff] }
 0x5b9   : > { %6384 = vmatpush3.bf16.msra.mxu1 %v6383_v61  ;;  %v3738_v23 = vmul.f32 %v8058_v9, %v3700_v21 }
 0x5ba   : > { %v3739_v28 = vmul.f32 %v8058_v9, %v3701_v50  ;;  %v3846_v50 = vld [vmem:[#allocation2 + $0x20] sm:$0xff] }
 0x5bb   : > { %v6754_v44 = vpop.eup %6753  ;;  %v3776_v57 = vadd.f32 %v8066_v10, %v3738_v23 }
 0x5bc   : > { %v3777_v36 = vadd.f32 %v8066_v10, %v3739_v28  ;;  %v3685_v37 = vmul.f32 %v6754_v44, %v3589_v45  ;;  %v3847_v44 = vld [vmem:[#allocation2 + $0x28] sm:$0xff] }
 0x5bd   : > { %v3808_v35 = vadd.f32 %v6784_v53, %v3776_v57 }
 0x5be   : > { %v3809_v62 = vadd.f32 %v6785_v47, %v3777_v36  ;;  %v6385_v14 = vpack.c.bf16 %v3777_v36, %v3776_v57  ;;  %v3723_v60 = vmul.f32 %v8058_v9, %v3685_v37 }
 0x5bf   : > { %3840 = vst [vmem:[%s7001_s21 + $0xf0] sm:$0xff] %v3808_v35  ;;  %v3848_v35 = vld [vmem:[#allocation2 + $0x30] sm:$0xff] }
 0x5c0   : > { %3841 = vst [vmem:[%s7001_s21 + $0xf8] sm:$0xff] %v3809_v62  ;;  %6386 = vmatprep.subr.bf16.mxu1 %v6385_v14  ;;  %v3761_v38 = vadd.f32 %v8066_v10, %v3723_v60 }
 0x5c2   : > { %v3793_v5 = vadd.f32 %v6786_v55, %v3761_v38  ;;  %v6387_v13 = vpack.c.bf16 %v3761_v38, %v8289_v18  ;;  %v3849_v38 = vld [vmem:[#allocation2 + $0x38] sm:$0xff] }
 0x5c4   : > { %3825 = vst [vmem:[%s7001_s21 + $0x78] sm:$0xff] %v3793_v5  ;;  %6388 = vmatpush3.bf16.msra.mxu1 %v6387_v13 }
 0x5cb   : > { %v6651_v0 = vpop.trf.xlu1 }
 0x5cc   : > { %v6655_v8 = vunpack.i.h.bf16 %v6651_v0  ;;  %v6652_v48 = vunpack.i.l.bf16 %v6651_v0  ;;  %v4063_v0 = vld [vmem:[%s8818_s15] sm:$0xff] (!%p4979_p5) }
 0x5ce   : > { %3978 = vmatprep.mubr.f32.mxu1 %v6652_v48  ;;  %v4065_v48 = vld [vmem:[%s8818_s15 + $0x10] sm:$0xff] (!%p4979_p5) }
 0x5cf   : > { %v6656_v59 = vpop.trf.xlu1  ;;  %3979 = vmatmul.mubr.f32.vlgmr.msra.gmra.mrb[104].mxu1 %v6655_v8  ;;  %v4064_v8 = vld [vmem:[%s8818_s15 + $0x8] sm:$0xff] (!%p4979_p5) }
 0x5d0   : > { %v6657_v33 = vunpack.i.l.bf16 %v6656_v59  ;;  %v6660_v31 = vunpack.i.h.bf16 %v6656_v59  ;;  %v6389_v59 = vpack.c.bf16 (!%p4979_p5), %v4064_v8, %v4063_v0  ;;  %v4047_v0 = vld [vmem:[%s8817_s14 + $0x40] sm:$0xff] (!%p4979_p5)  ;;  %v4048_v8 = vld [vmem:[%s8817_s14 + $0x48] sm:$0xff] (!%p4979_p5) }
 0x5d2   : > { %3983 = vmatprep.mubr.f32.mxu1 %v6657_v33  ;;  %v4066_v33 = vld [vmem:[%s8818_s15 + $0x18] sm:$0xff] (!%p4979_p5)  ;;  %6390 = vmatprep.subr.bf16.mxu0 (!%p4979_p5), %v6389_v59 }
 0x5d3   : > { %v6661_v9 = vpop.trf.xlu1  ;;  %3984 = vmatmul.mubr.f32.gmra.mrb[106].mxu1 %v6660_v31  ;;  %v6393_v31 = vpack.c.bf16 (!%p4979_p5), %v4066_v33, %v4065_v48  ;;  %6392 = vmatpush3.bf16.msra.mxu0 (!%p4979_p5), %v6389_v59  ;;  %v6437_v59 = vpack.c.bf16 (!%p4979_p5), %v4048_v8, %v4047_v0  ;;  %v4049_v33 = vld [vmem:[%s8817_s14 + $0x50] sm:$0xff] (!%p4979_p5)  ;;  %v4332_v8 = vld [vmem:[%s8822_s19 + $0x58] sm:$0xff] (!%p4979_p5) }
 0x5d4   : > { %v6662_v4 = vunpack.i.l.bf16 %v6661_v9  ;;  %v6665_v42 = vunpack.i.h.bf16 %v6661_v9  ;;  %v4067_v9 = vld [vmem:[%s8818_s15 + $0x20] sm:$0xff] (!%p4979_p5)  ;;  %v4331_v0 = vld [vmem:[%s8822_s19 + $0x50] sm:$0xff] (!%p4979_p5) }
 0x5d5   : > { %6394 = vmatprep.subr.bf16.mxu0 (!%p4979_p5), %v6393_v31 }
 0x5d6   : > { %3988 = vmatprep.mubr.f32.mxu1 %v6662_v4  ;;  %v4068_v4 = vld [vmem:[%s8818_s15 + $0x28] sm:$0xff] (!%p4979_p5) }
 0x5d7   : > { %v6666_v10 = vpop.trf.xlu1  ;;  %3989 = vmatmul.mubr.f32.gmra.mrb[108].mxu1 %v6665_v42  ;;  %v6397_v42 = vpack.c.bf16 (!%p4979_p5), %v4068_v4, %v4067_v9  ;;  %6396 = vmatpush3.bf16.msra.mxu0 (!%p4979_p5), %v6393_v31  ;;  %v4050_v31 = vld [vmem:[%s8817_s14 + $0x58] sm:$0xff] (!%p4979_p5)  ;;  %v8966_v9 = vld [vmem:[#allocation7_spill] sm:$0xff] (!%p4979_p5) }
 0x5d8   : > { %v6667_v32 = vunpack.i.l.bf16 %v6666_v10  ;;  %v6670_v18 = vunpack.i.h.bf16 %v6666_v10  ;;  %v6441_v4 = vpack.c.bf16 (!%p4979_p5), %v4050_v31, %v4049_v33  ;;  %v4334_v33 = vld [vmem:[%s8822_s19 + $0x68] sm:$0xff] (!%p4979_p5) }
 0x5d9   : > { %6398 = vmatprep.subr.bf16.mxu0 (!%p4979_p5), %v6397_v42 }
 0x5da   : > { %3993 = vmatprep.mubr.f32.mxu1 %v6667_v32  ;;  %v4069_v32 = vld [vmem:[%s8818_s15 + $0x30] sm:$0xff] (!%p4979_p5) }
 0x5db   : > { %v6671_v12 = vpop.trf.xlu1  ;;  %3994 = vmatmul.mubr.f32.gmra.mrb[110].mxu1 %v6670_v18  ;;  %v4070_v18 = vld [vmem:[%s8818_s15 + $0x38] sm:$0xff] (!%p4979_p5)  ;;  %6400 = vmatpush3.bf16.msra.mxu0 (!%p4979_p5), %v6397_v42  ;;  %v4051_v42 = vld [vmem:[%s8817_s14 + $0x60] sm:$0xff] (!%p4979_p5) }
 0x5dc   : > { %v6672_v15 = vunpack.i.l.bf16 %v6671_v12  ;;  %v6675_v19 = vunpack.i.h.bf16 %v6671_v12  ;;  %v6401_v12 = vpack.c.bf16 (!%p4979_p5), %v4070_v18, %v4069_v32  ;;  %v4053_v18 = vld [vmem:[%s8817_s14 + $0x70] sm:$0xff] (!%p4979_p5) }
 0x5de   : > { %3998 = vmatprep.mubr.f32.mxu1 %v6672_v15  ;;  %v4071_v15 = vld [vmem:[%s8818_s15 + $0x40] sm:$0xff] (!%p4979_p5)  ;;  %6402 = vmatprep.subr.bf16.mxu0 (!%p4979_p5), %v6401_v12 }
 0x5df   : > { %v6676_v34 = vpop.trf.xlu1  ;;  %3999 = vmatmul.mubr.f32.gmra.mrb[112].mxu1 %v6675_v19  ;;  %v4072_v19 = vld [vmem:[%s8818_s15 + $0x48] sm:$0xff] (!%p4979_p5)  ;;  %6404 = vmatpush3.bf16.msra.mxu0 (!%p4979_p5), %v6401_v12  ;;  %v4054_v12 = vld [vmem:[%s8817_s14 + $0x78] sm:$0xff] (!%p4979_p5) }
 0x5e0   : > { %v6677_v58 = vunpack.i.l.bf16 %v6676_v34  ;;  %v6680_v26 = vunpack.i.h.bf16 %v6676_v34  ;;  %v6405_v34 = vpack.c.bf16 (!%p4979_p5), %v4072_v19, %v4071_v15  ;;  %v6449_v15 = vpack.c.bf16 (!%p4979_p5), %v4054_v12, %v4053_v18  ;;  %v8967_v19 = vld [vmem:[#allocation8_spill] sm:$0xff] (!%p4979_p5) }
 0x5e2   : > { %4003 = vmatprep.mubr.f32.mxu1 %v6677_v58  ;;  %v4073_v58 = vld [vmem:[%s8818_s15 + $0x50] sm:$0xff] (!%p4979_p5)  ;;  %6406 = vmatprep.subr.bf16.mxu0 (!%p4979_p5), %v6405_v34 }
 0x5e3   : > { %v6681_v43 = vpop.trf.xlu1  ;;  %4004 = vmatmul.mubr.f32.gmra.mrb[114].mxu1 %v6680_v26  ;;  %v4304_v26 = vld [vmem:[%s8820_s17] sm:$0xff] (!%p4979_p5)  ;;  %6408 = vmatpush3.bf16.msra.mxu0 (!%p4979_p5), %v6405_v34  ;;  %v8968_v34 = vld [vmem:[#allocation9_spill] sm:$0xff] (!%p4979_p5) }
 0x5e4   : > { %v6682_v6 = vunpack.i.l.bf16 %v6681_v43  ;;  %v6685_v22 = vunpack.i.h.bf16 %v6681_v43  ;;  %v4305_v43 = vld [vmem:[%s8820_s17 + $0x8] sm:$0xff] (!%p4979_p5) }
 0x5e6   : > { %4008 = vmatprep.mubr.f32.mxu1 %v6682_v6  ;;  %v4074_v6 = vld [vmem:[%s8818_s15 + $0x58] sm:$0xff] (!%p4979_p5) }
 0x5e7   : > { %v6686_v1 = vpop.trf.xlu1  ;;  %4009 = vmatmul.mubr.f32.gmra.mrb[116].mxu1 %v6685_v22  ;;  %v6453_v22 = vpack.c.bf16 (!%p4979_p5), %v4305_v43, %v4304_v26  ;;  %v8970_v26 = vld [vmem:[#allocation11_spill] sm:$0xff] (!%p4979_p5)  ;;  %v8971_v43 = vld [vmem:[#allocation12_spill] sm:$0xff] (!%p4979_p5) }
 0x5e8   : > { %v6690_v29 = vunpack.i.h.bf16 %v6686_v1  ;;  %v6687_v52 = vunpack.i.l.bf16 %v6686_v1  ;;  %v4306_v1 = vld [vmem:[%s8820_s17 + $0x10] sm:$0xff] (!%p4979_p5) }
 0x5e9   : > { %6454 = vmatprep.subr.bf16.mxu1 (!%p4979_p5), %v6453_v22 }
 0x5ea   : > { %4013 = vmatprep.mubr.f32.mxu1 %v6687_v52  ;;  %6456 = vmatpush3.bf16.msra.mxu1 (!%p4979_p5), %v6453_v22  ;;  %v8973_v22 = vld [vmem:[#allocation14_spill] sm:$0xff] (!%p4979_p5) }
 0x5eb   : > { %4014 = vmatmul.mubr.f32.gmra.mrb[118].mxu1 %v6690_v29  ;;  %v4307_v29 = vld [vmem:[%s8820_s17 + $0x18] sm:$0xff] (!%p4979_p5) }
 0x5ec   : > { %v6457_v52 = vpack.c.bf16 (!%p4979_p5), %v4307_v29, %v4306_v1  ;;  %v4318_v1 = vld [vmem:[%s8820_s17 + $0x70] sm:$0xff] (!%p4979_p5)  ;;  %v4319_v29 = vld [vmem:[%s8820_s17 + $0x78] sm:$0xff] (!%p4979_p5) }
 0x5ee   : > { %6458 = vmatprep.subr.bf16.mxu1 (!%p4979_p5), %v6457_v52 }
 0x5ef   : > { %6460 = vmatpush3.bf16.msra.mxu1 (!%p4979_p5), %v6457_v52  ;;  %v6481_v52 = vpack.c.bf16 (!%p4979_p5), %v4319_v29, %v4318_v1 }
 0x6a2   : > { %v5341_v51 = vpop.f32.mrb[104].mxu1 }
 0x6a3   : > { %v5342_v41 = vpop.f32.mrb[105].mxu1 }
 0x6a4   : > { %v5343_v63 = vadd.f32 %v5342_v41, %v5341_v51  ;;  %v4308_v51 = vld [vmem:[%s8820_s17 + $0x20] sm:$0xff] (!%p4979_p5)  ;;  %v6409_v41 = vpack.c.bf16 (!%p4979_p5), %v4074_v6, %v4073_v58  ;;  %v8969_v58 = vld [vmem:[#allocation10_spill] sm:$0xff] (!%p4979_p5)  ;;  %v8972_v6 = vld [vmem:[#allocation13_spill] sm:$0xff] (!%p4979_p5) }
 0x6a6   : > { %v4019_v27 = vadd.f32 %v5343_v63, %v3842_v54  ;;  %v5344_v25 = vpop.f32.mrb[106].mxu1  ;;  %v4309_v54 = vld [vmem:[%s8820_s17 + $0x28] sm:$0xff] (!%p4979_p5)  ;;  %v4075_v63 = vld [vmem:[%s8818_s15 + $0x60] sm:$0xff] (!%p4979_p5)  ;;  %6410 = vmatprep.subr.bf16.mxu0 (!%p4979_p5), %v6409_v41 }
 0x6a7   : > { %v5345_v40 = vpop.f32.mrb[107].mxu1  ;;  %6412 = vmatpush3.bf16.msra.mxu0 (!%p4979_p5), %v6409_v41 }
 0x6a8   : > { %4027 = vst [vmem:[#allocation2] sm:$0xff] %v4019_v27  ;;  %v5346_v17 = vadd.f32 %v5345_v40, %v5344_v25  ;;  %v4076_v27 = vld [vmem:[%s8818_s15 + $0x68] sm:$0xff] (!%p4979_p5)  ;;  %v6461_v25 = vpack.c.bf16 (!%p4979_p5), %v4309_v54, %v4308_v51  ;;  %v4311_v40 = vld [vmem:[%s8820_s17 + $0x38] sm:$0xff] (!%p4979_p5)  ;;  %v4321_v51 = vld [vmem:[%s8822_s19] sm:$0xff] (!%p4979_p5) }
 0x6a9   : > { %v4322_v54 = vld [vmem:[%s8822_s19 + $0x8] sm:$0xff] (!%p4979_p5) }
 0x6aa   : > { %v4020_v16 = vadd.f32 %v5346_v17, %v3843_v39  ;;  %v5347_v20 = vpop.f32.mrb[108].mxu1  ;;  %v4310_v39 = vld [vmem:[%s8820_s17 + $0x30] sm:$0xff] (!%p4979_p5)  ;;  %v6413_v17 = vpack.c.bf16 (!%p4979_p5), %v4076_v27, %v4075_v63  ;;  %6462 = vmatprep.subr.bf16.mxu1 (!%p4979_p5), %v6461_v25  ;;  %v6485_v41 = vpack.c.bf16 (!%p4979_p5), %v4322_v54, %v4321_v51  ;;  %v4980_v63 = vld [vmem:[%s8819_s16] ss:$0 sm:$0xff] (!%p4979_p5) }
 0x6ab   : > { %v5348_v56 = vpop.f32.mrb[109].mxu1  ;;  %6464 = vmatpush3.bf16.msra.mxu1 (!%p4979_p5), %v6461_v25 }
 0x6ac   : > { %4028 = vst [vmem:[#allocation2 + $0x8] sm:$0xff] %v4020_v16  ;;  %v5349_v24 = vadd.f32 %v5348_v56, %v5347_v20  ;;  %v4077_v16 = vld [vmem:[%s8818_s15 + $0x70] sm:$0xff] (!%p4979_p5)  ;;  %v4078_v20 = vld [vmem:[%s8818_s15 + $0x78] sm:$0xff] (!%p4979_p5)  ;;  %v4312_v56 = vld [vmem:[%s8820_s17 + $0x40] sm:$0xff] (!%p4979_p5)  ;;  %6414 = vmatprep.subr.bf16.mxu0 (!%p4979_p5), %v6413_v17 }
 0x6ad   : > { %6416 = vmatpush3.bf16.msra.mxu0 (!%p4979_p5), %v6413_v17  ;;  %v4323_v17 = vld [vmem:[%s8822_s19 + $0x10] sm:$0xff] (!%p4979_p5) }
 0x6ae   : > { %v4021_v30 = vadd.f32 %v5349_v24, %v3844_v49  ;;  %v5350_v2 = vpop.f32.mrb[110].mxu1  ;;  %v6465_v49 = vpack.c.bf16 (!%p4979_p5), %v4311_v40, %v4310_v39  ;;  %v4313_v24 = vld [vmem:[%s8820_s17 + $0x48] sm:$0xff] (!%p4979_p5) }
 0x6af   : > { %v5351_v46 = vpop.f32.mrb[111].mxu1  ;;  %v4055_v10 = vld [vmem:[#allocation2] sm:$0xff] (!%p4979_p5) }
 0x6b0   : > { %4029 = vst [vmem:[#allocation2 + $0x10] sm:$0xff] %v4021_v30  ;;  %v5352_v7 = vadd.f32 %v5351_v46, %v5350_v2  ;;  %6021 = vmatprep.mubr.f32.mxu0 (!%p4979_p5), %v4055_v10  ;;  %v6417_v30 = vpack.c.bf16 (!%p4979_p5), %v4078_v20, %v4077_v16  ;;  %v4039_v2 = vld [vmem:[%s8817_s14] sm:$0xff] (!%p4979_p5)  ;;  %6466 = vmatprep.subr.bf16.mxu1 (!%p4979_p5), %v6465_v49  ;;  %v4052_v10 = vld [vmem:[%s8817_s14 + $0x68] sm:$0xff] (!%p4979_p5)  ;;  %v4324_v16 = vld [vmem:[%s8822_s19 + $0x18] sm:$0xff] (!%p4979_p5) }
 0x6b1   : > { %v6469_v46 = vpack.c.bf16 (!%p4979_p5), %v4313_v24, %v4312_v56  ;;  %6468 = vmatpush3.bf16.msra.mxu1 (!%p4979_p5), %v6465_v49  ;;  %v6445_v32 = vpack.c.bf16 (!%p4979_p5), %v4052_v10, %v4051_v42  ;;  %v4336_v42 = vld [vmem:[%s8822_s19 + $0x78] sm:$0xff] (!%p4979_p5) }
 0x6b2   : > { %v4022_v61 = vadd.f32 %v5352_v7, %v3845_v3  ;;  %v5353_v21 = vpop.f32.mrb[112].mxu1  ;;  %v4040_v3 = vld [vmem:[%s8817_s14 + $0x8] sm:$0xff] (!%p4979_p5)  ;;  %v4314_v7 = vld [vmem:[%s8820_s17 + $0x50] sm:$0xff] (!%p4979_p5)  ;;  %6418 = vmatprep.subr.bf16.mxu0 (!%p4979_p5), %v6417_v30 }
 0x6b3   : > { %v5354_v23 = vpop.f32.mrb[113].mxu1  ;;  %6470 = vmatprep.subr.bf16.mxu1 (!%p4979_p5), %v6469_v46  ;;  %6420 = vmatpush3.bf16.msra.mxu0 (!%p4979_p5), %v6417_v30 }
 0x6b4   : > { %4030 = vst [vmem:[#allocation2 + $0x18] sm:$0xff] %v4022_v61  ;;  %v5355_v11 = vadd.f32 %v5354_v23, %v5353_v21  ;;  %v4315_v61 = vld [vmem:[%s8820_s17 + $0x58] sm:$0xff] (!%p4979_p5)  ;;  %v6421_v21 = vpack.c.bf16 (!%p4979_p5), %v4040_v3, %v4039_v2  ;;  %v6489_v2 = vpack.c.bf16 (!%p4979_p5), %v4324_v16, %v4323_v17 }
 0x6b5   : > { %v4042_v23 = vld [vmem:[%s8817_s14 + $0x18] sm:$0xff] (!%p4979_p5)  ;;  %6472 = vmatpush3.bf16.msra.mxu1 (!%p4979_p5), %v6469_v46  ;;  %v4325_v46 = vld [vmem:[%s8822_s19 + $0x20] sm:$0xff] (!%p4979_p5) }
 0x6b6   : > { %v4023_v45 = vadd.f32 %v5355_v11, %v3846_v50  ;;  %v5356_v28 = vpop.f32.mrb[114].mxu1  ;;  %v4041_v50 = vld [vmem:[%s8817_s14 + $0x10] sm:$0xff] (!%p4979_p5)  ;;  %v6473_v11 = vpack.c.bf16 (!%p4979_p5), %v4315_v61, %v4314_v7  ;;  %6422 = vmatprep.subr.bf16.mxu0 (!%p4979_p5), %v6421_v21  ;;  %v4326_v7 = vld [vmem:[%s8822_s19 + $0x28] sm:$0xff] (!%p4979_p5) }
 0x6b7   : > { %v5357_v57 = vpop.f32.mrb[115].mxu1 }
 0x6b8   : > { %4031 = vst [vmem:[#allocation2 + $0x20] sm:$0xff] %v4023_v45  ;;  %v5358_v36 = vadd.f32 %v5357_v57, %v5356_v28  ;;  %v4316_v45 = vld [vmem:[%s8820_s17 + $0x60] sm:$0xff] (!%p4979_p5)  ;;  %v4317_v28 = vld [vmem:[%s8820_s17 + $0x68] sm:$0xff] (!%p4979_p5)  ;;  %v6425_v57 = vpack.c.bf16 (!%p4979_p5), %v4042_v23, %v4041_v50  ;;  %6474 = vmatprep.subr.bf16.mxu1 (!%p4979_p5), %v6473_v11 }
 0x6b9   : > { %6476 = vmatpush3.bf16.msra.mxu1 (!%p4979_p5), %v6473_v11 }
 0x6ba   : > { %v4024_v37 = vadd.f32 %v5358_v36, %v3847_v44  ;;  %v5359_v53 = vpop.f32.mrb[116].mxu1  ;;  %v4056_v44 = vld [vmem:[#allocation2 + $0x8] sm:$0xff] (!%p4979_p5)  ;;  %v4057_v36 = vld [vmem:[#allocation2 + $0x10] sm:$0xff] (!%p4979_p5) }
 0x6bb   : > { %v5360_v47 = vpop.f32.mrb[117].mxu1  ;;  %6022 = vmatmul.mubr.f32.vlgmr.msra.gmra.mrb[0].mxu0 (!%p4979_p5), %v4056_v44  ;;  %v4327_v44 = vld [vmem:[%s8822_s19 + $0x30] sm:$0xff] (!%p4979_p5) }
 0x6bc   : > { %4032 = vst [vmem:[#allocation2 + $0x28] sm:$0xff] %v4024_v37  ;;  %v5361_v62 = vadd.f32 %v5360_v47, %v5359_v53  ;;  %v4043_v37 = vld [vmem:[%s8817_s14 + $0x20] sm:$0xff] (!%p4979_p5)  ;;  %v4044_v53 = vld [vmem:[%s8817_s14 + $0x28] sm:$0xff] (!%p4979_p5)  ;;  %6424 = vmatpush3.bf16.msra.mxu0 (!%p4979_p5), %v6421_v21  ;;  %6024 = vmatprep.mubr.f32.mxu0 (!%p4979_p5), %v4057_v36  ;;  %v4058_v47 = vld [vmem:[#allocation2 + $0x18] sm:$0xff] (!%p4979_p5) }
 0x6bd   : > { %6426 = vmatprep.subr.bf16.mxu0 (!%p4979_p5), %v6425_v57 }
 0x6be   : > { %v4025_v14 = vadd.f32 %v5361_v62, %v3848_v35  ;;  %v5362_v60 = vpop.f32.mrb[118].mxu1  ;;  %4038 = sbr.rel (%p4979_p5) target bundleno = 2604 (0xa2c), region = 120  ;;  %v6477_v35 = vpack.c.bf16 (!%p4979_p5), %v4317_v28, %v4316_v45  ;;  %v6429_v62 = vpack.c.bf16 (!%p4979_p5), %v4044_v53, %v4043_v37  ;;  %v6493_v45 = vpack.c.bf16 (!%p4979_p5), %v4326_v7, %v4325_v46  ;;  %v4982_v7 = vld [vmem:[%s8823_s20] ss:$0 sm:$0xff] (!%p4979_p5) }
 0x6bf   : > { %v5363_v55 = vpop.f32.mrb[119].mxu1  ;;  %6025 = vmatmul.mubr.f32.gmra.mrb[2].mxu0 (!%p4979_p5), %v4058_v47 }
 0x6c0   : > { %4033 = vst [vmem:[#allocation2 + $0x30] sm:$0xff] %v4025_v14  ;;  %v5364_v5 = vadd.f32 %v5363_v55, %v5362_v60  ;;  %v4059_v14 = vld [vmem:[#allocation2 + $0x20] sm:$0xff] (!%p4979_p5)  ;;  %v4045_v60 = vld [vmem:[%s8817_s14 + $0x30] sm:$0xff] (!%p4979_p5)  ;;  %6478 = vmatprep.subr.bf16.mxu1 (!%p4979_p5), %v6477_v35  ;;  %6428 = vmatpush3.bf16.msra.mxu0 (!%p4979_p5), %v6425_v57  ;;  %v4328_v57 = vld [vmem:[%s8822_s19 + $0x38] sm:$0xff] (!%p4979_p5) }
 0x6c1   : > { %6027 = vmatprep.mubr.f32.mxu0 (!%p4979_p5), %v4059_v14  ;;  %6430 = vmatprep.subr.bf16.mxu0 (!%p4979_p5), %v6429_v62 }
 0x6c2   : > { %v4026_v13 = vadd.f32 %v5364_v5, %v3849_v38  ;;  %v4046_v38 = vld [vmem:[%s8817_s14 + $0x38] sm:$0xff] (!%p4979_p5)  ;;  %6480 = vmatpush3.bf16.msra.mxu1 (!%p4979_p5), %v6477_v35 }
 0x6c3   : > { %v4060_v55 = vld [vmem:[#allocation2 + $0x28] sm:$0xff] (!%p4979_p5)  ;;  %v6433_v5 = vpack.c.bf16 (!%p4979_p5), %v4046_v38, %v4045_v60  ;;  %6482 = vmatprep.subr.bf16.mxu1 (!%p4979_p5), %v6481_v52  ;;  %v4329_v60 = vld [vmem:[%s8822_s19 + $0x40] sm:$0xff] (!%p4979_p5) }
 0x6c4   : > { %4034 = vst [vmem:[#allocation2 + $0x38] sm:$0xff] %v4026_v13  ;;  %6028 = vmatmul.mubr.f32.gmra.mrb[4].mxu0 (!%p4979_p5), %v4060_v55  ;;  %v4330_v38 = vld [vmem:[%s8822_s19 + $0x48] sm:$0xff] (!%p4979_p5) }
 0x6c5   : > { %6432 = vmatpush3.bf16.msra.mxu0 %v6429_v62  ;;  %v6497_v62 = vpack.c.bf16 %v4328_v57, %v4327_v44 }
 0x6c6   : > { %6434 = vmatprep.subr.bf16.mxu0 %v6433_v5  ;;  %6484 = vmatpush3.bf16.msra.mxu1 %v6481_v52 }
 0x6c7   : > { %v4061_v13 = vld [vmem:[#allocation2 + $0x30] sm:$0xff]  ;;  %6486 = vmatprep.subr.bf16.mxu1 %v6485_v41 }
 0x6c8   : > { %6030 = vmatprep.mubr.f32.mxu0 %v4061_v13  ;;  %v6501_v13 = vpack.c.bf16 %v4330_v38, %v4329_v60 }
 0x6c9   : > { %6436 = vmatpush3.bf16.msra.mxu0 %v6433_v5 }
 0x6ca   : > { %6438 = vmatprep.subr.bf16.mxu0 %v6437_v59 }
 0x6cb   : > { %v4062_v48 = vld [vmem:[#allocation2 + $0x38] sm:$0xff] }
 0x6cc   : > { %6031 = vmatmul.mubr.f32.gmra.mrb[6].mxu0 %v4062_v48  ;;  %v6505_v48 = vpack.c.bf16 %v4332_v8, %v4331_v0 }
 0x6cd   : > { %6065 = vmatprep.mubr.f32.mxu0 %v8966_v9  ;;  %6440 = vmatpush3.bf16.msra.mxu0 %v6437_v59  ;;  %v4333_v59 = vld [vmem:[%s8822_s19 + $0x60] sm:$0xff] }
 0x6ce   : > { %6442 = vmatprep.subr.bf16.mxu0 %v6441_v4  ;;  %v6509_v31 = vpack.c.bf16 %v4334_v33, %v4333_v59 }
 0x6d1   : > { %6444 = vmatpush3.bf16.msra.mxu0 %v6441_v4  ;;  %v4335_v4 = vld [vmem:[%s8822_s19 + $0x70] sm:$0xff] }
 0x6d2   : > { %6446 = vmatprep.subr.bf16.mxu0 %v6445_v32  ;;  %v6513_v10 = vpack.c.bf16 %v4336_v42, %v4335_v4 }
 0x6d5   : > { %6448 = vmatpush3.bf16.msra.mxu0 %v6445_v32  ;;  %v4981_v32 = vld [vmem:[%s8821_s18] ss:$0 sm:$0xff] }
 0x6d6   : > { %6450 = vmatprep.subr.bf16.mxu0 %v6449_v15 }
 0x6d9   : > { %6452 = vmatpush3.bf16.msra.mxu0 %v6449_v15 }
 0x6dc   : > { %6066 = vmatmul.mubr.f32.vlgmr.msra.gmra.mrb[0].mxu0 %v8967_v19 }
 0x6dd   : > { %6068 = vmatprep.mubr.f32.mxu0 %v8968_v34 }
 0x6e0   : > { %6069 = vmatmul.mubr.f32.gmra.mrb[2].mxu0 %v8969_v58 }
 0x6e1   : > { %6071 = vmatprep.mubr.f32.mxu0 %v8970_v26 }
 0x6e4   : > { %6072 = vmatmul.mubr.f32.gmra.mrb[4].mxu0 %v8971_v43 }
 0x6e5   : > { %6074 = vmatprep.mubr.f32.mxu0 %v8972_v6 }
 0x6e8   : > { %6075 = vmatmul.mubr.f32.gmra.mrb[6].mxu0 %v8973_v22 }
 0x7af   : > { %v6067_v27 = vpop.f32.mrb[0].mxu0 }
 0x7b0   : > { %v4297_v25 = vadd.f32 %v6067_v27, %v4980_v63  ;;  %v4250_v39 = vpop.f32.mrb[1].mxu0 }
 0x7b1   : > { %v4296_v40 = vadd.f32 %v4980_v63, %v4250_v39 }
 0x7b2   : > { %v4341_v56 = vmax.f32 %v4297_v25, 0.0 }
 0x7b3   : > { %v6070_v20 = vpop.f32.mrb[2].mxu0  ;;  %v4340_v49 = vmax.f32 %v4296_v40, 0.0 }
 0x7b4   : > { %v4299_v24 = vadd.f32 %v6070_v20, %v4980_v63  ;;  %v4260_v30 = vpop.f32.mrb[3].mxu0 }
 0x7b5   : > { %v4298_v3 = vadd.f32 %v4980_v63, %v4260_v30  ;;  %6109 = vmatprep.mubr.f32.mxu1 %v4340_v49 }
 0x7b6   : > { %6110 = vmatmul.mubr.f32.vlgmr.msra.gmra.mrb[0].mxu1 %v4341_v56  ;;  %v4343_v50 = vmax.f32 %v4299_v24, 0.0 }
 0x7b7   : > { %v4342_v61 = vmax.f32 %v4298_v3, 0.0  ;;  %v6073_v21 = vpop.f32.mrb[4].mxu0  ;;  %6488 = vmatpush3.bf16.msra.mxu1 %v6485_v41 }
 0x7b8   : > { %v4301_v23 = vadd.f32 %v6073_v21, %v4980_v63  ;;  %v4270_v11 = vpop.f32.mrb[5].mxu0  ;;  %6490 = vmatprep.subr.bf16.mxu1 %v6489_v2 }
 0x7b9   : > { %v4300_v28 = vadd.f32 %v4980_v63, %v4270_v11  ;;  %6112 = vmatprep.mubr.f32.mxu1 %v4342_v61 }
 0x7ba   : > { %6113 = vmatmul.mubr.f32.gmra.mrb[2].mxu1 %v4343_v50  ;;  %v4345_v53 = vmax.f32 %v4301_v23, 0.0 }
 0x7bb   : > { %v4344_v36 = vmax.f32 %v4300_v28, 0.0  ;;  %v6076_v37 = vpop.f32.mrb[6].mxu0  ;;  %6492 = vmatpush3.bf16.msra.mxu1 %v6489_v2 }
 0x7bc   : > { %v4303_v35 = vadd.f32 %v6076_v37, %v4980_v63  ;;  %v4280_v47 = vpop.f32.mrb[7].mxu0  ;;  %6494 = vmatprep.subr.bf16.mxu1 %v6493_v45 }
 0x7bd   : > { %v4302_v14 = vadd.f32 %v4980_v63, %v4280_v47  ;;  %6115 = vmatprep.mubr.f32.mxu1 %v4344_v36 }
 0x7be   : > { %6116 = vmatmul.mubr.f32.gmra.mrb[4].mxu1 %v4345_v53  ;;  %v4347_v5 = vmax.f32 %v4303_v35, 0.0 }
 0x7bf   : > { %v4346_v55 = vmax.f32 %v4302_v14, 0.0  ;;  %6496 = vmatpush3.bf16.msra.mxu1 %v6493_v45 }
 0x7c0   : > { %6498 = vmatprep.subr.bf16.mxu1 %v6497_v62 }
 0x7c1   : > { %6118 = vmatprep.mubr.f32.mxu1 %v4346_v55 }
 0x7c2   : > { %6119 = vmatmul.mubr.f32.gmra.mrb[6].mxu1 %v4347_v5 }
 0x7c3   : > { %6500 = vmatpush3.bf16.msra.mxu1 %v6497_v62 }
 0x7c4   : > { %6502 = vmatprep.subr.bf16.mxu1 %v6501_v13 }
 0x7c7   : > { %6504 = vmatpush3.bf16.msra.mxu1 %v6501_v13 }
 0x7c8   : > { %6506 = vmatprep.subr.bf16.mxu1 %v6505_v48 }
 0x7cb   : > { %6508 = vmatpush3.bf16.msra.mxu1 %v6505_v48 }
 0x7cc   : > { %6510 = vmatprep.subr.bf16.mxu1 %v6509_v31 }
 0x7cf   : > { %6512 = vmatpush3.bf16.msra.mxu1 %v6509_v31 }
 0x7d0   : > { %6514 = vmatprep.subr.bf16.mxu1 %v6513_v10 }
 0x7d3   : > { %6516 = vmatpush3.bf16.msra.mxu1 %v6513_v10 }
 0x889   : > { %v6111_v18 = vpop.f32.mrb[0].mxu1 }
 0x88a   : > { %v4426_v12 = vadd.f32 %v6111_v18, %v4981_v32  ;;  %v4420_v15 = vpop.f32.mrb[1].mxu1 }
 0x88b   : > { %v4421_v1 = vadd.f32 %v4981_v32, %v4420_v15 }
 0x88c   : > { %v4460_v51 = vmax.f32 %v4426_v12, 0.0 }
 0x88d   : > { %v4459_v29 = vmax.f32 %v4421_v1, 0.0  ;;  %v6114_v52 = vpop.f32.mrb[2].mxu1 }
 0x88e   : > { %v4436_v54 = vadd.f32 %v6114_v52, %v4981_v32  ;;  %v4430_v41 = vpop.f32.mrb[3].mxu1 }
 0x88f   : > { %v4431_v63 = vadd.f32 %v4981_v32, %v4430_v41  ;;  %6153 = vmatprep.mubr.f32.mxu1 %v4459_v29 }
 0x890   : > { %6154 = vmatmul.mubr.f32.vlgmr.msra.gmra.mrb[8].mxu1 %v4460_v51  ;;  %v4462_v39 = vmax.f32 %v4436_v54, 0.0 }
 0x891   : > { %v4461_v27 = vmax.f32 %v4431_v63, 0.0  ;;  %v6117_v25 = vpop.f32.mrb[4].mxu1 }
 0x892   : > { %v4446_v40 = vadd.f32 %v6117_v25, %v4981_v32  ;;  %v4440_v17 = vpop.f32.mrb[5].mxu1 }
 0x893   : > { %v4441_v16 = vadd.f32 %v4981_v32, %v4440_v17  ;;  %6156 = vmatprep.mubr.f32.mxu1 %v4461_v27 }
 0x894   : > { %6157 = vmatmul.mubr.f32.gmra.mrb[10].mxu1 %v4462_v39  ;;  %v4464_v56 = vmax.f32 %v4446_v40, 0.0 }
 0x895   : > { %v4463_v20 = vmax.f32 %v4441_v16, 0.0  ;;  %v6120_v49 = vpop.f32.mrb[6].mxu1 }
 0x896   : > { %v4456_v24 = vadd.f32 %v6120_v49, %v4981_v32  ;;  %v4450_v30 = vpop.f32.mrb[7].mxu1 }
 0x897   : > { %v4451_v2 = vadd.f32 %v4981_v32, %v4450_v30  ;;  %6159 = vmatprep.mubr.f32.mxu1 %v4463_v20 }
 0x898   : > { %6160 = vmatmul.mubr.f32.gmra.mrb[12].mxu1 %v4464_v56  ;;  %v4466_v46 = vmax.f32 %v4456_v24, 0.0 }
 0x899   : > { %v4465_v3 = vmax.f32 %v4451_v2, 0.0 }
 0x89b   : > { %6162 = vmatprep.mubr.f32.mxu1 %v4465_v3 }
 0x89c   : > { %6163 = vmatmul.mubr.f32.gmra.mrb[14].mxu1 %v4466_v46 }
 0x963   : > { %v6155_v61 = vpop.f32.mrb[8].mxu1 }
 0x964   : > { %v8680_v21 = vadd.f32 %v6155_v61, %v4982_v7  ;;  %v4539_v50 = vpop.f32.mrb[9].mxu1  ;;  %v8730_v61 = vld [vmem:[%s8974_s25] ss:$0 sm:$0xff] }
 0x965   : > { %v8685_v45 = vadd.f32 %v4982_v7, %v4539_v50 }
 0x966   : > { %4580 = vadd.xlane.f32.xlu0 %v8680_v21  ;;  %v4603_v23 = vmul.f32 %v8680_v21, %v8680_v21 }
 0x967   : > { %v6158_v11 = vpop.f32.mrb[10].mxu1  ;;  %v4602_v53 = vmul.f32 %v8685_v45, %v8685_v45 }
 0x968   : > { %4612 = vadd.xlane.f32.xlu1 %v4603_v23  ;;  %v4549_v28 = vpop.f32.mrb[11].mxu1  ;;  %v8687_v44 = vadd.f32 %v6158_v11, %v4982_v7 }
 0x969   : > { %v8690_v36 = vadd.f32 %v4982_v7, %v4549_v28 }
 0x96a   : > { %4578 = vadd.xlane.f32.xlu0 %v8685_v45  ;;  %v4605_v14 = vmul.f32 %v8687_v44, %v8687_v44 }
 0x96b   : > { %v6161_v57 = vpop.f32.mrb[12].mxu1  ;;  %v4604_v62 = vmul.f32 %v8690_v36, %v8690_v36 }
 0x96c   : > { %4584 = vadd.xlane.f32.xlu1 %v8687_v44  ;;  %v4559_v37 = vpop.f32.mrb[13].mxu1  ;;  %v8702_v38 = vadd.f32 %v6161_v57, %v4982_v7  ;;  %v8737_v57 = vld [vmem:[%s8975_s3] ss:$0 sm:$0xff] }
 0x96d   : > { %v8700_v60 = vadd.f32 %v4982_v7, %v4559_v37 }
 0x96e   : > { %4610 = vadd.xlane.f32.xlu0 %v4602_v53  ;;  %v4607_v5 = vmul.f32 %v8702_v38, %v8702_v38 }
 0x96f   : > { %v6164_v35 = vpop.f32.mrb[14].mxu1  ;;  %v4606_v55 = vmul.f32 %v8700_v60, %v8700_v60 }
 0x970   : > { %4582 = vadd.xlane.f32.xlu1 %v8690_v36  ;;  %v4569_v47 = vpop.f32.mrb[15].mxu1  ;;  %v8712_v0 = vadd.f32 %v6164_v35, %v4982_v7 }
 0x971   : > { %v8710_v13 = vadd.f32 %v4982_v7, %v4569_v47 }
 0x972   : > { %4614 = vadd.xlane.f32.xlu0 %v4604_v62  ;;  %v4609_v48 = vmul.f32 %v8712_v0, %v8712_v0 }
 0x973   : > { %v4608_v8 = vmul.f32 %v8710_v13, %v8710_v13 }
 0x974   : > { %4616 = vadd.xlane.f32.xlu1 %v4605_v14 }
 0x976   : > { %4586 = vadd.xlane.f32.xlu0 %v8700_v60 }
 0x978   : > { %4588 = vadd.xlane.f32.xlu1 %v8702_v38 }
 0x97a   : > { %4618 = vadd.xlane.f32.xlu0 %v4606_v55 }
 0x97c   : > { %4620 = vadd.xlane.f32.xlu1 %v4607_v5 }
 0x97e   : > { %4590 = vadd.xlane.f32.xlu0 %v8710_v13 }
 0x980   : > { %4592 = vadd.xlane.f32.xlu1 %v8712_v0 }
 0x982   : > { %4622 = vadd.xlane.f32.xlu0 %v4608_v8 }
 0x984   : > { %4624 = vadd.xlane.f32.xlu1 %v4609_v48 }
 0x9f3   : > { %v4581_v59 = vpop.xlane.xlu0 %4580 }
 0x9f4   : > { %v4595_v33 = vmul.f32 0.0078125, %v4581_v59 }
 0x9f5   : > { %v4613_v31 = vpop.xlane.xlu1 %4612 }
 0x9f6   : > { %v4635_v4 = vmul.f32 %v4595_v33, %v4595_v33  ;;  %v4627_v42 = vmul.f32 0.0078125, %v4613_v31  ;;  %v4651_v3 = vsub.f32 %v8680_v21, %v4595_v33 }
 0x9f7   : > { %v4579_v10 = vpop.xlane.xlu0 %4578 }
 0x9f8   : > { %v4643_v32 = vsub.f32 %v4627_v42, %v4635_v4  ;;  %v4594_v18 = vmul.f32 0.0078125, %v4579_v10 }
 0x9f9   : > { %v4585_v12 = vpop.xlane.xlu1 %4584 }
 0x9fa   : > { %v4659_v15 = vadd.f32 1e-05, %v4643_v32  ;;  %v4634_v29 = vmul.f32 %v4594_v18, %v4594_v18  ;;  %v8720_v54 = vmul.f32 0.0078125, %v4585_v12  ;;  %v4650_v5 = vsub.f32 %v8685_v45, %v4594_v18 }
 0x9fb   : > { %v4611_v1 = vpop.xlane.xlu0 %4610 }
 0x9fc   : > { %6787 = vrsqrt.f32 %v4659_v15  ;;  %v4626_v52 = vmul.f32 0.0078125, %v4611_v1  ;;  %v4637_v16 = vmul.f32 %v8720_v54, %v8720_v54 }
 0x9fd   : > { %v4583_v51 = vpop.xlane.xlu1 %4582 }
 0x9fe   : > { %v4642_v41 = vsub.f32 %v4626_v52, %v4634_v29  ;;  %v4596_v63 = vmul.f32 0.0078125, %v4583_v51  ;;  %v4653_v51 = vsub.f32 %v8687_v44, %v8720_v54 }
 0x9ff   : > { %v4615_v27 = vpop.xlane.xlu0 %4614 }
 0xa00   : > { %v4658_v25 = vadd.f32 1e-05, %v4642_v41  ;;  %v4636_v39 = vmul.f32 %v4596_v63, %v4596_v63  ;;  %v4628_v40 = vmul.f32 0.0078125, %v4615_v27  ;;  %v4652_v15 = vsub.f32 %v8690_v36, %v4596_v63 }
 0xa01   : > { %v4617_v17 = vpop.xlane.xlu1 %4616 }
 0xa02   : > { %6789 = vrsqrt.f32 %v4658_v25  ;;  %v4644_v20 = vsub.f32 %v4628_v40, %v4636_v39  ;;  %v4629_v49 = vmul.f32 0.0078125, %v4617_v17 }
 0xa03   : > { %v4587_v56 = vpop.xlane.xlu0 %4586 }
 0xa04   : > { %v4660_v24 = vadd.f32 1e-05, %v4644_v20  ;;  %v4645_v30 = vsub.f32 %v4629_v49, %v4637_v16  ;;  %v8724_v2 = vmul.f32 0.0078125, %v4587_v56 }
 0xa05   : > { %v4589_v46 = vpop.xlane.xlu1 %4588 }
 0xa06   : > { %v6788_v7 = vpop.eup %6787  ;;  %6791 = vrsqrt.f32 %v4660_v24  ;;  %v4661_v50 = vadd.f32 1e-05, %v4645_v30  ;;  %v8732_v11 = vmul.f32 0.0078125, %v4589_v46  ;;  %v4638_v21 = vmul.f32 %v8724_v2, %v8724_v2 }
 0xa07   : > { %v4675_v23 = vmul.f32 %v6788_v7, %v4651_v3  ;;  %v4619_v28 = vpop.xlane.xlu0 %4618  ;;  %v4654_v3 = vsub.f32 %v8700_v60, %v8724_v2 }
 0xa08   : > { %6793 = vrsqrt.f32 %v4661_v50  ;;  %v4630_v37 = vmul.f32 0.0078125, %v4619_v28  ;;  %v4639_v47 = vmul.f32 %v8732_v11, %v8732_v11  ;;  %v4655_v7 = vsub.f32 %v8702_v38, %v8732_v11 }
 0xa09   : > { %v4689_v53 = vmul.f32 %v8730_v61, %v4675_v23  ;;  %v4621_v35 = vpop.xlane.xlu1 %4620 }
 0xa0a   : > { %v4646_v62 = vsub.f32 %v4630_v37, %v4638_v21  ;;  %v4631_v14 = vmul.f32 0.0078125, %v4621_v35 }
 0xa0b   : > { %v4703_v55 = vadd.f32 %v8737_v57, %v4689_v53  ;;  %v4591_v8 = vpop.xlane.xlu0 %4590 }
 0xa0c   : > { %v6790_v48 = vpop.eup %6789  ;;  %v4662_v59 = vadd.f32 1e-05, %v4646_v62  ;;  %v4647_v33 = vsub.f32 %v4631_v14, %v4639_v47  ;;  %v4600_v31 = vmul.f32 0.0078125, %v4591_v8 }
 0xa0d   : > { %v4711_v4 = vadd.f32 %v4703_v55, %v8967_v19  ;;  %v4674_v42 = vmul.f32 %v6790_v48, %v4650_v5  ;;  %v4593_v10 = vpop.xlane.xlu1 %4592 }
 0xa0e   : > { %6795 = vrsqrt.f32 %v4662_v59  ;;  %v4663_v32 = vadd.f32 1e-05, %v4647_v33  ;;  %v4601_v1 = vmul.f32 0.0078125, %v4593_v10  ;;  %v4640_v45 = vmul.f32 %v4600_v31, %v4600_v31 }
 0xa0f   : > { %4719 = vst [vmem:[#allocation3 + $0x8] sm:$0xff] %v4711_v4  ;;  %v4688_v12 = vmul.f32 %v8730_v61, %v4674_v42  ;;  %v4623_v29 = vpop.xlane.xlu0 %4622  ;;  %v4656_v53 = vsub.f32 %v8710_v13, %v4600_v31 }
 0xa10   : > { %v6792_v52 = vpop.eup %6791  ;;  %6797 = vrsqrt.f32 %v4663_v32  ;;  %v4632_v18 = vmul.f32 0.0078125, %v4623_v29  ;;  %v4641_v39 = vmul.f32 %v4601_v1, %v4601_v1  ;;  %v4657_v11 = vsub.f32 %v8712_v0, %v4601_v1 }
 0xa11   : > { %v4702_v19 = vadd.f32 %v8737_v57, %v4688_v12  ;;  %v4676_v41 = vmul.f32 %v6792_v52, %v4652_v15  ;;  %v4625_v27 = vpop.xlane.xlu1 %4624 }
 0xa12   : > { %v6794_v25 = vpop.eup %6793  ;;  %v4648_v40 = vsub.f32 %v4632_v18, %v4640_v45  ;;  %v4633_v17 = vmul.f32 0.0078125, %v4625_v27 }
 0xa13   : > { %v4710_v16 = vadd.f32 %v4702_v19, %v8966_v9  ;;  %v4690_v36 = vmul.f32 %v8730_v61, %v4676_v41  ;;  %v4677_v63 = vmul.f32 %v6794_v25, %v4653_v51 }
 0xa14   : > { %v4664_v20 = vadd.f32 1e-05, %v4648_v40  ;;  %v4649_v49 = vsub.f32 %v4633_v17, %v4641_v39 }
 0xa15   : > { %4718 = vst [vmem:[#allocation3] sm:$0xff] %v4710_v16  ;;  %v4704_v56 = vadd.f32 %v8737_v57, %v4690_v36  ;;  %v4691_v44 = vmul.f32 %v8730_v61, %v4677_v63 }
 0xa16   : > { %6799 = vrsqrt.f32 %v4664_v20  ;;  %v4665_v54 = vadd.f32 1e-05, %v4649_v49 }
 0xa17   : > { %v4712_v24 = vadd.f32 %v4704_v56, %v8968_v34  ;;  %v4705_v30 = vadd.f32 %v8737_v57, %v4691_v44 }
 0xa18   : > { %v6796_v9 = vpop.eup %6795  ;;  %6801 = vrsqrt.f32 %v4665_v54 }
 0xa19   : > { %4720 = vst [vmem:[#allocation3 + $0x10] sm:$0xff] %v4712_v24  ;;  %v4713_v46 = vadd.f32 %v4705_v30, %v8969_v58  ;;  %v4678_v50 = vmul.f32 %v6796_v9, %v4654_v3 }
 0xa1a   : > { %v6798_v23 = vpop.eup %6797 }
 0xa1b   : > { %4721 = vst [vmem:[#allocation3 + $0x18] sm:$0xff] %v4713_v46  ;;  %v4692_v28 = vmul.f32 %v8730_v61, %v4678_v50  ;;  %v4679_v21 = vmul.f32 %v6798_v23, %v4655_v7 }
 0xa1d   : > { %v4706_v34 = vadd.f32 %v8737_v57, %v4692_v28  ;;  %v4693_v37 = vmul.f32 %v8730_v61, %v4679_v21 }
 0xa1f   : > { %v4714_v60 = vadd.f32 %v4706_v34, %v8970_v26  ;;  %v4707_v2 = vadd.f32 %v8737_v57, %v4693_v37 }
 0xa20   : > { %v6800_v58 = vpop.eup %6799 }
 0xa21   : > { %4722 = vst [vmem:[#allocation3 + $0x20] sm:$0xff] %v4714_v60  ;;  %v4715_v38 = vadd.f32 %v4707_v2, %v8971_v43  ;;  %v4680_v35 = vmul.f32 %v6800_v58, %v4656_v53 }
 0xa22   : > { %v6802_v47 = vpop.eup %6801 }
 0xa23   : > { %4723 = vst [vmem:[#allocation3 + $0x28] sm:$0xff] %v4715_v38  ;;  %v4694_v62 = vmul.f32 %v8730_v61, %v4680_v35  ;;  %v4681_v14 = vmul.f32 %v6802_v47, %v4657_v11 }
 0xa25   : > { %v4708_v55 = vadd.f32 %v8737_v57, %v4694_v62  ;;  %v4695_v26 = vmul.f32 %v8730_v61, %v4681_v14 }
 0xa27   : > { %v4716_v5 = vadd.f32 %v4708_v55, %v8972_v6  ;;  %v4709_v13 = vadd.f32 %v8737_v57, %v4695_v26 }
 0xa29   : > { %4724 = vst [vmem:[#allocation3 + $0x30] sm:$0xff] %v4716_v5  ;;  %v4717_v8 = vadd.f32 %v4709_v13, %v8973_v22 }
 0xa2b   : > { %4725 = vst [vmem:[#allocation3 + $0x38] sm:$0xff] %v4717_v8 }
 0xa2c PF: > { %p6601_p6 = scmp.eq.s32.totalorder %s6978_s26, 1  ;;  %s6844_s8 = smov [#allocation3]  }
 0xa2d   : > { %s4741_s4 = sshll.u32 %s6844_s8, 4  ;;  %s4742_s4 = int_to_ptr.vmem [resolvable:$true] %s4741_s4 }
 0xa2e   : > { %s6803_s22 = scalar_lea.vmem %s4742_s4, 1024  ;;  %p6810_p10 = scmp.lt.s32.totalorder %s4742_s4, %s4742_s4 }
 0xa2f   : > { %p6804_p7 = scmp.ne.s32.totalorder %s4742_s4, %s6803_s22  ;;  %p6811_p11 = scmp.lt.s32.totalorder %s6803_s22, %s6803_s22 }
 0xa31   : > { %p6805_p8 = pnand %p6804_p7, %p6601_p6  ;;  %p6812_p12 = por %p6811_p11, %p6810_p10 }
 0xa33   : > { %p6806_p9 = pneg %p6805_p8 }
 0xa35   : > { %p6813_p13 = pnand %p6812_p12, %p6806_p9 }
 0xa37   : > { %6816 = shalt.err (!%p6813_p13)
}
 0xa38   : > { %s8976_s5 = sld [smem:[#allocation49_spill]] }
 0xa3e   : > { %s8977_s28 = smov %s8976_s5  ;;  %s6817_s6 = scalar_lea.hbm %s8976_s5, 1024 }
 0xa3f   : > { %p6818_p0 = scmp.ne.s32.totalorder %s8977_s28, %s6817_s6  ;;  %p6823_p3 = scmp.lt.u32.totalorder %s6817_s6, %s8977_s28 }
 0xa41   : > { %p6819_p1 = pnand %p6818_p0, %p6601_p6 }
 0xa43   : > { %p6820_p2 = pneg %p6819_p1 }
 0xa45   : > { %p6825_p4 = pnand %p6823_p3, %p6820_p2 }
 0xa47   : > { %6828 = shalt.err (!%p6825_p4)
}
 0xa48   : > { %s6845_s8 = smov 128   ;;  %s6846_s22 = smov 8  }
 0xa49   : > { %6598 = dma.vmem_to_hbm [thread:$0]  (%p6601_p6), %s4742_s4, 1024, %s8977_s28, [#allocation4], %s6845_s8, %s6845_s8, %s6846_s22  }
 0xa4a   : > { %6834 = dma.done.wait (%p6601_p6), [#allocation4], 1024  }
 0xa4b   : > { %6836 = vsyncadd (%p6601_p6), [#allocation4], 4294966272 }
 0xa4c PF: > { %s8978_s5 = sld [smem:[#allocation6_spill]] }
 0xa52   : > { %s36_s5 = sadd.s32 1, %s8978_s5  }
 0xa53   : > { %p33_p5 = scmp.ge.s32.totalorder %s36_s5, 4  }
 0xa55   :  { %35 = sbr.rel (!%p33_p5) target bundleno = 14 (0xe), region = 165 }
 0xa5c   :  { %4765 = vsyncpa [#allocation4], 1 }
 0xa5d   :  { %4767 = vsyncpa [#allocation4 + $0x1], 1 }

</bundles_post_ra>
